<compile_context>
chip_gen: v5e
topology: v5e:2x2
jax: 0.10.0
libtpu: 0.0.40
codegen_flags: <defaults>
</compile_context>

<pallas_src>
import functools

import jax
import jax.numpy as jnp
from jax.experimental import pallas as pl
from jax.experimental.pallas import tpu as pltpu


# ---------------------------------------------------------------------------
# Fused matmul kernel: [BN-affine + ReLU prologue] -> bf16 MXU dot -> bias
#                      -> [tanh] -> output (+ per-tile sum / sum-sq stats)
# ---------------------------------------------------------------------------
def _mm_kernel(*refs, prologue, act, stats, m_valid, tile_m):
    it = iter(refs)
    x_ref = next(it)
    w_ref = next(it)
    b_ref = next(it)
    scale_ref = next(it) if prologue else None
    shift_ref = next(it) if prologue else None
    o_ref = next(it)
    st_ref = next(it) if stats else None

    x = x_ref[...].astype(jnp.float32)
    if prologue:
        # Fused BatchNorm affine + ReLU of the previous layer (f32 VPU math).
        x = jnp.maximum(x * scale_ref[...] + shift_ref[...], 0.0)

    y = jnp.dot(x.astype(jnp.bfloat16), w_ref[...],
                preferred_element_type=jnp.float32)
    y = y + b_ref[...]
    if act == "tanh":
        y = jnp.tanh(y)
    o_ref[...] = y.astype(o_ref.dtype)

    if stats:
        # Per-tile column sums / sums-of-squares for the next BatchNorm.
        # Rows beyond the real M (padding of the last tile) are masked out.
        row = pl.program_id(0) * tile_m + jax.lax.broadcasted_iota(
            jnp.int32, (tile_m, 1), 0)
        ym = jnp.where(row < m_valid, y, 0.0)
        st_ref[0:1, :] = jnp.sum(ym, axis=0, keepdims=True)
        st_ref[1:2, :] = jnp.sum(ym * ym, axis=0, keepdims=True)


def _pick_tile_m(m, cap=256):
    """Row tile: multiple of 8 (or the full dim when m <= 8), capped, and
    roughly m/2 so the grid has >= 2 steps (keeps both v7x TensorCores busy)."""
    if m <= 8:
        return m
    half = -(-((m + 1) // 2) // 8) * 8
    return min(cap, half)


def fused_matmul(x, w, b, scale=None, shift=None, *, act=None, stats=False,
                 out_dtype=jnp.float32, tile_cap=256):
    """out = [tanh]( relu(x*scale+shift) @ w + b ); optional per-tile stats."""
    m, k = x.shape
    kw, n = w.shape
    assert k == kw
    prologue = scale is not None

    tm = _pick_tile_m(m, tile_cap)
    grid_m = pl.cdiv(m, tm)
    m_pad = grid_m * tm
    if m_pad != m:
        x = jnp.pad(x, ((0, m_pad - m), (0, 0)))

    kernel = functools.partial(_mm_kernel, prologue=prologue, act=act,
                               stats=stats, m_valid=m, tile_m=tm)

    in_specs = [
        pl.BlockSpec((tm, k), lambda i: (i, 0)),      # activation / col tile
        pl.BlockSpec((k, n), lambda i: (0, 0)),       # resident weight
        pl.BlockSpec((1, n), lambda i: (0, 0)),       # bias row
    ]
    inputs = [x, w, b]
    if prologue:
        in_specs += [pl.BlockSpec((1, k), lambda i: (0, 0)),
                     pl.BlockSpec((1, k), lambda i: (0, 0))]
        inputs += [scale, shift]

    out_shape = [jax.ShapeDtypeStruct((m_pad, n), out_dtype)]
    out_specs = [pl.BlockSpec((tm, n), lambda i: (i, 0))]
    if stats:
        out_shape.append(jax.ShapeDtypeStruct((grid_m, 2, n), jnp.float32))
        out_specs.append(pl.BlockSpec((None, 2, n), lambda i: (i, 0, 0)))

    res = pl.pallas_call(
        kernel,
        out_shape=tuple(out_shape) if stats else out_shape[0],
        grid=(grid_m,),
        in_specs=in_specs,
        out_specs=tuple(out_specs) if stats else out_specs[0],
        compiler_params=pltpu.CompilerParams(
            dimension_semantics=("parallel",),
            vmem_limit_bytes=32 * 1024 * 1024),
    )(*inputs)

    if stats:
        out, st = res
        return out[:m], st
    return res[:m]


# ---------------------------------------------------------------------------
# BatchNorm helpers (tiny per-channel math, plain JAX)
# ---------------------------------------------------------------------------
def bn_scale_shift(stats, count, groups, gamma, beta, eps=1e-5):
    """Training-mode BN scale/shift from the fused per-tile [sum; sum_sq].

    stats: (tiles, 2, groups*C); columns grouped (group, channel)."""
    c = gamma.shape[0]
    s = stats[:, 0, :].sum(0).reshape(groups, c).sum(0)
    sq = stats[:, 1, :].sum(0).reshape(groups, c).sum(0)
    mean = s / count
    # Biased variance (what PyTorch uses to normalize).  Single-pass E[x^2]-E[x]^2
    # in f32 is fine at these magnitudes.
    var = sq / count - mean * mean
    scale = gamma / jnp.sqrt(var + eps)
    shift = beta - mean * scale
    return scale, shift


def bn_pad_value(scale, shift):
    """Per-channel v with relu(v*scale + shift) == 0, so padding the *pre*-BN
    activation with v reproduces zero-padding of the post-BN/ReLU map inside
    the next kernel's fused prologue (margin covers bf16 rounding)."""
    safe = jnp.where(scale == 0.0, 1.0, scale)
    v0 = -shift / safe
    v = v0 - jnp.sign(safe) * (0.01 * jnp.abs(v0) + 1e-3)
    # TODO(synk): gamma == 0 channels (never the case with standard BN init)
    # fall back to 0-padding, which is only exact when shift <= 0.
    return jnp.where(scale == 0.0, 0.0, v)


# ---------------------------------------------------------------------------
# ConvTranspose2d(4, 2, 1) sub-pixel / phase formulation helpers
# ---------------------------------------------------------------------------
def build_patch_cols(a, pad_val):
    """(N,H,W,C) pre-BN activation -> (N*H*W, 9*C) bf16 stride-1 3x3 patches of
    the 1-padded map; columns ordered (dy, dx, c)."""
    n, h, w, c = a.shape
    a = a.astype(jnp.bfloat16)
    base = jnp.broadcast_to(pad_val.astype(jnp.bfloat16), (n, h + 2, w + 2, c))
    padded = base.at[:, 1:h + 1, 1:w + 1, :].set(a)
    cols = [padded[:, dy:dy + h, dx:dx + w, :]
            for dy in range(3) for dx in range(3)]
    col = jnp.stack(cols, axis=3)                       # (N, H, W, 9, C)
    return col.reshape(n * h * w, 9 * c)


def depth_to_space(y, n, h, w, c):
    """(N*H*W, 4*C) phase-major matmul output -> (N, 2H, 2W, C)."""
    y = y.reshape(n, h, w, 2, 2, c)
    y = jnp.transpose(y, (0, 1, 3, 2, 4, 5))
    return y.reshape(n, 2 * h, 2 * w, c)


def _convT_phase_weight(w_t, cout_pad=None):
    """PyTorch ConvTranspose2d(k=4, s=2, p=1) weight (Cin, Cout, 4, 4) ->
    (9*Cin, 4*Cout_pad).  Rows ordered (dy, dx, cin), columns (py, px, cout).
    Output pixel (2m+py, 2n+px) = sum over the 3x3 window at base (m, n) of the
    1-padded input with kernel taps ky = 3-2*dy+py, kx = 3-2*dx+px (others 0)."""
    cin, cout = w_t.shape[0], w_t.shape[1]
    cp = cout if cout_pad is None else cout_pad
    mat = jnp.zeros((3, 3, cin, 2, 2, cp), jnp.float32)
    for py in range(2):
        for px in range(2):
            for dy in range(3):
                ky = 3 - 2 * dy + py
                if not 0 <= ky <= 3:
                    continue
                for dx in range(3):
                    kx = 3 - 2 * dx + px
                    if not 0 <= kx <= 3:
                        continue
                    mat = mat.at[dy, dx, :, py, px, :cout].set(w_t[:, :, ky, kx])
    return mat.reshape(9 * cin, 4 * cp)


def prepare_params(raw, cout4_pad=32):
    """One-time (outside jit) conversion of PyTorch-layout params into
    matmul-ready bf16 weight matrices and f32 bias rows."""
    w1, b1, g1, be1 = raw["deconv1"]
    w2, b2, g2, be2 = raw["deconv2"]
    w3, b3, g3, be3 = raw["deconv3"]
    w4, b4 = raw["deconv4"]
    cin, c1 = w1.shape[0], w1.shape[1]
    return {
        # deconv1 on a 1x1 input == dense layer; columns ordered (ky, kx, c).
        "w1": jnp.transpose(w1, (0, 2, 3, 1)).reshape(cin, 16 * c1).astype(jnp.bfloat16),
        "b1": jnp.tile(b1, 16)[None, :],
        "g1": g1, "be1": be1,
        "w2": _convT_phase_weight(w2).astype(jnp.bfloat16),
        "b2": jnp.tile(b2, 4)[None, :],
        "g2": g2, "be2": be2,
        "w3": _convT_phase_weight(w3).astype(jnp.bfloat16),
        "b3": jnp.tile(b3, 4)[None, :],
        "g3": g3, "be3": be3,
        # Final layer: pad Cout 3 -> 32 so the output block is 128 lanes wide.
        "w4": _convT_phase_weight(w4, cout_pad=cout4_pad).astype(jnp.bfloat16),
        "b4": jnp.tile(jnp.pad(b4, (0, cout4_pad - b4.shape[0])), 4)[None, :],
    }


# ---------------------------------------------------------------------------
# Generator forward
# ---------------------------------------------------------------------------
def generator_forward(p, z, label):
    n = z.shape[0]
    c1, c2, c3 = p["g1"].shape[0], p["g2"].shape[0], p["g3"].shape[0]
    cp4 = p["w4"].shape[1] // 4

    x = jnp.concatenate([z, label.reshape(n, -1)], axis=1).astype(jnp.bfloat16)

    # deconv1: 1x1 -> 4x4 (dense matmul), batch stats fused into the kernel.
    a1, st1 = fused_matmul(x, p["w1"], p["b1"], stats=True, out_dtype=jnp.bfloat16)
    sc1, sh1 = bn_scale_shift(st1, count=n * 16, groups=16,
                              gamma=p["g1"], beta=p["be1"])
    a1 = a1.reshape(n, 4, 4, c1)

    # deconv2: 4x4 -> 8x8; BN1 affine + ReLU fused as the matmul prologue.
    col = build_patch_cols(a1, bn_pad_value(sc1, sh1))
    a2, st2 = fused_matmul(col, p["w2"], p["b2"],
                           scale=jnp.tile(sc1, 9)[None, :],
                           shift=jnp.tile(sh1, 9)[None, :],
                           stats=True, out_dtype=jnp.bfloat16)
    sc2, sh2 = bn_scale_shift(st2, count=n * 8 * 8, groups=4,
                              gamma=p["g2"], beta=p["be2"])
    a2 = depth_to_space(a2, n, 4, 4, c2)

    # deconv3: 8x8 -> 16x16
    col = build_patch_cols(a2, bn_pad_value(sc2, sh2))
    a3, st3 = fused_matmul(col, p["w3"], p["b3"],
                           scale=jnp.tile(sc2, 9)[None, :],
                           shift=jnp.tile(sh2, 9)[None, :],
                           stats=True, out_dtype=jnp.bfloat16)
    sc3, sh3 = bn_scale_shift(st3, count=n * 16 * 16, groups=4,
                              gamma=p["g3"], beta=p["be3"])
    a3 = depth_to_space(a3, n, 8, 8, c3)

    # deconv4: 16x16 -> 32x32, BN3+ReLU prologue and tanh fused in-kernel.
    col = build_patch_cols(a3, bn_pad_value(sc3, sh3))
    y = fused_matmul(col, p["w4"], p["b4"],
                     scale=jnp.tile(sc3, 9)[None, :],
                     shift=jnp.tile(sh3, 9)[None, :],
                     act="tanh", stats=False, out_dtype=jnp.float32)
    y = depth_to_space(y, n, 16, 16, cp4)[..., :3]
    return jnp.transpose(y, (0, 3, 1, 2))               # NCHW (N, 3, 32, 32)


# ---------------------------------------------------------------------------
# Deterministic parameter init (gaussian_weights_init: Conv* weights ~ N(0, 0.02))
# ---------------------------------------------------------------------------
def init_params(key, nz, class_num, d):
    ks = jax.random.split(key, 8)
    cin = nz + class_num

    def w(k, shape):
        return 0.02 * jax.random.normal(k, shape, jnp.float32)

    return {
        # (ConvTranspose2d weight (Cin, Cout, 4, 4), bias, bn_gamma, bn_beta)
        "deconv1": (w(ks[0], (cin, d * 4, 4, 4)), w(ks[1], (d * 4,)),
                    jnp.ones((d * 4,), jnp.float32), jnp.zeros((d * 4,), jnp.float32)),
        "deconv2": (w(ks[2], (d * 4, d * 2, 4, 4)), w(ks[3], (d * 2,)),
                    jnp.ones((d * 2,), jnp.float32), jnp.zeros((d * 2,), jnp.float32)),
        "deconv3": (w(ks[4], (d * 2, d, 4, 4)), w(ks[5], (d,)),
                    jnp.ones((d,), jnp.float32), jnp.zeros((d,), jnp.float32)),
        "deconv4": (w(ks[6], (d, 3, 4, 4)), w(ks[7], (3,))),
    }


if __name__ == "__main__":
    nz, class_num, d, batch = 8, 4, 32, 2   # small synthetic config
    key = jax.random.PRNGKey(0)
    kp, kz, kl = jax.random.split(key, 3)
    raw = init_params(kp, nz, class_num, d)
    params = prepare_params(raw)            # weight layout conversion, done once
    z = jax.random.normal(kz, (batch, nz), jnp.float32)
    label = jax.random.normal(kl, (batch, class_num, 1, 1), jnp.float32)

    fwd = jax.jit(generator_forward)
    out = jax.block_until_ready(fwd(params, z, label))
    assert out.shape == (batch, 3, 32, 32), out.shape
    assert bool(jnp.all(jnp.isfinite(out)))
    print("KERNEL_OK")
</pallas_src>

<mosaic_0001>
module attributes {stable_mosaic.version = 11 : i64} {
  func.func @_mm_kernel(%arg0: i32, %arg1: memref<2x12xbf16, #tpu.memory_space<vmem>>, %arg2: memref<12x2048xbf16, #tpu.memory_space<vmem>>, %arg3: memref<1x2048xf32, #tpu.memory_space<vmem>>, %arg4: memref<2x2048xbf16, #tpu.memory_space<vmem>>, %arg5: memref<1x2x2048xf32, #tpu.memory_space<vmem>>) attributes {dimension_semantics = [#tpu.dimension_semantics<parallel>], iteration_bounds = array<i64: 1>, scalar_prefetch = 0 : i64, scratch_operands = 0 : i64, tpu.core_type = #tpu.core_type<tc>, window_params = [{transform_indices = @transform_0, window_bounds = array<i64: 2, 12>}, {pipeline_mode = #tpu.pipeline_mode<synchronous>, transform_indices = @transform_1, window_bounds = array<i64: 12, 2048>}, {pipeline_mode = #tpu.pipeline_mode<synchronous>, transform_indices = @transform_2, window_bounds = array<i64: 1, 2048>}, {transform_indices = @transform_3, window_bounds = array<i64: 2, 2048>}, {transform_indices = @transform_4, window_bounds = array<i64: 1, 2, 2048>}]} {
    %c0 = arith.constant 0 : index
    %c0_0 = arith.constant 0 : index
    %0 = vector.load %arg1[%c0, %c0_0] : memref<2x12xbf16, #tpu.memory_space<vmem>>, vector<2x12xbf16>
    %1 = arith.extf %0 : vector<2x12xbf16> to vector<2x12xf32>
    %2 = arith.truncf %1 : vector<2x12xf32> to vector<2x12xbf16>
    %c0_1 = arith.constant 0 : index
    %c0_2 = arith.constant 0 : index
    %3 = vector.load %arg2[%c0_1, %c0_2] : memref<12x2048xbf16, #tpu.memory_space<vmem>>, vector<12x2048xbf16>
    %cst = arith.constant dense<0.000000e+00> : vector<2x2048xf32>
    %4 = tpu.matmul %2, %3, %cst {dimension_numbers = #tpu.dot_dimension_numbers<[1], [0], [0], [1], [0, 0, 1, 1], [], []>} : vector<2x12xbf16>, vector<12x2048xbf16>, vector<2x2048xf32> -> vector<2x2048xf32>
    %c0_3 = arith.constant 0 : index
    %c0_4 = arith.constant 0 : index
    %5 = vector.load %arg3[%c0_3, %c0_4] : memref<1x2048xf32, #tpu.memory_space<vmem>>, vector<1x2048xf32>
    %6 = vector.broadcast %5 : vector<1x2048xf32> to vector<2x2048xf32>
    %7 = arith.addf %4, %6 : vector<2x2048xf32>
    %8 = arith.truncf %7 : vector<2x2048xf32> to vector<2x2048xbf16>
    %c0_5 = arith.constant 0 : index
    %c0_6 = arith.constant 0 : index
    %9 = vector.load %arg4[%c0_5, %c0_6] : memref<2x2048xbf16, #tpu.memory_space<vmem>>, vector<2x2048xbf16>
    tpu.vector_store %arg4[%c0_5, %c0_6], %8 {strides = array<i32>} : memref<2x2048xbf16, #tpu.memory_space<vmem>>, vector<2x2048xbf16>,
    %c2_i32 = arith.constant 2 : i32
    %10 = arith.muli %arg0, %c2_i32 : i32
    %11 = tpu.iota {dimensions = array<i32: 0>} : vector<2x1xi32>
    %12 = vector.broadcast %10 : i32 to vector<2x1xi32>
    %13 = arith.addi %12, %11 : vector<2x1xi32>
    %c2_i32_7 = arith.constant 2 : i32
    %14 = vector.broadcast %c2_i32_7 : i32 to vector<2x1xi32>
    %15 = arith.cmpi slt, %13, %14 : vector<2x1xi32>
    %cst_8 = arith.constant 0.000000e+00 : f32
    %16 = vector.shape_cast %15 : vector<2x1xi1> to vector<2x1xi1>
    %17 = vector.broadcast %16 : vector<2x1xi1> to vector<2x2048xi1>
    %18 = vector.broadcast %cst_8 : f32 to vector<2x2048xf32>
    %19 = arith.select %17, %7, %18 : vector<2x2048xi1>, vector<2x2048xf32>
    %cst_9 = arith.constant dense<0.000000e+00> : vector<2048xf32>
    %20 = vector.multi_reduction <add>, %19, %cst_9 [0] : vector<2x2048xf32> to vector<2048xf32>
    %21 = vector.shape_cast %20 : vector<2048xf32> to vector<1x2048xf32>
    %c0_10 = arith.constant 0 : index
    %c0_11 = arith.constant 0 : index
    %c0_12 = arith.constant 0 : index
    %22 = vector.load %arg5[%c0_10, %c0_11, %c0_12] : memref<1x2x2048xf32, #tpu.memory_space<vmem>>, vector<1x1x2048xf32>
    %23 = vector.shape_cast %22 : vector<1x1x2048xf32> to vector<1x2048xf32>
    %24 = vector.shape_cast %21 : vector<1x2048xf32> to vector<1x1x2048xf32>
    tpu.vector_store %arg5[%c0_10, %c0_11, %c0_12], %24 {strides = array<i32>} : memref<1x2x2048xf32, #tpu.memory_space<vmem>>, vector<1x1x2048xf32>,
    %25 = arith.mulf %19, %19 : vector<2x2048xf32>
    %cst_13 = arith.constant dense<0.000000e+00> : vector<2048xf32>
    %26 = vector.multi_reduction <add>, %25, %cst_13 [0] : vector<2x2048xf32> to vector<2048xf32>
    %27 = vector.shape_cast %26 : vector<2048xf32> to vector<1x2048xf32>
    %c0_14 = arith.constant 0 : index
    %c1 = arith.constant 1 : index
    %c0_15 = arith.constant 0 : index
    %28 = vector.load %arg5[%c0_14, %c1, %c0_15] : memref<1x2x2048xf32, #tpu.memory_space<vmem>>, vector<1x1x2048xf32>
    %29 = vector.shape_cast %28 : vector<1x1x2048xf32> to vector<1x2048xf32>
    %30 = vector.shape_cast %27 : vector<1x2048xf32> to vector<1x1x2048xf32>
    tpu.vector_store %arg5[%c0_14, %c1, %c0_15], %30 {strides = array<i32>} : memref<1x2x2048xf32, #tpu.memory_space<vmem>>, vector<1x1x2048xf32>,
    return
  }
  func.func @transform_0(%arg0: i32) -> (i32, i32) {
    %c0_i32 = arith.constant 0 : i32
    %c0_i32_0 = arith.constant 0 : i32
    return %arg0, %c0_i32 : i32, i32
  }
  func.func @transform_1(%arg0: i32) -> (i32, i32) {
    %c0_i32 = arith.constant 0 : i32
    %c0_i32_0 = arith.constant 0 : i32
    %c0_i32_1 = arith.constant 0 : i32
    return %c0_i32, %c0_i32_0 : i32, i32
  }
  func.func @transform_2(%arg0: i32) -> (i32, i32) {
    %c0_i32 = arith.constant 0 : i32
    %c0_i32_0 = arith.constant 0 : i32
    %c0_i32_1 = arith.constant 0 : i32
    return %c0_i32, %c0_i32_0 : i32, i32
  }
  func.func @transform_3(%arg0: i32) -> (i32, i32) {
    %c0_i32 = arith.constant 0 : i32
    %c0_i32_0 = arith.constant 0 : i32
    return %arg0, %c0_i32 : i32, i32
  }
  func.func @transform_4(%arg0: i32) -> (i32, i32, i32) {
    %c0_i32 = arith.constant 0 : i32
    %c0_i32_0 = arith.constant 0 : i32
    %c0_i32_1 = arith.constant 0 : i32
    return %arg0, %c0_i32, %c0_i32_0 : i32, i32, i32
  }
}

module attributes {stable_mosaic.version = 11 : i64} {
  func.func @_mm_kernel(%arg0: i32, %arg1: memref<16x1152xbf16, #tpu.memory_space<vmem>>, %arg2: memref<1152x256xbf16, #tpu.memory_space<vmem>>, %arg3: memref<1x256xf32, #tpu.memory_space<vmem>>, %arg4: memref<1x1152xf32, #tpu.memory_space<vmem>>, %arg5: memref<1x1152xf32, #tpu.memory_space<vmem>>, %arg6: memref<16x256xbf16, #tpu.memory_space<vmem>>, %arg7: memref<1x2x256xf32, #tpu.memory_space<vmem>>) attributes {dimension_semantics = [#tpu.dimension_semantics<parallel>], iteration_bounds = array<i64: 2>, scalar_prefetch = 0 : i64, scratch_operands = 0 : i64, tpu.core_type = #tpu.core_type<tc>, window_params = [{transform_indices = @transform_0, window_bounds = array<i64: 16, 1152>}, {pipeline_mode = #tpu.pipeline_mode<synchronous>, transform_indices = @transform_1, window_bounds = array<i64: 1152, 256>}, {pipeline_mode = #tpu.pipeline_mode<synchronous>, transform_indices = @transform_2, window_bounds = array<i64: 1, 256>}, {pipeline_mode = #tpu.pipeline_mode<synchronous>, transform_indices = @transform_3, window_bounds = array<i64: 1, 1152>}, {pipeline_mode = #tpu.pipeline_mode<synchronous>, transform_indices = @transform_4, window_bounds = array<i64: 1, 1152>}, {transform_indices = @transform_5, window_bounds = array<i64: 16, 256>}, {transform_indices = @transform_6, window_bounds = array<i64: 1, 2, 256>}]} {
    %c0 = arith.constant 0 : index
    %c0_0 = arith.constant 0 : index
    %0 = vector.load %arg1[%c0, %c0_0] : memref<16x1152xbf16, #tpu.memory_space<vmem>>, vector<16x1152xbf16>
    %1 = arith.extf %0 : vector<16x1152xbf16> to vector<16x1152xf32>
    %c0_1 = arith.constant 0 : index
    %c0_2 = arith.constant 0 : index
    %2 = vector.load %arg4[%c0_1, %c0_2] : memref<1x1152xf32, #tpu.memory_space<vmem>>, vector<1x1152xf32>
    %3 = vector.broadcast %2 : vector<1x1152xf32> to vector<16x1152xf32>
    %4 = arith.mulf %1, %3 : vector<16x1152xf32>
    %c0_3 = arith.constant 0 : index
    %c0_4 = arith.constant 0 : index
    %5 = vector.load %arg5[%c0_3, %c0_4] : memref<1x1152xf32, #tpu.memory_space<vmem>>, vector<1x1152xf32>
    %6 = vector.broadcast %5 : vector<1x1152xf32> to vector<16x1152xf32>
    %7 = arith.addf %4, %6 : vector<16x1152xf32>
    %cst = arith.constant 0.000000e+00 : f32
    %8 = vector.broadcast %cst : f32 to vector<16x1152xf32>
    %9 = arith.maximumf %7, %8 : vector<16x1152xf32>
    %10 = arith.truncf %9 : vector<16x1152xf32> to vector<16x1152xbf16>
    %c0_5 = arith.constant 0 : index
    %c0_6 = arith.constant 0 : index
    %11 = vector.load %arg2[%c0_5, %c0_6] : memref<1152x256xbf16, #tpu.memory_space<vmem>>, vector<1152x256xbf16>
    %cst_7 = arith.constant dense<0.000000e+00> : vector<16x256xf32>
    %12 = tpu.matmul %10, %11, %cst_7 {dimension_numbers = #tpu.dot_dimension_numbers<[1], [0], [0], [1], [0, 0, 1, 1], [], []>} : vector<16x1152xbf16>, vector<1152x256xbf16>, vector<16x256xf32> -> vector<16x256xf32>
    %c0_8 = arith.constant 0 : index
    %c0_9 = arith.constant 0 : index
    %13 = vector.load %arg3[%c0_8, %c0_9] : memref<1x256xf32, #tpu.memory_space<vmem>>, vector<1x256xf32>
    %14 = vector.broadcast %13 : vector<1x256xf32> to vector<16x256xf32>
    %15 = arith.addf %12, %14 : vector<16x256xf32>
    %16 = arith.truncf %15 : vector<16x256xf32> to vector<16x256xbf16>
    %c0_10 = arith.constant 0 : index
    %c0_11 = arith.constant 0 : index
    %17 = vector.load %arg6[%c0_10, %c0_11] : memref<16x256xbf16, #tpu.memory_space<vmem>>, vector<16x256xbf16>
    tpu.vector_store %arg6[%c0_10, %c0_11], %16 {strides = array<i32>} : memref<16x256xbf16, #tpu.memory_space<vmem>>, vector<16x256xbf16>,
    %c16_i32 = arith.constant 16 : i32
    %18 = arith.muli %arg0, %c16_i32 : i32
    %19 = tpu.iota {dimensions = array<i32: 0>} : vector<16x1xi32>
    %20 = vector.broadcast %18 : i32 to vector<16x1xi32>
    %21 = arith.addi %20, %19 : vector<16x1xi32>
    %c32_i32 = arith.constant 32 : i32
    %22 = vector.broadcast %c32_i32 : i32 to vector<16x1xi32>
    %23 = arith.cmpi slt, %21, %22 : vector<16x1xi32>
    %cst_12 = arith.constant 0.000000e+00 : f32
    %24 = vector.shape_cast %23 : vector<16x1xi1> to vector<16x1xi1>
    %25 = vector.broadcast %24 : vector<16x1xi1> to vector<16x256xi1>
    %26 = vector.broadcast %cst_12 : f32 to vector<16x256xf32>
    %27 = arith.select %25, %15, %26 : vector<16x256xi1>, vector<16x256xf32>
    %cst_13 = arith.constant dense<0.000000e+00> : vector<256xf32>
    %28 = vector.multi_reduction <add>, %27, %cst_13 [0] : vector<16x256xf32> to vector<256xf32>
    %29 = vector.shape_cast %28 : vector<256xf32> to vector<1x256xf32>
    %c0_14 = arith.constant 0 : index
    %c0_15 = arith.constant 0 : index
    %c0_16 = arith.constant 0 : index
    %30 = vector.load %arg7[%c0_14, %c0_15, %c0_16] : memref<1x2x256xf32, #tpu.memory_space<vmem>>, vector<1x1x256xf32>
    %31 = vector.shape_cast %30 : vector<1x1x256xf32> to vector<1x256xf32>
    %32 = vector.shape_cast %29 : vector<1x256xf32> to vector<1x1x256xf32>
    tpu.vector_store %arg7[%c0_14, %c0_15, %c0_16], %32 {strides = array<i32>} : memref<1x2x256xf32, #tpu.memory_space<vmem>>, vector<1x1x256xf32>,
    %33 = arith.mulf %27, %27 : vector<16x256xf32>
    %cst_17 = arith.constant dense<0.000000e+00> : vector<256xf32>
    %34 = vector.multi_reduction <add>, %33, %cst_17 [0] : vector<16x256xf32> to vector<256xf32>
    %35 = vector.shape_cast %34 : vector<256xf32> to vector<1x256xf32>
    %c0_18 = arith.constant 0 : index
    %c1 = arith.constant 1 : index
    %c0_19 = arith.constant 0 : index
    %36 = vector.load %arg7[%c0_18, %c1, %c0_19] : memref<1x2x256xf32, #tpu.memory_space<vmem>>, vector<1x1x256xf32>
    %37 = vector.shape_cast %36 : vector<1x1x256xf32> to vector<1x256xf32>
    %38 = vector.shape_cast %35 : vector<1x256xf32> to vector<1x1x256xf32>
    tpu.vector_store %arg7[%c0_18, %c1, %c0_19], %38 {strides = array<i32>} : memref<1x2x256xf32, #tpu.memory_space<vmem>>, vector<1x1x256xf32>,
    return
  }
  func.func @transform_0(%arg0: i32) -> (i32, i32) {
    %c0_i32 = arith.constant 0 : i32
    %c0_i32_0 = arith.constant 0 : i32
    return %arg0, %c0_i32 : i32, i32
  }
  func.func @transform_1(%arg0: i32) -> (i32, i32) {
    %c0_i32 = arith.constant 0 : i32
    %c0_i32_0 = arith.constant 0 : i32
    %c0_i32_1 = arith.constant 0 : i32
    return %c0_i32, %c0_i32_0 : i32, i32
  }
  func.func @transform_2(%arg0: i32) -> (i32, i32) {
    %c0_i32 = arith.constant 0 : i32
    %c0_i32_0 = arith.constant 0 : i32
    %c0_i32_1 = arith.constant 0 : i32
    return %c0_i32, %c0_i32_0 : i32, i32
  }
  func.func @transform_3(%arg0: i32) -> (i32, i32) {
    %c0_i32 = arith.constant 0 : i32
    %c0_i32_0 = arith.constant 0 : i32
    %c0_i32_1 = arith.constant 0 : i32
    return %c0_i32, %c0_i32_0 : i32, i32
  }
  func.func @transform_4(%arg0: i32) -> (i32, i32) {
    %c0_i32 = arith.constant 0 : i32
    %c0_i32_0 = arith.constant 0 : i32
    %c0_i32_1 = arith.constant 0 : i32
    return %c0_i32, %c0_i32_0 : i32, i32
  }
  func.func @transform_5(%arg0: i32) -> (i32, i32) {
    %c0_i32 = arith.constant 0 : i32
    %c0_i32_0 = arith.constant 0 : i32
    return %arg0, %c0_i32 : i32, i32
  }
  func.func @transform_6(%arg0: i32) -> (i32, i32, i32) {
    %c0_i32 = arith.constant 0 : i32
    %c0_i32_0 = arith.constant 0 : i32
    %c0_i32_1 = arith.constant 0 : i32
    return %arg0, %c0_i32, %c0_i32_0 : i32, i32, i32
  }
}

module attributes {stable_mosaic.version = 11 : i64} {
  func.func @_mm_kernel(%arg0: i32, %arg1: memref<64x576xbf16, #tpu.memory_space<vmem>>, %arg2: memref<576x128xbf16, #tpu.memory_space<vmem>>, %arg3: memref<1x128xf32, #tpu.memory_space<vmem>>, %arg4: memref<1x576xf32, #tpu.memory_space<vmem>>, %arg5: memref<1x576xf32, #tpu.memory_space<vmem>>, %arg6: memref<64x128xbf16, #tpu.memory_space<vmem>>, %arg7: memref<1x2x128xf32, #tpu.memory_space<vmem>>) attributes {dimension_semantics = [#tpu.dimension_semantics<parallel>], iteration_bounds = array<i64: 2>, scalar_prefetch = 0 : i64, scratch_operands = 0 : i64, tpu.core_type = #tpu.core_type<tc>, window_params = [{transform_indices = @transform_0, window_bounds = array<i64: 64, 576>}, {pipeline_mode = #tpu.pipeline_mode<synchronous>, transform_indices = @transform_1, window_bounds = array<i64: 576, 128>}, {pipeline_mode = #tpu.pipeline_mode<synchronous>, transform_indices = @transform_2, window_bounds = array<i64: 1, 128>}, {pipeline_mode = #tpu.pipeline_mode<synchronous>, transform_indices = @transform_3, window_bounds = array<i64: 1, 576>}, {pipeline_mode = #tpu.pipeline_mode<synchronous>, transform_indices = @transform_4, window_bounds = array<i64: 1, 576>}, {transform_indices = @transform_5, window_bounds = array<i64: 64, 128>}, {transform_indices = @transform_6, window_bounds = array<i64: 1, 2, 128>}]} {
    %c0 = arith.constant 0 : index
    %c0_0 = arith.constant 0 : index
    %0 = vector.load %arg1[%c0, %c0_0] : memref<64x576xbf16, #tpu.memory_space<vmem>>, vector<64x576xbf16>
    %1 = arith.extf %0 : vector<64x576xbf16> to vector<64x576xf32>
    %c0_1 = arith.constant 0 : index
    %c0_2 = arith.constant 0 : index
    %2 = vector.load %arg4[%c0_1, %c0_2] : memref<1x576xf32, #tpu.memory_space<vmem>>, vector<1x576xf32>
    %3 = vector.broadcast %2 : vector<1x576xf32> to vector<64x576xf32>
    %4 = arith.mulf %1, %3 : vector<64x576xf32>
    %c0_3 = arith.constant 0 : index
    %c0_4 = arith.constant 0 : index
    %5 = vector.load %arg5[%c0_3, %c0_4] : memref<1x576xf32, #tpu.memory_space<vmem>>, vector<1x576xf32>
    %6 = vector.broadcast %5 : vector<1x576xf32> to vector<64x576xf32>
    %7 = arith.addf %4, %6 : vector<64x576xf32>
    %cst = arith.constant 0.000000e+00 : f32
    %8 = vector.broadcast %cst : f32 to vector<64x576xf32>
    %9 = arith.maximumf %7, %8 : vector<64x576xf32>
    %10 = arith.truncf %9 : vector<64x576xf32> to vector<64x576xbf16>
    %c0_5 = arith.constant 0 : index
    %c0_6 = arith.constant 0 : index
    %11 = vector.load %arg2[%c0_5, %c0_6] : memref<576x128xbf16, #tpu.memory_space<vmem>>, vector<576x128xbf16>
    %cst_7 = arith.constant dense<0.000000e+00> : vector<64x128xf32>
    %12 = tpu.matmul %10, %11, %cst_7 {dimension_numbers = #tpu.dot_dimension_numbers<[1], [0], [0], [1], [0, 0, 1, 1], [], []>} : vector<64x576xbf16>, vector<576x128xbf16>, vector<64x128xf32> -> vector<64x128xf32>
    %c0_8 = arith.constant 0 : index
    %c0_9 = arith.constant 0 : index
    %13 = vector.load %arg3[%c0_8, %c0_9] : memref<1x128xf32, #tpu.memory_space<vmem>>, vector<1x128xf32>
    %14 = vector.broadcast %13 : vector<1x128xf32> to vector<64x128xf32>
    %15 = arith.addf %12, %14 : vector<64x128xf32>
    %16 = arith.truncf %15 : vector<64x128xf32> to vector<64x128xbf16>
    %c0_10 = arith.constant 0 : index
    %c0_11 = arith.constant 0 : index
    %17 = vector.load %arg6[%c0_10, %c0_11] : memref<64x128xbf16, #tpu.memory_space<vmem>>, vector<64x128xbf16>
    tpu.vector_store %arg6[%c0_10, %c0_11], %16 {strides = array<i32>} : memref<64x128xbf16, #tpu.memory_space<vmem>>, vector<64x128xbf16>,
    %c64_i32 = arith.constant 64 : i32
    %18 = arith.muli %arg0, %c64_i32 : i32
    %19 = tpu.iota {dimensions = array<i32: 0>} : vector<64x1xi32>
    %20 = vector.broadcast %18 : i32 to vector<64x1xi32>
    %21 = arith.addi %20, %19 : vector<64x1xi32>
    %c128_i32 = arith.constant 128 : i32
    %22 = vector.broadcast %c128_i32 : i32 to vector<64x1xi32>
    %23 = arith.cmpi slt, %21, %22 : vector<64x1xi32>
    %cst_12 = arith.constant 0.000000e+00 : f32
    %24 = vector.shape_cast %23 : vector<64x1xi1> to vector<64x1xi1>
    %25 = vector.broadcast %24 : vector<64x1xi1> to vector<64x128xi1>
    %26 = vector.broadcast %cst_12 : f32 to vector<64x128xf32>
    %27 = arith.select %25, %15, %26 : vector<64x128xi1>, vector<64x128xf32>
    %cst_13 = arith.constant dense<0.000000e+00> : vector<128xf32>
    %28 = vector.multi_reduction <add>, %27, %cst_13 [0] : vector<64x128xf32> to vector<128xf32>
    %29 = vector.shape_cast %28 : vector<128xf32> to vector<1x128xf32>
    %c0_14 = arith.constant 0 : index
    %c0_15 = arith.constant 0 : index
    %c0_16 = arith.constant 0 : index
    %30 = vector.load %arg7[%c0_14, %c0_15, %c0_16] : memref<1x2x128xf32, #tpu.memory_space<vmem>>, vector<1x1x128xf32>
    %31 = vector.shape_cast %30 : vector<1x1x128xf32> to vector<1x128xf32>
    %32 = vector.shape_cast %29 : vector<1x128xf32> to vector<1x1x128xf32>
    tpu.vector_store %arg7[%c0_14, %c0_15, %c0_16], %32 {strides = array<i32>} : memref<1x2x128xf32, #tpu.memory_space<vmem>>, vector<1x1x128xf32>,
    %33 = arith.mulf %27, %27 : vector<64x128xf32>
    %cst_17 = arith.constant dense<0.000000e+00> : vector<128xf32>
    %34 = vector.multi_reduction <add>, %33, %cst_17 [0] : vector<64x128xf32> to vector<128xf32>
    %35 = vector.shape_cast %34 : vector<128xf32> to vector<1x128xf32>
    %c0_18 = arith.constant 0 : index
    %c1 = arith.constant 1 : index
    %c0_19 = arith.constant 0 : index
    %36 = vector.load %arg7[%c0_18, %c1, %c0_19] : memref<1x2x128xf32, #tpu.memory_space<vmem>>, vector<1x1x128xf32>
    %37 = vector.shape_cast %36 : vector<1x1x128xf32> to vector<1x128xf32>
    %38 = vector.shape_cast %35 : vector<1x128xf32> to vector<1x1x128xf32>
    tpu.vector_store %arg7[%c0_18, %c1, %c0_19], %38 {strides = array<i32>} : memref<1x2x128xf32, #tpu.memory_space<vmem>>, vector<1x1x128xf32>,
    return
  }
  func.func @transform_0(%arg0: i32) -> (i32, i32) {
    %c0_i32 = arith.constant 0 : i32
    %c0_i32_0 = arith.constant 0 : i32
    return %arg0, %c0_i32 : i32, i32
  }
  func.func @transform_1(%arg0: i32) -> (i32, i32) {
    %c0_i32 = arith.constant 0 : i32
    %c0_i32_0 = arith.constant 0 : i32
    %c0_i32_1 = arith.constant 0 : i32
    return %c0_i32, %c0_i32_0 : i32, i32
  }
  func.func @transform_2(%arg0: i32) -> (i32, i32) {
    %c0_i32 = arith.constant 0 : i32
    %c0_i32_0 = arith.constant 0 : i32
    %c0_i32_1 = arith.constant 0 : i32
    return %c0_i32, %c0_i32_0 : i32, i32
  }
  func.func @transform_3(%arg0: i32) -> (i32, i32) {
    %c0_i32 = arith.constant 0 : i32
    %c0_i32_0 = arith.constant 0 : i32
    %c0_i32_1 = arith.constant 0 : i32
    return %c0_i32, %c0_i32_0 : i32, i32
  }
  func.func @transform_4(%arg0: i32) -> (i32, i32) {
    %c0_i32 = arith.constant 0 : i32
    %c0_i32_0 = arith.constant 0 : i32
    %c0_i32_1 = arith.constant 0 : i32
    return %c0_i32, %c0_i32_0 : i32, i32
  }
  func.func @transform_5(%arg0: i32) -> (i32, i32) {
    %c0_i32 = arith.constant 0 : i32
    %c0_i32_0 = arith.constant 0 : i32
    return %arg0, %c0_i32 : i32, i32
  }
  func.func @transform_6(%arg0: i32) -> (i32, i32, i32) {
    %c0_i32 = arith.constant 0 : i32
    %c0_i32_0 = arith.constant 0 : i32
    %c0_i32_1 = arith.constant 0 : i32
    return %arg0, %c0_i32, %c0_i32_0 : i32, i32, i32
  }
}

module attributes {stable_mosaic.version = 11 : i64} {
  func.func @_mm_kernel(%arg0: i32, %arg1: memref<256x288xbf16, #tpu.memory_space<vmem>>, %arg2: memref<288x128xbf16, #tpu.memory_space<vmem>>, %arg3: memref<1x128xf32, #tpu.memory_space<vmem>>, %arg4: memref<1x288xf32, #tpu.memory_space<vmem>>, %arg5: memref<1x288xf32, #tpu.memory_space<vmem>>, %arg6: memref<256x128xf32, #tpu.memory_space<vmem>>) attributes {dimension_semantics = [#tpu.dimension_semantics<parallel>], iteration_bounds = array<i64: 2>, scalar_prefetch = 0 : i64, scratch_operands = 0 : i64, tpu.core_type = #tpu.core_type<tc>, window_params = [{transform_indices = @transform_0, window_bounds = array<i64: 256, 288>}, {pipeline_mode = #tpu.pipeline_mode<synchronous>, transform_indices = @transform_1, window_bounds = array<i64: 288, 128>}, {pipeline_mode = #tpu.pipeline_mode<synchronous>, transform_indices = @transform_2, window_bounds = array<i64: 1, 128>}, {pipeline_mode = #tpu.pipeline_mode<synchronous>, transform_indices = @transform_3, window_bounds = array<i64: 1, 288>}, {pipeline_mode = #tpu.pipeline_mode<synchronous>, transform_indices = @transform_4, window_bounds = array<i64: 1, 288>}, {transform_indices = @transform_5, window_bounds = array<i64: 256, 128>}]} {
    %c0 = arith.constant 0 : index
    %c0_0 = arith.constant 0 : index
    %0 = vector.load %arg1[%c0, %c0_0] : memref<256x288xbf16, #tpu.memory_space<vmem>>, vector<256x288xbf16>
    %1 = arith.extf %0 : vector<256x288xbf16> to vector<256x288xf32>
    %c0_1 = arith.constant 0 : index
    %c0_2 = arith.constant 0 : index
    %2 = vector.load %arg4[%c0_1, %c0_2] : memref<1x288xf32, #tpu.memory_space<vmem>>, vector<1x288xf32>
    %3 = vector.broadcast %2 : vector<1x288xf32> to vector<256x288xf32>
    %4 = arith.mulf %1, %3 : vector<256x288xf32>
    %c0_3 = arith.constant 0 : index
    %c0_4 = arith.constant 0 : index
    %5 = vector.load %arg5[%c0_3, %c0_4] : memref<1x288xf32, #tpu.memory_space<vmem>>, vector<1x288xf32>
    %6 = vector.broadcast %5 : vector<1x288xf32> to vector<256x288xf32>
    %7 = arith.addf %4, %6 : vector<256x288xf32>
    %cst = arith.constant 0.000000e+00 : f32
    %8 = vector.broadcast %cst : f32 to vector<256x288xf32>
    %9 = arith.maximumf %7, %8 : vector<256x288xf32>
    %10 = arith.truncf %9 : vector<256x288xf32> to vector<256x288xbf16>
    %c0_5 = arith.constant 0 : index
    %c0_6 = arith.constant 0 : index
    %11 = vector.load %arg2[%c0_5, %c0_6] : memref<288x128xbf16, #tpu.memory_space<vmem>>, vector<288x128xbf16>
    %cst_7 = arith.constant dense<0.000000e+00> : vector<256x128xf32>
    %12 = tpu.matmul %10, %11, %cst_7 {dimension_numbers = #tpu.dot_dimension_numbers<[1], [0], [0], [1], [0, 0, 1, 1], [], []>} : vector<256x288xbf16>, vector<288x128xbf16>, vector<256x128xf32> -> vector<256x128xf32>
    %c0_8 = arith.constant 0 : index
    %c0_9 = arith.constant 0 : index
    %13 = vector.load %arg3[%c0_8, %c0_9] : memref<1x128xf32, #tpu.memory_space<vmem>>, vector<1x128xf32>
    %14 = vector.broadcast %13 : vector<1x128xf32> to vector<256x128xf32>
    %15 = arith.addf %12, %14 : vector<256x128xf32>
    %16 = math.tanh %15 : vector<256x128xf32>
    %c0_10 = arith.constant 0 : index
    %c0_11 = arith.constant 0 : index
    %17 = vector.load %arg6[%c0_10, %c0_11] : memref<256x128xf32, #tpu.memory_space<vmem>>, vector<256x128xf32>
    tpu.vector_store %arg6[%c0_10, %c0_11], %16 {strides = array<i32>} : memref<256x128xf32, #tpu.memory_space<vmem>>, vector<256x128xf32>,
    return
  }
  func.func @transform_0(%arg0: i32) -> (i32, i32) {
    %c0_i32 = arith.constant 0 : i32
    %c0_i32_0 = arith.constant 0 : i32
    return %arg0, %c0_i32 : i32, i32
  }
  func.func @transform_1(%arg0: i32) -> (i32, i32) {
    %c0_i32 = arith.constant 0 : i32
    %c0_i32_0 = arith.constant 0 : i32
    %c0_i32_1 = arith.constant 0 : i32
    return %c0_i32, %c0_i32_0 : i32, i32
  }
  func.func @transform_2(%arg0: i32) -> (i32, i32) {
    %c0_i32 = arith.constant 0 : i32
    %c0_i32_0 = arith.constant 0 : i32
    %c0_i32_1 = arith.constant 0 : i32
    return %c0_i32, %c0_i32_0 : i32, i32
  }
  func.func @transform_3(%arg0: i32) -> (i32, i32) {
    %c0_i32 = arith.constant 0 : i32
    %c0_i32_0 = arith.constant 0 : i32
    %c0_i32_1 = arith.constant 0 : i32
    return %c0_i32, %c0_i32_0 : i32, i32
  }
  func.func @transform_4(%arg0: i32) -> (i32, i32) {
    %c0_i32 = arith.constant 0 : i32
    %c0_i32_0 = arith.constant 0 : i32
    %c0_i32_1 = arith.constant 0 : i32
    return %c0_i32, %c0_i32_0 : i32, i32
  }
  func.func @transform_5(%arg0: i32) -> (i32, i32) {
    %c0_i32 = arith.constant 0 : i32
    %c0_i32_0 = arith.constant 0 : i32
    return %arg0, %c0_i32 : i32, i32
  }
}

</mosaic_0001>

<bundles_post_ra>
// kernel: generator_forward.4
= control target key start
LH: loop header
LB: loop body
LE: loop exit
PB: predicated region body
PF: predicated region fallthrough
CT: control target
= control target key end

     0   :  { %10 = vsyncpa [#allocation3], 0  ;;  %s1337_s0 = inlined_call_operand.vmem [shape: bf16[2,12], index: 0, kind: input, shape index: {}]   ;;  %s1338_s1 = inlined_call_operand.hbm [shape: bf16[12,2048], index: 1, kind: input, shape index: {}]   ;;  %s1339_s2 = inlined_call_operand.hbm [shape: f32[1,2048], index: 2, kind: input, shape index: {}]   ;;  %s1340_s3 = inlined_call_operand.vmem [shape: bf16[2,2048], index: 3, kind: output, shape index: {0}]   ;;  %s1341_s4 = inlined_call_operand.vmem [shape: f32[1,2,2048], index: 4, kind: output, shape index: {1}]  }
   0x1   :  { %s18_s17 = sshll.u32 %s1338_s1, 4  ;;  %s19_s17 = int_to_ptr.hbm [resolvable:$true] %s18_s17 }
   0x2   :  { %11 = vsyncpa [#allocation5], 0  ;;  %s1024_s18 = smov [#allocation2]   ;;  %s32_s22 = sshll.u32 %s1339_s2, 4  ;;  %s33_s22 = int_to_ptr.hbm [resolvable:$true] %s32_s22 }
   0x3   :  { %s20_s19 = sshll.u32 %s1024_s18, 4  ;;  %s1025_s23 = smov 1024   ;;  %s21_s19 = int_to_ptr.vmem [resolvable:$true] %s20_s19 }
   0x4   :  { %s1026_s24 = smov 64   ;;  %s1027_s25 = smov [#allocation4]  }
   0x5   :  { %26 = dma.hbm_to_vmem [thread:$0]  %s19_s17, 2048, %s21_s19, [#allocation3], %s1025_s23, %s1025_s23, %s1026_s24  }
   0x6   :  { %s34_s26 = sshll.u32 %s1027_s25, 4  ;;  %s35_s26 = int_to_ptr.vmem [resolvable:$true] %s34_s26 }
   0x7   :  { %37 = dma.hbm_to_vmem [thread:$0]  %s33_s22, 256, %s35_s26, [#allocation5]  }
   0x8   :  { %1020 = dma.done.wait [#allocation3], 2048  }
   0x9   :  { %1021 = vsyncadd [#allocation3], 4294965248 }
   0xa   :  { %1022 = dma.done.wait [#allocation5], 256  }
   0xb   :  { %1023 = vsyncadd [#allocation5], 4294967040  ;;  %vm168_vm0 = vcmask 1045504   ;;  %v871_v0 = vld [vmem:[#allocation2] sm:$0xf]  ;;  %vm164_vm1 = vcmask 97280  }
   0xc   :  { %v960_v1 = vld [vmem:[#allocation2 + $0x3c] sm:$0x30]  ;;  %v952_v2 = vld [vmem:[#allocation2 + $0x4] sm:$0xf]  ;;  %v879_v5 = vld [vmem:[#allocation2 + $0x8] sm:$0xf] }
   0xd   :  { %v872_v3 = vor.u32 %v960_v1, %v871_v0  ;;  %v873_v4 = vld [vmem:[#allocation2 + $0x40] sm:$0x30]  ;;  %v961_v6 = vld [vmem:[#allocation2 + $0x44] sm:$0x30]  ;;  %v953_v9 = vld [vmem:[#allocation2 + $0xc] sm:$0xf]  ;;  %v497_v1 = vlaneseq }
   0xe   :  { %v876_v7 = vor.u32 %v952_v2, %v873_v4  ;;  %v880_v8 = vor.u32 %v961_v6, %v879_v5  ;;  %v881_v10 = vld [vmem:[#allocation2 + $0x48] sm:$0x30]  ;;  %v1062_v11 = vld [vmem:[%s1337_s0] sm:$0x1]  ;;  %v895_v14 = vld [vmem:[#allocation2 + $0x18] sm:$0xf] }
   0xf   :  { %v170_v12 = vsel %vm168_vm0, %v872_v3, 0  ;;  %v884_v13 = vor.u32 %v953_v9, %v881_v10  ;;  %v963_v15 = vld [vmem:[#allocation2 + $0x54] sm:$0x30]  ;;  %v955_v19 = vld [vmem:[#allocation2 + $0x1c] sm:$0xf]  ;;  %v1112_v2 = vld [vmem:[#allocation4] sm:$0xff] }
  0x10   :  { %224 = vmatpush.bf16.msra.mxu0 %v170_v12  ;;  %v173_v16 = vsel %vm168_vm0, %v876_v7, 0  ;;  %v176_v17 = vsel %vm168_vm0, %v880_v8, 0  ;;  %v896_v18 = vor.u32 %v963_v15, %v895_v14  ;;  %v897_v20 = vld [vmem:[#allocation2 + $0x58] sm:$0x30]  ;;  %v887_v23 = vld [vmem:[#allocation2 + $0x10] sm:$0xf] }
  0x11   :  { %237 = vmatpush.bf16.msra.mxu1 %v173_v16  ;;  %250 = vmatpush.bf16.msra.mxu2 %v176_v17  ;;  %v179_v21 = vsel %vm168_vm0, %v884_v13, 0  ;;  %v900_v22 = vor.u32 %v955_v19, %v897_v20  ;;  %v962_v24 = vld [vmem:[#allocation2 + $0x4c] sm:$0x30]  ;;  %v954_v27 = vld [vmem:[#allocation2 + $0x14] sm:$0xf]  ;;  %v1114_v3 = vshrl.u32 %v497_v1, 7 }
  0x12   :  { %263 = vmatpush.bf16.msra.mxu3 %v179_v21  ;;  %v188_v25 = vsel %vm168_vm0, %v896_v18, 0  ;;  %v888_v26 = vor.u32 %v962_v24, %v887_v23  ;;  %v889_v28 = vld [vmem:[#allocation2 + $0x50] sm:$0x30]  ;;  %v911_v31 = vld [vmem:[#allocation2 + $0x28] sm:$0xf]  ;;  %v68_v4 = vperm.slane %v1112_v2, 0 }
  0x13   :  { %933 = vmatmul.msk.bf16.vlgmr.msra.gmra.mxu0 %vm164_vm1, %v1062_v11  ;;  %v191_v29 = vsel %vm168_vm0, %v900_v22, 0  ;;  %v892_v30 = vor.u32 %v954_v27, %v889_v28  ;;  %v965_v32 = vld [vmem:[#allocation2 + $0x64] sm:$0x30]  ;;  %v957_v35 = vld [vmem:[#allocation2 + $0x2c] sm:$0xf]  ;;  %v69_v5 = vperm.slane %v1112_v2, 1 }
  0x14   :  { %934 = vmatmul.msk.bf16.vlgmr.msra.gmra.mxu1 %vm164_vm1, %v1062_v11  ;;  %935 = vmatmul.msk.bf16.vlgmr.msra.gmra.mxu2 %vm164_vm1, %v1062_v11  ;;  %v182_v33 = vsel %vm168_vm0, %v888_v26, 0  ;;  %v912_v34 = vor.u32 %v965_v32, %v911_v31  ;;  %v913_v36 = vld [vmem:[#allocation2 + $0x68] sm:$0x30]  ;;  %v903_v39 = vld [vmem:[#allocation2 + $0x20] sm:$0xf]  ;;  %vm501_vm2 = vcmp.lt.s32.totalorder %v1114_v3, 2 }
  0x15   :  { %302 = vmatpush.bf16.msrb.mxu2 %v188_v25  ;;  %936 = vmatmul.msk.bf16.vlgmr.msra.gmra.mxu3 %vm164_vm1, %v1062_v11  ;;  %v185_v37 = vsel %vm168_vm0, %v892_v30, 0  ;;  %v916_v38 = vor.u32 %v957_v35, %v913_v36  ;;  %v964_v40 = vld [vmem:[#allocation2 + $0x5c] sm:$0x30]  ;;  %v956_v43 = vld [vmem:[#allocation2 + $0x24] sm:$0xf]  ;;  %vm463_vm3 = vcmask 1041408  }
  0x16   :  { %276 = vmatpush.bf16.msrb.mxu0 %v182_v33  ;;  %315 = vmatpush.bf16.msrb.mxu3 %v191_v29  ;;  %v200_v41 = vsel %vm168_vm0, %v912_v34, 0  ;;  %v904_v42 = vor.u32 %v964_v40, %v903_v39  ;;  %v905_v44 = vld [vmem:[#allocation2 + $0x60] sm:$0x30]  ;;  %v927_v49 = vld [vmem:[#allocation2 + $0x38] sm:$0xf]  ;;  %v70_v14 = vperm.slane %v1112_v2, 2 }
  0x17   :  { %289 = vmatpush.bf16.msrb.mxu1 %v185_v37  ;;  %v203_v45 = vsel %vm168_vm0, %v916_v38, 0  ;;  %v908_v46 = vor.u32 %v956_v43, %v905_v44  ;;  %v967_v50 = vld [vmem:[#allocation2 + $0x74] sm:$0x30]  ;;  %v959_v51 = vld [vmem:[#allocation2 + $0x3c] sm:$0xf]  ;;  %v71_v20 = vperm.slane %v1112_v2, 3 }
  0x18   :  { %v194_v47 = vsel %vm168_vm0, %v904_v42, 0  ;;  %v929_v52 = vld [vmem:[#allocation2 + $0x78] sm:$0x30]  ;;  %v919_v53 = vld [vmem:[#allocation2 + $0x30] sm:$0xf]  ;;  %v928_v57 = vor.u32 %v967_v50, %v927_v49  ;;  %vm455_vm4 = vcmask 1040384  }
  0x19   :  { %354 = vmatpush.bf16.msra.mxu2 %v200_v41  ;;  %v197_v48 = vsel %vm168_vm0, %v908_v46, 0  ;;  %v966_v54 = vld [vmem:[#allocation2 + $0x6c] sm:$0x30]  ;;  %v958_v55 = vld [vmem:[#allocation2 + $0x34] sm:$0xf]  ;;  %v932_v58 = vor.u32 %v959_v51, %v929_v52  ;;  %v72_v46 = vperm.slane %v1112_v2, 4 }
  0x1a   :  { %367 = vmatpush.bf16.msra.mxu3 %v203_v45  ;;  %328 = vmatpush.bf16.msra.mxu0 %v194_v47  ;;  %v921_v56 = vld [vmem:[#allocation2 + $0x70] sm:$0x30]  ;;  %v920_v59 = vor.u32 %v966_v54, %v919_v53  ;;  %v212_v61 = vsel %vm168_vm0, %v928_v57, 0  ;;  %v73_v53 = vperm.slane %v1112_v2, 5  ;;  %vm459_vm5 = vcmask 1042434  }
  0x1b   :  { %341 = vmatpush.bf16.msra.mxu1 %v197_v48  ;;  %v924_v60 = vor.u32 %v958_v55, %v921_v56  ;;  %v215_v62 = vsel %vm168_vm0, %v932_v58, 0  ;;  %v74_v1 = vperm.slane %v1112_v2, 6  ;;  %vm465_vm6 = vcmask 1044484  }
  0x1c   :  { %v206_v63 = vsel %vm168_vm0, %v920_v59, 0  ;;  %vm469_vm7 = vcmask 1046534   ;;  %vm473_vm8 = vcmask 1045508   ;;  %vm475_vm9 = vcmask 1043456  }
  0x1d   :  { %v209_v0 = vsel %vm168_vm0, %v924_v60, 0 }
  0x23   :  { %937 = vmatmul.msk.bf16.vlgmr.msrb.gmra.mxu0 %vm164_vm1, %v1062_v11 }
  0x24   :  { %938 = vmatmul.msk.bf16.vlgmr.msrb.gmra.mxu1 %vm164_vm1, %v1062_v11  ;;  %939 = vmatmul.msk.bf16.vlgmr.msrb.gmra.mxu2 %vm164_vm1, %v1062_v11 }
  0x25   :  { %940 = vmatmul.msk.bf16.vlgmr.msrb.gmra.mxu3 %vm164_vm1, %v1062_v11  ;;  %406 = vmatpush.bf16.msrb.mxu2 %v212_v61 }
  0x26   :  { %419 = vmatpush.bf16.msrb.mxu3 %v215_v62  ;;  %380 = vmatpush.bf16.msrb.mxu0 %v206_v63 }
  0x27   :  { %393 = vmatpush.bf16.msrb.mxu1 %v209_v0 }
  0x33   :  { %941 = vmatmul.msk.bf16.vlgmr.msra.gmra.mxu0 %vm164_vm1, %v1062_v11 }
  0x34   :  { %942 = vmatmul.msk.bf16.vlgmr.msra.gmra.mxu1 %vm164_vm1, %v1062_v11  ;;  %943 = vmatmul.msk.bf16.vlgmr.msra.gmra.mxu2 %vm164_vm1, %v1062_v11 }
  0x35   :  { %944 = vmatmul.msk.bf16.vlgmr.msra.gmra.mxu3 %vm164_vm1, %v1062_v11 }
  0x43   :  { %945 = vmatmul.msk.bf16.vlgmr.msrb.gmra.mxu0 %vm164_vm1, %v1062_v11 }
  0x44   :  { %946 = vmatmul.msk.bf16.vlgmr.msrb.gmra.mxu1 %vm164_vm1, %v1062_v11  ;;  %947 = vmatmul.msk.bf16.vlgmr.msrb.gmra.mxu2 %vm164_vm1, %v1062_v11 }
  0x45   :  { %948 = vmatmul.msk.bf16.vlgmr.msrb.gmra.mxu3 %vm164_vm1, %v1062_v11 }
  0x90   :  { %v226_v6 = vpop.f32.mrf.mxu0 }
  0x91   :  { %v227_v7 = vadd.f32 %v226_v6, %v68_v4  ;;  %v239_v8 = vpop.f32.mrf.mxu1 }
  0x92   :  { %v240_v9 = vadd.f32 %v239_v8, %v69_v5 }
  0x93   :  { %v504_v10 = vsel %vm501_vm2, %v227_v7, 0.0 }
  0x94   :  { %v520_v11 = vsel %vm463_vm3, %v504_v10, 0.0  ;;  %v681_v12 = vmul.f32 %v504_v10, %v504_v10  ;;  %v505_v13 = vsel %vm501_vm2, %v240_v9, 0.0  ;;  %v425_v47 = vpack.c.bf16 %v240_v9, %v227_v7 }
  0x95   :  { %v521_v15 = vrot.slane %v520_v11, 4  ;;  %v527_v16 = vsel %vm463_vm3, %v505_v13, 0.0  ;;  %v682_v17 = vmul.f32 %v505_v13, %v505_v13 }
  0x96   :  { %v697_v18 = vsel %vm463_vm3, %v681_v12, 0.0  ;;  %v528_v19 = vrot.slane %v527_v16, 4  ;;  %v441_v62 = vrot.slane %v425_v47, 3 }
  0x97   :  { %v698_v21 = vrot.slane %v697_v18, 4  ;;  %v704_v22 = vsel %vm463_vm3, %v682_v17, 0.0  ;;  %v252_v23 = vpop.f32.mrf.mxu2  ;;  %v522_v27 = vadd.f32 %v521_v15, %v520_v11  ;;  %v75_v11 = vperm.slane %v1112_v2, 7 }
  0x98   :  { %v253_v24 = vadd.f32 %v252_v23, %v70_v14  ;;  %v265_v25 = vpop.f32.mrf.mxu3  ;;  %v228_v26 = vpop.f32.mrf.mxu0  ;;  %v529_v28 = vadd.f32 %v528_v19, %v527_v16  ;;  %v705_v31 = vrot.slane %v704_v22, 4  ;;  %v458_v17 = vsel %vm455_vm4, %v425_v47, %v441_v62 }
  0x99   :  { %v241_v29 = vpop.f32.mrf.mxu1  ;;  %v699_v30 = vadd.f32 %v698_v21, %v697_v18  ;;  %v266_v33 = vadd.f32 %v265_v25, %v71_v20  ;;  %v523_v39 = vrot.slane %v522_v27, 2 }
  0x9a   :  { %v506_v32 = vsel %vm501_vm2, %v253_v24, 0.0  ;;  %v530_v37 = vrot.slane %v529_v28, 2  ;;  %v706_v41 = vadd.f32 %v705_v31, %v704_v22 }
  0x9b   :  { %v534_v34 = vsel %vm463_vm3, %v506_v32, 0.0  ;;  %v683_v35 = vmul.f32 %v506_v32, %v506_v32  ;;  %v700_v40 = vrot.slane %v699_v30, 2  ;;  %v507_v42 = vsel %vm501_vm2, %v266_v33, 0.0 }
  0x9c   :  { %v535_v36 = vrot.slane %v534_v34, 4  ;;  %v531_v50 = vadd.f32 %v530_v37, %v529_v28  ;;  %v541_v51 = vsel %vm463_vm3, %v507_v42, 0.0  ;;  %v684_v52 = vmul.f32 %v507_v42, %v507_v42 }
  0x9d   :  { %v711_v38 = vsel %vm463_vm3, %v683_v35, 0.0  ;;  %v524_v55 = vadd.f32 %v523_v39, %v522_v27  ;;  %v701_v56 = vadd.f32 %v700_v40, %v699_v30  ;;  %v707_v57 = vrot.slane %v706_v41, 2 }
  0x9e   :  { %v536_v43 = vadd.f32 %v535_v36, %v534_v34  ;;  %v712_v44 = vrot.slane %v711_v38, 4  ;;  %v718_v60 = vsel %vm463_vm3, %v684_v52, 0.0  ;;  %v426_v63 = vpack.c.bf16 %v266_v33, %v253_v24 }
  0x9f   :  { %v254_v45 = vpop.f32.mrf.mxu2  ;;  %v542_v0 = vrot.slane %v541_v51, 4  ;;  %v532_v4 = vrot.slane %v531_v50, 1  ;;  %v719_v5 = vrot.slane %v718_v60, 4  ;;  %v525_v8 = vrot.slane %v524_v55, 1 }
  0xa0   :  { %v267_v48 = vpop.f32.mrf.mxu3  ;;  %v278_v49 = vpop.f32.mrf.mxu0  ;;  %v537_v58 = vrot.slane %v536_v43, 2  ;;  %v713_v59 = vadd.f32 %v712_v44, %v711_v38  ;;  %v702_v9 = vrot.slane %v701_v56, 1  ;;  %v708_v10 = vadd.f32 %v707_v57, %v706_v41 }
  0xa1   :  { %v291_v54 = vpop.f32.mrf.mxu1  ;;  %v279_v61 = vadd.f32 %v278_v49, %v72_v46  ;;  %v442_v18 = vrot.slane %v426_v63, 6  ;;  %v543_v19 = vadd.f32 %v542_v0, %v541_v51  ;;  %v1147_v23 = vadd.f32 %v532_v4, %v531_v50 }
  0xa2   :  { %v292_v7 = vadd.f32 %v291_v54, %v73_v53  ;;  %v538_v12 = vadd.f32 %v537_v58, %v536_v43  ;;  %v714_v13 = vrot.slane %v713_v59, 2  ;;  %v443_v24 = vrot.slane %v426_v63, 1 }
  0xa3   :  { %v508_v6 = vsel %vm501_vm2, %v279_v61, 0.0  ;;  %v720_v25 = vadd.f32 %v719_v5, %v718_v60  ;;  %v1150_v27 = vadd.f32 %v525_v8, %v524_v55  ;;  %v709_v28 = vrot.slane %v708_v10, 1 }
  0xa4   :  { %v548_v14 = vsel %vm463_vm3, %v508_v6, 0.0  ;;  %v685_v15 = vmul.f32 %v508_v6, %v508_v6  ;;  %v509_v20 = vsel %vm501_vm2, %v292_v7, 0.0  ;;  %v1152_v31 = vadd.f32 %v702_v9, %v701_v56 }
  0xa5   :  { %v549_v29 = vrot.slane %v548_v14, 4  ;;  %v539_v32 = vrot.slane %v538_v12, 1  ;;  %v715_v33 = vadd.f32 %v714_v13, %v713_v59  ;;  %v555_v34 = vsel %vm463_vm3, %v509_v20, 0.0 }
  0xa6   :  { %v725_v2 = vsel %vm463_vm3, %v685_v15, 0.0  ;;  %v544_v35 = vrot.slane %v543_v19, 2  ;;  %v427_v36 = vpack.c.bf16 %v292_v7, %v279_v61  ;;  %v556_v37 = vrot.slane %v555_v34, 4 }
  0xa7   :  { %v304_v16 = vpop.f32.mrf.mxu2  ;;  %v726_v30 = vrot.slane %v725_v2, 4  ;;  %v686_v38 = vmul.f32 %v509_v20, %v509_v20  ;;  %v648_v39 = vrot.slane %v1147_v23, 7  ;;  %v462_v40 = vsel %vm459_vm5, %v442_v18, %v443_v24 }
  0xa8   :  { %v317_v21 = vpop.f32.mrf.mxu3  ;;  %v280_v22 = vpop.f32.mrf.mxu0  ;;  %v721_v41 = vrot.slane %v720_v25, 2  ;;  %v305_v42 = vadd.f32 %v304_v16, %v74_v1  ;;  %v550_v43 = vadd.f32 %v549_v29, %v548_v14  ;;  %v1158_v47 = vadd.f32 %v539_v32, %v538_v12 }
  0xa9   :  { %v293_v26 = vpop.f32.mrf.mxu1  ;;  %v727_v44 = vadd.f32 %v726_v30, %v725_v2  ;;  %v732_v45 = vsel %vm463_vm3, %v686_v38, 0.0  ;;  %v318_v46 = vadd.f32 %v317_v21, %v75_v11  ;;  %v716_v48 = vrot.slane %v715_v33, 1  ;;  %v1183_v38 = vld [vmem:[#allocation4 + $0x8] sm:$0xff] }
  0xaa   :  { %v557_v49 = vadd.f32 %v556_v37, %v555_v34  ;;  %v733_v50 = vrot.slane %v732_v45, 4  ;;  %v545_v52 = vadd.f32 %v544_v35, %v543_v19  ;;  %v444_v53 = vrot.slane %v427_v36, 4 }
  0xab   :  { %v445_v54 = vrot.slane %v427_v36, 7  ;;  %v510_v55 = vsel %vm501_vm2, %v305_v42, 0.0  ;;  %v1164_v58 = vadd.f32 %v709_v28, %v708_v10  ;;  %v722_v59 = vadd.f32 %v721_v41, %v720_v25 }
  0xac   :  { %v734_v60 = vadd.f32 %v733_v50, %v732_v45  ;;  %v428_v61 = vpack.c.bf16 %v318_v46, %v305_v42  ;;  %v464_v63 = vsel %vm463_vm3, %v458_v17, %v462_v40  ;;  %v551_v0 = vrot.slane %v550_v43, 2 }
  0xad   :  { %v728_v1 = vrot.slane %v727_v44, 2  ;;  %v562_v4 = vsel %vm463_vm3, %v510_v55, 0.0  ;;  %v649_v5 = vrot.slane %v1158_v47, 6  ;;  %v1169_v6 = vadd.f32 %v716_v48, %v715_v33 }
  0xae   :  { %v558_v7 = vrot.slane %v557_v49, 2  ;;  %v563_v8 = vrot.slane %v562_v4, 4  ;;  %v546_v9 = vrot.slane %v545_v52, 1  ;;  %v468_v10 = vsel %vm465_vm6, %v444_v53, %v445_v54 }
  0xaf   :  { %v306_v51 = vpop.f32.mrf.mxu2  ;;  %v735_v11 = vrot.slane %v734_v60, 2  ;;  %v687_v12 = vmul.f32 %v510_v55, %v510_v55  ;;  %v723_v13 = vrot.slane %v722_v59, 1  ;;  %v446_v15 = vrot.slane %v428_v61, 2 }
  0xb0   :  { %v319_v56 = vpop.f32.mrf.mxu3  ;;  %v1162_v57 = vpop.f32.mrf.mxu0  ;;  %v564_v14 = vadd.f32 %v563_v8, %v562_v4  ;;  %v447_v16 = vrot.slane %v428_v61, 5  ;;  %v552_v17 = vadd.f32 %v551_v0, %v550_v43  ;;  %v729_v18 = vadd.f32 %v728_v1, %v727_v44 }
  0xb1   :  { %v343_v62 = vpop.f32.mrf.mxu1  ;;  %v739_v19 = vsel %vm463_vm3, %v687_v12, 0.0  ;;  %v511_v20 = vsel %vm501_vm2, %v318_v46, 0.0  ;;  %v559_v21 = vadd.f32 %v558_v7, %v557_v49  ;;  %v736_v26 = vadd.f32 %v735_v11, %v734_v60 }
  0xb2   :  { %v565_v22 = vrot.slane %v564_v14, 2  ;;  %v740_v24 = vrot.slane %v739_v19, 4  ;;  %v472_v25 = vsel %vm469_vm7, %v446_v15, %v447_v16  ;;  %v569_v29 = vsel %vm463_vm3, %v511_v20, 0.0 }
  0xb3   :  { %v474_v28 = vsel %vm473_vm8, %v468_v10, %v472_v25  ;;  %v688_v30 = vmul.f32 %v511_v20, %v511_v20  ;;  %v547_v34 = vadd.f32 %v546_v9, %v545_v52  ;;  %v724_v41 = vadd.f32 %v723_v13, %v722_v59 }
  0xb4   :  { %v566_v35 = vadd.f32 %v565_v22, %v564_v14  ;;  %v741_v36 = vadd.f32 %v740_v24, %v739_v19  ;;  %v476_v37 = vsel %vm475_vm9, %v464_v63, %v474_v28  ;;  %v553_v42 = vrot.slane %v552_v17, 1 }
  0xb5   :  { %494 = vst [vmem:[%s1340_s3] sm:$0xff] %v476_v37  ;;  %v570_v43 = vrot.slane %v569_v29, 4  ;;  %v746_v44 = vsel %vm463_vm3, %v688_v30, 0.0  ;;  %v730_v45 = vrot.slane %v729_v18, 1  ;;  %v560_v46 = vrot.slane %v559_v21, 1 }
  0xb6   :  { %v742_v48 = vrot.slane %v741_v36, 2  ;;  %v747_v49 = vrot.slane %v746_v44, 4  ;;  %v737_v50 = vrot.slane %v736_v26, 1  ;;  %v567_v51 = vrot.slane %v566_v35, 1 }
  0xb7   :  { %v1176_v2 = vpop.f32.mrf.mxu2  ;;  %v571_v52 = vadd.f32 %v570_v43, %v569_v29  ;;  %v77_v53 = vperm.slane %v1183_v38, 1  ;;  %v826_v54 = vrot.slane %v1169_v6, 6  ;;  %v76_v59 = vperm.slane %v1183_v38, 0 }
  0xb8   :  { %v1180_v32 = vpop.f32.mrf.mxu3  ;;  %v332_v33 = vpop.f32.mrf.mxu0  ;;  %v743_v55 = vadd.f32 %v742_v48, %v741_v36  ;;  %v748_v56 = vadd.f32 %v747_v49, %v746_v44  ;;  %v650_v60 = vrot.slane %v547_v34, 5  ;;  %v827_v61 = vrot.slane %v724_v41, 5 }
  0xb9   :  { %v345_v40 = vpop.f32.mrf.mxu1  ;;  %v554_v63 = vadd.f32 %v553_v42, %v552_v17  ;;  %v572_v0 = vrot.slane %v571_v52, 2  ;;  %v731_v1 = vadd.f32 %v730_v45, %v729_v18  ;;  %v1192_v8 = vadd.f32 %v343_v62, %v77_v53 }
  0xba   :  { %v744_v4 = vrot.slane %v743_v55, 1  ;;  %v749_v7 = vrot.slane %v748_v56, 2  ;;  %v561_v10 = vadd.f32 %v560_v46, %v559_v21  ;;  %v738_v11 = vadd.f32 %v737_v50, %v736_v26 }
  0xbb   :  { %v568_v12 = vadd.f32 %v567_v51, %v566_v35  ;;  %v573_v13 = vadd.f32 %v572_v0, %v571_v52  ;;  %v825_v15 = vrot.slane %v1164_v58, 7  ;;  %v331_v20 = vadd.f32 %v1162_v57, %v76_v59 }
  0xbc   :  { %v745_v16 = vadd.f32 %v744_v4, %v743_v55  ;;  %v750_v19 = vadd.f32 %v749_v7, %v748_v56  ;;  %v663_v62 = vsel %vm459_vm5, %v649_v5, %v650_v60  ;;  %v840_v18 = vsel %vm459_vm5, %v826_v54, %v827_v61 }
  0xbd   :  { %v574_v21 = vrot.slane %v573_v13, 1  ;;  %v78_v22 = vperm.slane %v1183_v38, 2  ;;  %v651_v24 = vrot.slane %v554_v63, 4  ;;  %v828_v25 = vrot.slane %v731_v1, 4 }
  0xbe   :  { %v751_v26 = vrot.slane %v750_v19, 1  ;;  %v513_v58 = vsel %vm501_vm2, %v1192_v8, 0.0  ;;  %v652_v28 = vrot.slane %v561_v10, 3  ;;  %v829_v57 = vrot.slane %v738_v11, 3 }
  0xbf   :  { %v358_v9 = vpop.f32.mrf.mxu2  ;;  %v653_v29 = vrot.slane %v568_v12, 2  ;;  %v575_v30 = vadd.f32 %v574_v21, %v573_v13  ;;  %v662_v47 = vsel %vm455_vm4, %v1150_v27, %v648_v39  ;;  %v830_v5 = vrot.slane %v745_v16, 2 }
  0xc0   :  { %v371_v14 = vpop.f32.mrf.mxu3  ;;  %v382_v6 = vpop.f32.mrf.mxu0  ;;  %v752_v33 = vadd.f32 %v751_v26, %v750_v19  ;;  %v512_v34 = vsel %vm501_vm2, %v331_v20, 0.0  ;;  %v839_v35 = vsel %vm455_vm4, %v1152_v31, %v825_v15  ;;  %v583_v37 = vsel %vm463_vm3, %v513_v58, 0.0 }
  0xc1   :  { %v1196_v17 = vpop.f32.mrf.mxu1  ;;  %v654_v36 = vrot.slane %v575_v30, 1  ;;  %v1216_v40 = vadd.f32 %v1176_v2, %v78_v22  ;;  %v664_v41 = vsel %vm463_vm3, %v662_v47, %v663_v62  ;;  %v841_v23 = vsel %vm463_vm3, %v839_v35, %v840_v18 }
  0xc2   :  { %v831_v42 = vrot.slane %v752_v33, 1  ;;  %v665_v39 = vsel %vm465_vm6, %v651_v24, %v652_v28  ;;  %v842_v43 = vsel %vm465_vm6, %v828_v25, %v829_v57  ;;  %v576_v31 = vsel %vm463_vm3, %v512_v34, 0.0 }
  0xc3   :  { %v666_v44 = vsel %vm469_vm7, %v653_v29, %v654_v36  ;;  %v584_v49 = vrot.slane %v583_v37, 4  ;;  %v690_v50 = vmul.f32 %v513_v58, %v513_v58  ;;  %v689_v54 = vmul.f32 %v512_v34, %v512_v34 }
  0xc4   :  { %v667_v2 = vsel %vm473_vm8, %v665_v39, %v666_v44  ;;  %v843_v48 = vsel %vm469_vm7, %v830_v5, %v831_v42  ;;  %v514_v55 = vsel %vm501_vm2, %v1216_v40, 0.0  ;;  %v577_v59 = vrot.slane %v576_v31, 4 }
  0xc5   :  { %v668_v52 = vsel %vm475_vm9, %v664_v41, %v667_v2  ;;  %v844_v53 = vsel %vm473_vm8, %v842_v43, %v843_v48  ;;  %v79_v60 = vperm.slane %v1183_v38, 3  ;;  %v80_v61 = vperm.slane %v1183_v38, 4 }
  0xc6   :  { %678 = vst [vmem:[%s1341_s4] ss:$2 sm:$0xff] %v668_v52  ;;  %v845_v56 = vsel %vm475_vm9, %v841_v23, %v844_v53  ;;  %v585_v63 = vadd.f32 %v584_v49, %v583_v37  ;;  %v760_v0 = vsel %vm463_vm3, %v690_v50, 0.0  ;;  %v590_v1 = vsel %vm463_vm3, %v514_v55, 0.0 }
  0xc7   :  { %v408_v27 = vpop.f32.mrf.mxu2  ;;  %950 = vst [vmem:[%s1341_s4 + $0x1] ss:$2 sm:$0xff] %v845_v56  ;;  %v753_v4 = vsel %vm463_vm3, %v689_v54, 0.0  ;;  %v370_v7 = vadd.f32 %v1180_v32, %v79_v60  ;;  %v578_v9 = vadd.f32 %v577_v59, %v576_v31  ;;  %v691_v10 = vmul.f32 %v514_v55, %v514_v55 }
  0xc8   :  { %v1224_v45 = vpop.f32.mrf.mxu3  ;;  %v384_v46 = vpop.f32.mrf.mxu0  ;;  %v1246_v11 = vadd.f32 %v382_v6, %v80_v61  ;;  %v761_v13 = vrot.slane %v760_v0, 4  ;;  %v591_v14 = vrot.slane %v590_v1, 4  ;;  %v754_v16 = vrot.slane %v753_v4, 4 }
  0xc9   :  { %v397_v51 = vpop.f32.mrf.mxu1  ;;  %v586_v19 = vrot.slane %v585_v63, 2  ;;  %v429_v62 = vpack.c.bf16 %v1192_v8, %v331_v20  ;;  %v515_v18 = vsel %vm501_vm2, %v370_v7, 0.0  ;;  %v579_v21 = vrot.slane %v578_v9, 2 }
  0xca   :  { %v767_v22 = vsel %vm463_vm3, %v691_v10, 0.0  ;;  %v516_v32 = vsel %vm501_vm2, %v1246_v11, 0.0  ;;  %v81_v6 = vperm.slane %v1183_v38, 5  ;;  %v762_v24 = vadd.f32 %v761_v13, %v760_v0 }
  0xcb   :  { %v592_v25 = vadd.f32 %v591_v14, %v590_v1  ;;  %v755_v26 = vadd.f32 %v754_v16, %v753_v4  ;;  %v587_v58 = vadd.f32 %v586_v19, %v585_v63  ;;  %v597_v28 = vsel %vm463_vm3, %v515_v18, 0.0 }
  0xcc   :  { %v82_v8 = vperm.slane %v1183_v38, 6  ;;  %v768_v20 = vrot.slane %v767_v22, 4  ;;  %v692_v57 = vmul.f32 %v515_v18, %v515_v18  ;;  %v693_v29 = vmul.f32 %v516_v32, %v516_v32 }
  0xcd   :  { %v1258_v30 = vadd.f32 %v579_v21, %v578_v9  ;;  %v448_v47 = vrot.slane %v429_v62, 3  ;;  %v396_v5 = vadd.f32 %v1196_v17, %v81_v6  ;;  %v763_v33 = vrot.slane %v762_v24, 2 }
  0xce   :  { %v593_v34 = vrot.slane %v592_v25, 2  ;;  %v598_v35 = vrot.slane %v597_v28, 4  ;;  %v604_v36 = vsel %vm463_vm3, %v516_v32, 0.0  ;;  %v756_v37 = vrot.slane %v755_v26, 2 }
  0xcf   :  { %v410_v12 = vpop.f32.mrf.mxu2  ;;  %v588_v41 = vrot.slane %v587_v58, 1  ;;  %v517_v23 = vsel %vm501_vm2, %v396_v5, 0.0  ;;  %v409_v42 = vadd.f32 %v408_v27, %v82_v8  ;;  %v769_v39 = vadd.f32 %v768_v20, %v767_v22 }
  0xd0   :  { %v423_v15 = vpop.f32.mrf.mxu3  ;;  %v774_v43 = vsel %vm463_vm3, %v692_v57, 0.0  ;;  %v781_v44 = vsel %vm463_vm3, %v693_v29, 0.0  ;;  %v611_v31 = vsel %vm463_vm3, %v517_v23, 0.0  ;;  %v581_v17 = vrot.slane %v1258_v30, 1 }
  0xd1   :  { %v1269_v46 = vsel %vm455_vm4, %v429_v62, %v448_v47  ;;  %v605_v2 = vrot.slane %v604_v36, 4  ;;  %v612_v48 = vrot.slane %v611_v31, 4  ;;  %v1271_v49 = vadd.f32 %v763_v33, %v762_v24 }
  0xd2   :  { %v594_v50 = vadd.f32 %v593_v34, %v592_v25  ;;  %v599_v51 = vadd.f32 %v598_v35, %v597_v28  ;;  %v694_v52 = vmul.f32 %v517_v23, %v517_v23  ;;  %v430_v27 = vpack.c.bf16 %v370_v7, %v1216_v40 }
  0xd3   :  { %v775_v53 = vrot.slane %v774_v43, 4  ;;  %v782_v54 = vrot.slane %v781_v44, 4  ;;  %v518_v55 = vsel %vm501_vm2, %v409_v42, 0.0  ;;  %v1276_v56 = vadd.f32 %v756_v37, %v755_v26 }
  0xd4   :  { %v1278_v59 = vadd.f32 %v588_v41, %v587_v58  ;;  %v770_v60 = vrot.slane %v769_v39, 2  ;;  %v788_v61 = vsel %vm463_vm3, %v694_v52, 0.0  ;;  %v606_v63 = vadd.f32 %v605_v2, %v604_v36 }
  0xd5   :  { %v613_v0 = vadd.f32 %v612_v48, %v611_v31  ;;  %v789_v1 = vrot.slane %v788_v61, 4  ;;  %v618_v4 = vsel %vm463_vm3, %v518_v55, 0.0  ;;  %v765_v9 = vrot.slane %v1271_v49, 1 }
  0xd6   :  { %v595_v40 = vrot.slane %v594_v50, 1  ;;  %v600_v7 = vrot.slane %v599_v51, 2  ;;  %v619_v10 = vrot.slane %v618_v4, 4  ;;  %v449_v12 = vrot.slane %v430_v27, 6 }
  0xd7   :  { %v450_v13 = vrot.slane %v430_v27, 1  ;;  %v776_v14 = vadd.f32 %v775_v53, %v774_v43  ;;  %v783_v15 = vadd.f32 %v782_v54, %v781_v44  ;;  %v1283_v16 = vadd.f32 %v770_v60, %v769_v39 }
  0xd8   :  { %v431_v19 = vpack.c.bf16 %v396_v5, %v1246_v11  ;;  %v620_v62 = vadd.f32 %v619_v10, %v618_v4  ;;  %v695_v18 = vmul.f32 %v518_v55, %v518_v55  ;;  %v607_v21 = vrot.slane %v606_v63, 2 }
  0xd9   :  { %v614_v22 = vrot.slane %v613_v0, 2  ;;  %v790_v32 = vadd.f32 %v789_v1, %v788_v61  ;;  %v83_v6 = vperm.slane %v1183_v38, 7  ;;  %v1287_v24 = vadd.f32 %v595_v40, %v594_v50 }
  0xda   :  { %v601_v25 = vadd.f32 %v600_v7, %v599_v51  ;;  %v621_v26 = vrot.slane %v620_v62, 2  ;;  %v795_v58 = vsel %vm463_vm3, %v695_v18, 0.0  ;;  %v482_v28 = vsel %vm459_vm5, %v449_v12, %v450_v13 }
  0xdb   :  { %v777_v8 = vrot.slane %v776_v14, 2  ;;  %v784_v20 = vrot.slane %v783_v15, 2  ;;  %v796_v57 = vrot.slane %v795_v58, 4  ;;  %v772_v11 = vrot.slane %v1283_v16, 1 }
  0xdc   :  { %v451_v29 = vrot.slane %v431_v19, 4  ;;  %v452_v47 = vrot.slane %v431_v19, 7  ;;  %v422_v5 = vadd.f32 %v1224_v45, %v83_v6  ;;  %v608_v33 = vadd.f32 %v607_v21, %v606_v63 }
  0xdd   :  { %v615_v34 = vadd.f32 %v614_v22, %v613_v0  ;;  %v791_v38 = vrot.slane %v790_v32, 2  ;;  %v797_v35 = vadd.f32 %v796_v57, %v795_v58  ;;  %v602_v36 = vrot.slane %v601_v25, 1 }
  0xde   :  { %v622_v37 = vadd.f32 %v621_v26, %v620_v62  ;;  %v432_v41 = vpack.c.bf16 %v422_v5, %v409_v42  ;;  %v519_v23 = vsel %vm501_vm2, %v422_v5, 0.0  ;;  %v778_v39 = vadd.f32 %v777_v8, %v776_v14 }
  0xdf   :  { %v785_v43 = vadd.f32 %v784_v20, %v783_v15  ;;  %v798_v44 = vrot.slane %v797_v35, 2  ;;  %v625_v31 = vsel %vm463_vm3, %v519_v23, 0.0  ;;  %v486_v2 = vsel %vm465_vm6, %v451_v29, %v452_v47 }
  0xe0   :  { %v453_v48 = vrot.slane %v432_v41, 2  ;;  %v454_v50 = vrot.slane %v432_v41, 5  ;;  %v626_v45 = vrot.slane %v625_v31, 4  ;;  %v609_v51 = vrot.slane %v608_v33, 1 }
  0xe1   :  { %v616_v52 = vrot.slane %v615_v34, 1  ;;  %v792_v27 = vadd.f32 %v791_v38, %v790_v32  ;;  %v696_v53 = vmul.f32 %v519_v23, %v519_v23  ;;  %v623_v54 = vrot.slane %v622_v37, 1 }
  0xe2   :  { %v799_v55 = vadd.f32 %v798_v44, %v797_v35  ;;  %v489_v42 = vsel %vm469_vm7, %v453_v48, %v454_v50  ;;  %v627_v3 = vadd.f32 %v626_v45, %v625_v31  ;;  %v483_v60 = vsel %vm463_vm3, %v1269_v46, %v482_v28 }
  0xe3   :  { %v603_v61 = vadd.f32 %v602_v36, %v601_v25  ;;  %v490_v63 = vsel %vm473_vm8, %v486_v2, %v489_v42  ;;  %v802_v0 = vsel %vm463_vm3, %v696_v53, 0.0  ;;  %v779_v1 = vrot.slane %v778_v39, 1 }
  0xe4   :  { %v491_v4 = vsel %vm475_vm9, %v483_v60, %v490_v63  ;;  %v628_v40 = vrot.slane %v627_v3, 2  ;;  %v803_v7 = vrot.slane %v802_v0, 4  ;;  %v610_v10 = vadd.f32 %v609_v51, %v608_v33 }
  0xe5   :  { %v786_v12 = vrot.slane %v785_v43, 1  ;;  %v617_v13 = vadd.f32 %v616_v52, %v615_v34  ;;  %v793_v14 = vrot.slane %v792_v27, 1  ;;  %495 = vst [vmem:[%s1340_s3 + $0x8] sm:$0xff] %v491_v4  ;;  %v624_v15 = vadd.f32 %v623_v54, %v622_v37 }
  0xe6   :  { %v800_v46 = vrot.slane %v799_v55, 1  ;;  %v629_v19 = vadd.f32 %v628_v40, %v627_v3  ;;  %v804_v62 = vadd.f32 %v803_v7, %v802_v0  ;;  %v655_v18 = vrot.slane %v1278_v59, 7 }
  0xe7   :  { %v766_v21 = vadd.f32 %v765_v9, %v1271_v49  ;;  %v656_v22 = vrot.slane %v1287_v24, 6  ;;  %v773_v32 = vadd.f32 %v772_v11, %v1283_v16  ;;  %v657_v6 = vrot.slane %v603_v61, 5 }
  0xe8   :  { %v780_v25 = vadd.f32 %v779_v1, %v778_v39  ;;  %v630_v26 = vrot.slane %v629_v19, 1  ;;  %v805_v58 = vrot.slane %v804_v62, 2  ;;  %v658_v28 = vrot.slane %v610_v10, 4 }
  0xe9   :  { %v787_v8 = vadd.f32 %v786_v12, %v785_v43  ;;  %v659_v20 = vrot.slane %v617_v13, 3  ;;  %v794_v57 = vadd.f32 %v793_v14, %v792_v27  ;;  %v660_v29 = vrot.slane %v624_v15, 2 }
  0xea   :  { %v801_v47 = vadd.f32 %v800_v46, %v799_v55  ;;  %v631_v5 = vadd.f32 %v630_v26, %v629_v19  ;;  %v806_v59 = vadd.f32 %v805_v58, %v804_v62  ;;  %v582_v49 = vadd.f32 %v581_v17, %v1258_v30 }
  0xeb   :  { %v758_v9 = vrot.slane %v1276_v56, 1  ;;  %v833_v24 = vrot.slane %v773_v32, 6  ;;  %v670_v16 = vsel %vm459_vm5, %v656_v22, %v657_v6  ;;  %v834_v11 = vrot.slane %v780_v25, 5 }
  0xec   :  { %v661_v33 = vrot.slane %v631_v5, 1  ;;  %v807_v34 = vrot.slane %v806_v59, 1  ;;  %v669_v38 = vsel %vm455_vm4, %v582_v49, %v655_v18  ;;  %v832_v35 = vrot.slane %v766_v21, 7 }
  0xed   :  { %v835_v36 = vrot.slane %v787_v8, 4  ;;  %v672_v37 = vsel %vm465_vm6, %v658_v28, %v659_v20  ;;  %v836_v41 = vrot.slane %v794_v57, 3  ;;  %v837_v23 = vrot.slane %v801_v47, 2 }
  0xee   :  { %v673_v39 = vsel %vm469_vm7, %v660_v29, %v661_v33  ;;  %v808_v43 = vadd.f32 %v807_v34, %v806_v59  ;;  %v671_v30 = vsel %vm463_vm3, %v669_v38, %v670_v16  ;;  %v759_v44 = vadd.f32 %v758_v9, %v1276_v56 }
  0xef   :  { %v674_v17 = vsel %vm473_vm8, %v672_v37, %v673_v39  ;;  %v847_v31 = vsel %vm459_vm5, %v833_v24, %v834_v11  ;;  %v849_v45 = vsel %vm465_vm6, %v835_v36, %v836_v41 }
  0xf0   :  { %v675_v2 = vsel %vm475_vm9, %v671_v30, %v674_v17  ;;  %v838_v48 = vrot.slane %v808_v43, 1  ;;  %v846_v50 = vsel %vm455_vm4, %v759_v44, %v832_v35 }
  0xf1   :  { %949 = vst [vmem:[%s1341_s4 + $0x10] ss:$2 sm:$0xff] %v675_v2  ;;  %v848_v52 = vsel %vm463_vm3, %v846_v50, %v847_v31 }
  0xf2   :  { %v850_v51 = vsel %vm469_vm7, %v837_v23, %v838_v48 }
  0xf3   :  { %v851_v27 = vsel %vm473_vm8, %v849_v45, %v850_v51 }
  0xf4   :  { %v852_v56 = vsel %vm475_vm9, %v848_v52, %v851_v27 }
  0xf5   :  { %951 = vst [vmem:[%s1341_s4 + $0x11] ss:$2 sm:$0xff] %v852_v56 }
  0xf6   :  { %867 = vsyncpa [#allocation3], 1 }
  0xf7   :  { %868 = vsyncpa [#allocation5], 1 }

// kernel: tile.43
= control target key start
LH: loop header
LB: loop body
LE: loop exit
PB: predicated region body
PF: predicated region fallthrough
CT: control target
= control target key end

     0   :  { %s28_s0 = inlined_call_operand.vmem [shape: f32[64], index: 0, kind: input, shape index: {}]   ;;  %s29_s1 = inlined_call_operand.vmem [shape: f32[9,64], index: 1, kind: output, shape index: {}]  }
   0x1   :  { %v4_v0 = vld [vmem:[%s28_s0] ss:$0 sm:$0xff] }
   0x2   :  { %5 = vst [vmem:[%s29_s1] sm:$0xff] %v4_v0 }
   0x3   :  { %8 = vst [vmem:[%s29_s1 + $0x8] sm:$0xff] %v4_v0 }

// kernel: tile.44
= control target key start
LH: loop header
LB: loop body
LE: loop exit
PB: predicated region body
PF: predicated region fallthrough
CT: control target
= control target key end

     0   :  { %vm3_vm0 = vcmask 523264   ;;  %s49_s8 = smov 64   ;;  %vm11_vm1 = vcmask 1048064   ;;  %s81_s0 = inlined_call_operand.vmem [shape: f32[9,64], index: 0, kind: input, shape index: {}]   ;;  %s82_s1 = inlined_call_operand.vmem [shape: f32[1,576], index: 1, kind: output, shape index: {}]  }
   0x1   :  { %v43_v0 = vld [vmem:[%s81_s0 + $0x1] ss:$2 sm:$0xf]   ;;  %v2_v1 = vld [vmem:[%s81_s0] ss:$2 sm:$0x1f]  }
   0x2   :  { %9 = vrot.lane.b32.xlu0 %v43_v0, %s49_s8  ;;  %4 = vst.msk [vmem:[#allocation0] ss:$8 sm:$0xf] %vm3_vm0, %v2_v1  }
   0x3   :  { %6 = vst.msk [vmem:[#allocation0 + $0x1c] sm:$0x10] %vm3_vm0, %v2_v1  }
   0xa   :  { %v38_v2 = vld [vmem:[#allocation0 + $0x20] sm:$0x1] }
   0xb   :  { %47 = vst [vmem:[%s82_s1 + $0x4] sm:$0x1] %v38_v2 }
  0x74   :  { %v10_v3 = vpop.permute.xlu0 %9  }
  0x75   :  { %12 = vst.msk [vmem:[#allocation0] ss:$8 sm:$0xf] %vm11_vm1, %v10_v3  }
  0x7c   :  { %v15_v4 = vld [vmem:[#allocation0] sm:$0x1]  ;;  %v20_v5 = vld [vmem:[#allocation0 + $0x8] sm:$0x1]  ;;  %v26_v6 = vld [vmem:[#allocation0 + $0x10] sm:$0x1] }
  0x7d   :  { %18 = vst [vmem:[%s82_s1] sm:$0x1] %v15_v4  ;;  %v32_v7 = vld [vmem:[#allocation0 + $0x18] sm:$0x1] }
  0x7e   :  { %44 = vst [vmem:[%s82_s1 + $0x1] sm:$0x1] %v20_v5 }
  0x7f   :  { %45 = vst [vmem:[%s82_s1 + $0x2] sm:$0x1] %v26_v6 }
  0x80   :  { %46 = vst [vmem:[%s82_s1 + $0x3] sm:$0x1] %v32_v7 }

// kernel: generator_forward.5
= control target key start
LH: loop header
LB: loop body
LE: loop exit
PB: predicated region body
PF: predicated region fallthrough
CT: control target
= control target key end

     0   :  { %12 = vsyncpa [#allocation3], 0  ;;  %s2973_s0 = inlined_call_operand.vmem [shape: bf16[32,1152], index: 0, kind: input, shape index: {}]   ;;  %s2974_s1 = inlined_call_operand.hbm [shape: bf16[1152,256], index: 1, kind: input, shape index: {}]   ;;  %s2975_s2 = inlined_call_operand.hbm [shape: f32[1,256], index: 2, kind: input, shape index: {}]   ;;  %s2976_s3 = inlined_call_operand.vmem [shape: f32[1,1152], index: 3, kind: input, shape index: {}]   ;;  %s2977_s4 = inlined_call_operand.vmem [shape: f32[1,1152], index: 4, kind: input, shape index: {}]   ;;  %s2978_s5 = inlined_call_operand.vmem [shape: bf16[32,256], index: 5, kind: output, shape index: {0}]   ;;  %s2979_s6 = inlined_call_operand.vmem [shape: f32[2,2,256], index: 6, kind: output, shape index: {1}]  }
   0x1   :  { %13 = vsyncpa [#allocation5], 0  ;;  %s2637_s21 = smov 0  }
   0x2 LB: > { %s197_s24 = sshll.u32 %s2974_s1, 4  ;;  %s2646_s25 = sadd.s32 4294967295, %s2596_s21   ;;  %s2596_s21 = sphi %s2637_s21, %s19_s21   ;;  %s198_s24 = int_to_ptr.hbm [resolvable:$true] %s197_s24 }
   0x3   : > { %p1748_p0 = scmp.ge.s32.totalorder %s2596_s21, 1  ;;  %p186_p1 = scmp.lt.s32.totalorder %s2596_s21, 3 }
   0x4   : > { %p2504_p2 = scmp.eq.s32.totalorder %s2646_s25, 0  ;;  %s2598_s27 = smov [#allocation2]  }
   0x5   : > { %p2651_p3 = pnand %p1748_p0, %p186_p1  ;;  %s199_s28 = sshll.u32 %s2598_s27, 4  ;;  %s200_s28 = int_to_ptr.vmem [resolvable:$true] %s199_s28 }
   0x6   : > { %s212_s7 = sshll.u32 %s2975_s2, 4  ;;  %s2599_s8 = smov [#allocation4]   ;;  %s213_s7 = int_to_ptr.hbm [resolvable:$true] %s212_s7 }
   0x7   : > { %p2497_p4 = pneg %p2651_p3  ;;  %s214_s9 = sshll.u32 %s2599_s8, 4  ;;  %s215_s9 = int_to_ptr.vmem [resolvable:$true] %s214_s9 }
   0x8   : > { %s2600_s10 = smov 128   ;;  %s2601_s11 = smov 8  }
   0x9   : > { %p2498_p5 = pnand %p2504_p2, %p2497_p4  ;;  %243 = sbr.rel (%p2651_p3) target bundleno = 339 (0x153), region = 40 }
   0xb   : > { %2500 = dma.hbm_to_vmem [thread:$0]  (!%p2498_p5), %s198_s24, 18432, %s200_s28, [#allocation3], %s2600_s10, %s2600_s10, %s2601_s11  }
   0xc   : > { %2503 = dma.hbm_to_vmem [thread:$0]  (!%p2498_p5), %s213_s7, 32, %s215_s9, [#allocation5]  }
   0xe   : > { %2587 = dma.done.wait (%p2504_p2), [#allocation3], 18432  }
   0xf   : > { %2589 = vsyncadd (%p2504_p2), [#allocation3], 4294948864 }
  0x10   : > { %2591 = dma.done.wait (%p2504_p2), [#allocation5], 32  }
  0x11   : > { %2593 = vsyncadd (%p2504_p2), [#allocation5], 4294967264  ;;  %s1755_s12 = sshll.u32 %s2646_s25, 1  ;;  %v1820_v0 = vld [vmem:[#allocation2 + $0x70] sm:$0xf]  ;;  %s2338_s28 = sshll.u32 %s2646_s25, 4 }
  0x12   : > { %v2359_v1 = vld [vmem:[#allocation2 + $0x74] sm:$0xf0]  ;;  %v1884_v2 = vld [vmem:[#allocation2 + $0xf0] sm:$0xf]  ;;  %v1812_v11 = vld [vmem:[#allocation2 + $0x60] sm:$0xf] }
  0x13   : > { %v1821_v3 = vor.u32 %v2359_v1, %v1820_v0  ;;  %v2375_v4 = vld [vmem:[#allocation2 + $0xf4] sm:$0xf0]  ;;  %v1948_v5 = vld [vmem:[#allocation2 + $0x170] sm:$0xf]  ;;  %v2357_v13 = vld [vmem:[#allocation2 + $0x64] sm:$0xf0] }
  0x14   : > { %v2391_v6 = vld [vmem:[#allocation2 + $0x174] sm:$0xf0]  ;;  %v1885_v7 = vor.u32 %v2375_v4, %v1884_v2  ;;  %v2012_v9 = vld [vmem:[#allocation2 + $0x1f0] sm:$0xf]  ;;  %v1876_v14 = vld [vmem:[#allocation2 + $0xe0] sm:$0xf]  ;;  %v1813_v16 = vor.u32 %v2357_v13, %v1812_v11 }
  0x15   : > { %v1949_v8 = vor.u32 %v2391_v6, %v1948_v5  ;;  %v2407_v10 = vld [vmem:[#allocation2 + $0x1f4] sm:$0xf0]  ;;  %1310 = vmatpush.bf16.msra.mxu0 %v1821_v3  ;;  %v2373_v15 = vld [vmem:[#allocation2 + $0xe4] sm:$0xf0]  ;;  %v1940_v18 = vld [vmem:[#allocation2 + $0x160] sm:$0xf] }
  0x16   : > { %v2013_v12 = vor.u32 %v2407_v10, %v2012_v9  ;;  %1324 = vmatpush.bf16.msra.mxu1 %v1885_v7  ;;  %v1877_v17 = vor.u32 %v2373_v15, %v1876_v14  ;;  %v2389_v19 = vld [vmem:[#allocation2 + $0x164] sm:$0xf0]  ;;  %v2004_v20 = vld [vmem:[#allocation2 + $0x1e0] sm:$0xf]  ;;  %v1804_v23 = vld [vmem:[#allocation2 + $0x50] sm:$0xf] }
  0x17   : > { %1338 = vmatpush.bf16.msra.mxu2 %v1949_v8  ;;  %v1941_v21 = vor.u32 %v2389_v19, %v1940_v18  ;;  %v2405_v22 = vld [vmem:[#allocation2 + $0x1e4] sm:$0xf0]  ;;  %v2355_v24 = vld [vmem:[#allocation2 + $0x54] sm:$0xf0]  ;;  %v1868_v26 = vld [vmem:[#allocation2 + $0xd0] sm:$0xf] }
  0x18   : > { %1352 = vmatpush.bf16.msra.mxu3 %v2013_v12  ;;  %v2005_v25 = vor.u32 %v2405_v22, %v2004_v20  ;;  %v2371_v27 = vld [vmem:[#allocation2 + $0xd4] sm:$0xf0]  ;;  %v1932_v28 = vld [vmem:[#allocation2 + $0x150] sm:$0xf]  ;;  %v1805_v29 = vor.u32 %v2355_v24, %v1804_v23  ;;  %v1796_v35 = vld [vmem:[#allocation2 + $0x40] sm:$0xf] }
  0x19   : > { %1311 = vmatpush.bf16.msra.mxu0 %v1813_v16  ;;  %v2387_v30 = vld [vmem:[#allocation2 + $0x154] sm:$0xf0]  ;;  %v1996_v31 = vld [vmem:[#allocation2 + $0x1d0] sm:$0xf]  ;;  %v1869_v33 = vor.u32 %v2371_v27, %v1868_v26  ;;  %v2353_v36 = vld [vmem:[#allocation2 + $0x44] sm:$0xf0] }
  0x1a   : > { %v2403_v32 = vld [vmem:[#allocation2 + $0x1d4] sm:$0xf0]  ;;  %1325 = vmatpush.bf16.msra.mxu1 %v1877_v17  ;;  %v1933_v34 = vor.u32 %v2387_v30, %v1932_v28  ;;  %v1860_v37 = vld [vmem:[#allocation2 + $0xc0] sm:$0xf]  ;;  %v2369_v39 = vld [vmem:[#allocation2 + $0xc4] sm:$0xf0]  ;;  %v1797_v44 = vor.u32 %v2353_v36, %v1796_v35 }
  0x1b   : > { %1339 = vmatpush.bf16.msra.mxu2 %v1941_v21  ;;  %v1997_v38 = vor.u32 %v2403_v32, %v1996_v31  ;;  %v1924_v40 = vld [vmem:[#allocation2 + $0x140] sm:$0xf]  ;;  %v2385_v41 = vld [vmem:[#allocation2 + $0x144] sm:$0xf0]  ;;  %p2675_p6 = scmp.lt.s32.totalorder %s1755_s12, 3  ;;  %v1861_v45 = vor.u32 %v2369_v39, %v1860_v37  ;;  %p300_p7 = scmp.lt.s32.totalorder %s2646_s25, 1 }
  0x1c   : > { %1353 = vmatpush.bf16.msra.mxu3 %v2005_v25  ;;  %v1988_v42 = vld [vmem:[#allocation2 + $0x1c0] sm:$0xf]  ;;  %v2401_v43 = vld [vmem:[#allocation2 + $0x1c4] sm:$0xf0]  ;;  %v1925_v46 = vor.u32 %v2385_v41, %v1924_v40  ;;  %v1788_v47 = vld [vmem:[#allocation2 + $0x30] sm:$0xf] }
  0x1d   : > { %1312 = vmatpush.bf16.msra.mxu0 %v1805_v29  ;;  %v2351_v48 = vld [vmem:[#allocation2 + $0x34] sm:$0xf0]  ;;  %v1852_v49 = vld [vmem:[#allocation2 + $0xb0] sm:$0xf]  ;;  %v1989_v50 = vor.u32 %v2401_v43, %v1988_v42  ;;  %s2983_s12 = smov (!%p2675_p6, %s1755_s12), 3  ;;  %s2985_s25 = smov (!%p300_p7, %s2646_s25), 1 }
  0x1e   : > { %1326 = vmatpush.bf16.msra.mxu1 %v1869_v33  ;;  %v2367_v51 = vld [vmem:[#allocation2 + $0xb4] sm:$0xf0]  ;;  %v1916_v52 = vld [vmem:[#allocation2 + $0x130] sm:$0xf]  ;;  %v1789_v56 = vor.u32 %v2351_v48, %v1788_v47  ;;  %v1780_v59 = vld [vmem:[#allocation2 + $0x20] sm:$0xf] }
  0x1f   : > { %1340 = vmatpush.bf16.msra.mxu2 %v1933_v34  ;;  %v2383_v53 = vld [vmem:[#allocation2 + $0x134] sm:$0xf0]  ;;  %v1980_v54 = vld [vmem:[#allocation2 + $0x1b0] sm:$0xf]  ;;  %v1853_v57 = vor.u32 %v2367_v51, %v1852_v49  ;;  %v2349_v60 = vld [vmem:[#allocation2 + $0x24] sm:$0xf0] }
  0x20   : > { %1354 = vmatpush.bf16.msra.mxu3 %v1997_v38  ;;  %v2399_v55 = vld [vmem:[#allocation2 + $0x1b4] sm:$0xf0]  ;;  %v1917_v58 = vor.u32 %v2383_v53, %v1916_v52  ;;  %v1844_v61 = vld [vmem:[#allocation2 + $0xa0] sm:$0xf]  ;;  %v2365_v63 = vld [vmem:[#allocation2 + $0xa4] sm:$0xf0]  ;;  %v1781_v4 = vor.u32 %v2349_v60, %v1780_v59 }
  0x21   : > { %1313 = vmatpush.bf16.msra.mxu0 %v1797_v44  ;;  %v1981_v62 = vor.u32 %v2399_v55, %v1980_v54  ;;  %v1908_v0 = vld [vmem:[#allocation2 + $0x120] sm:$0xf]  ;;  %v2381_v1 = vld [vmem:[#allocation2 + $0x124] sm:$0xf0]  ;;  %v1772_v5 = vld [vmem:[#allocation2 + $0x10] sm:$0xf]  ;;  %v1845_v6 = vor.u32 %v2365_v63, %v1844_v61 }
  0x22   : > { %1327 = vmatpush.bf16.msra.mxu1 %v1861_v45  ;;  %v1972_v2 = vld [vmem:[#allocation2 + $0x1a0] sm:$0xf]  ;;  %v2397_v3 = vld [vmem:[#allocation2 + $0x1a4] sm:$0xf0]  ;;  %s2488_s14 = smul.u32 36, %s2983_s12  ;;  %v1909_v7 = vor.u32 %v2381_v1, %v1908_v0  ;;  %s2342_s29 = sshll.u32 %s2983_s12, 3 }
  0x23   : > { %1341 = vmatpush.bf16.msra.mxu2 %v1925_v46  ;;  %v2347_v8 = vld [vmem:[#allocation2 + $0x14] sm:$0xf0]  ;;  %v1836_v9 = vld [vmem:[#allocation2 + $0x90] sm:$0xf]  ;;  %v1973_v11 = vor.u32 %v2397_v3, %v1972_v2  ;;  %v1764_v16 = vld [vmem:[#allocation2] sm:$0xf]  ;;  %s298_s8 = scalar_lea.vmem %s2978_s5, %s2342_s29 }
  0x24   : > { %1355 = vmatpush.bf16.msra.mxu3 %v1989_v50  ;;  %v2363_v10 = vld [vmem:[#allocation2 + $0x94] sm:$0xf0]  ;;  %v1900_v12 = vld [vmem:[#allocation2 + $0x110] sm:$0xf]  ;;  %v2345_v17 = vld [vmem:[#allocation2 + $0x4] sm:$0xf0]  ;;  %v1773_v18 = vor.u32 %v2347_v8, %v1772_v5  ;;  %s2721_s17 = scalar_lea.vmem %s2973_s0, %s2488_s14 }
  0x25   : > { %1314 = vmatpush.bf16.msra.mxu0 %v1789_v56  ;;  %v2379_v13 = vld [vmem:[#allocation2 + $0x114] sm:$0xf0]  ;;  %v1964_v14 = vld [vmem:[#allocation2 + $0x190] sm:$0xf]  ;;  %v1828_v19 = vld [vmem:[#allocation2 + $0x80] sm:$0xf]  ;;  %v1837_v23 = vor.u32 %v2363_v10, %v1836_v9  ;;  %v1765_v41 = vor.u32 %v2345_v17, %v1764_v16 }
  0x26   : > { %1328 = vmatpush.bf16.msra.mxu1 %v1853_v57  ;;  %v2395_v15 = vld [vmem:[#allocation2 + $0x194] sm:$0xf0]  ;;  %v2361_v20 = vld [vmem:[#allocation2 + $0x84] sm:$0xf0]  ;;  %v1892_v21 = vld [vmem:[#allocation2 + $0x100] sm:$0xf]  ;;  %v1901_v24 = vor.u32 %v2379_v13, %v1900_v12 }
  0x27   : > { %1342 = vmatpush.bf16.msra.mxu2 %v1917_v58  ;;  %v2377_v22 = vld [vmem:[#allocation2 + $0x104] sm:$0xf0]  ;;  %v2076_v25 = vld [vmem:[#allocation2 + $0x270] sm:$0xf]  ;;  %v2423_v26 = vld [vmem:[#allocation2 + $0x274] sm:$0xf0]  ;;  %v1965_v29 = vor.u32 %v2395_v15, %v1964_v14  ;;  %v1829_v45 = vor.u32 %v2361_v20, %v1828_v19 }
  0x28   : > { %1356 = vmatpush.bf16.msra.mxu3 %v1981_v62  ;;  %v2140_v27 = vld [vmem:[#allocation2 + $0x2f0] sm:$0xf]  ;;  %v2439_v28 = vld [vmem:[#allocation2 + $0x2f4] sm:$0xf0]  ;;  %v1956_v32 = vld [vmem:[#allocation2 + $0x180] sm:$0xf]  ;;  %v1893_v46 = vor.u32 %v2377_v22, %v1892_v21  ;;  %v2077_v50 = vor.u32 %v2423_v26, %v2076_v25 }
  0x29   : > { %1315 = vmatpush.bf16.msra.mxu0 %v1781_v4  ;;  %v2204_v30 = vld [vmem:[#allocation2 + $0x370] sm:$0xf]  ;;  %v2455_v31 = vld [vmem:[#allocation2 + $0x374] sm:$0xf0]  ;;  %v2393_v33 = vld [vmem:[#allocation2 + $0x184] sm:$0xf0]  ;;  %v2141_v51 = vor.u32 %v2439_v28, %v2140_v27 }
  0x2a   : > { %1329 = vmatpush.bf16.msra.mxu1 %v1845_v6  ;;  %v2686_v34 = vld [vmem:[#allocation2 + $0x3f0] sm:$0xf]  ;;  %v2471_v35 = vld [vmem:[#allocation2 + $0x3f4] sm:$0xf0]  ;;  %v2688_v36 = vld [vmem:[#allocation2 + $0x260] sm:$0xf]  ;;  %v2205_v55 = vor.u32 %v2455_v31, %v2204_v30  ;;  %v1957_v56 = vor.u32 %v2393_v33, %v1956_v32 }
  0x2b   : > { %1343 = vmatpush.bf16.msra.mxu2 %v1909_v7  ;;  %v2690_v37 = vld [vmem:[#allocation2 + $0x264] sm:$0xf0]  ;;  %v2692_v38 = vld [vmem:[#allocation2 + $0x2e0] sm:$0xf]  ;;  %v2704_v47 = vld [vmem:[#allocation2 + $0x250] sm:$0xf]  ;;  %v2269_v57 = vor.u32 %v2471_v35, %v2686_v34 }
  0x2c   : > { %1357 = vmatpush.bf16.msra.mxu3 %v1973_v11  ;;  %v2694_v39 = vld [vmem:[#allocation2 + $0x2e4] sm:$0xf0]  ;;  %v2696_v40 = vld [vmem:[#allocation2 + $0x360] sm:$0xf]  ;;  %v2706_v48 = vld [vmem:[#allocation2 + $0x254] sm:$0xf0]  ;;  %v2069_v59 = vor.u32 %v2690_v37, %v2688_v36 }
  0x2d   : > { %1316 = vmatpush.bf16.msra.mxu0 %v1773_v18  ;;  %v2698_v42 = vld [vmem:[#allocation2 + $0x364] sm:$0xf0]  ;;  %v2700_v43 = vld [vmem:[#allocation2 + $0x3e0] sm:$0xf]  ;;  %v2708_v49 = vld [vmem:[#allocation2 + $0x2d0] sm:$0xf]  ;;  %v2133_v60 = vor.u32 %v2694_v39, %v2692_v38  ;;  %v2061_v2 = vor.u32 %v2706_v48, %v2704_v47 }
  0x2e   : > { %v2702_v44 = vld [vmem:[#allocation2 + $0x3e4] sm:$0xf0]  ;;  %1330 = vmatpush.bf16.msra.mxu1 %v1837_v23  ;;  %v2710_v52 = vld [vmem:[#allocation2 + $0x2d4] sm:$0xf0]  ;;  %v2712_v53 = vld [vmem:[#allocation2 + $0x350] sm:$0xf]  ;;  %v2197_v61 = vor.u32 %v2698_v42, %v2696_v40 }
  0x2f   : > { %1344 = vmatpush.bf16.msra.mxu2 %v1901_v24  ;;  %v2714_v54 = vld [vmem:[#allocation2 + $0x354] sm:$0xf0]  ;;  %v2724_v58 = vld [vmem:[#allocation2 + $0x3d0] sm:$0xf]  ;;  %v2261_v62 = vor.u32 %v2702_v44, %v2700_v43  ;;  %v2736_v0 = vld [vmem:[#allocation2 + $0x240] sm:$0xf]  ;;  %v2125_v3 = vor.u32 %v2710_v52, %v2708_v49 }
  0x30   : > { %1358 = vmatpush.bf16.msra.mxu3 %v1965_v29  ;;  %v2734_v63 = vld [vmem:[#allocation2 + $0x3d4] sm:$0xf0]  ;;  %v2738_v1 = vld [vmem:[#allocation2 + $0x244] sm:$0xf0]  ;;  %v2189_v4 = vor.u32 %v2714_v54, %v2712_v53  ;;  %v305_v5 = vld [vmem:[%s2721_s17] sm:$0xff]  ;;  %s2343_s9 = sshll.u32 %s2985_s25, 2 }
  0x31   : > { %1317 = vmatpush.bf16.msra.mxu0 %v1765_v41  ;;  %v310_v6 = vld [vmem:[%s2721_s17 + $0x24] sm:$0xff]  ;;  %v315_v8 = vunpack.c.l.bf16 %v305_v5  ;;  %v2763_v13 = vld [vmem:[%s2721_s17 + $0x2c] sm:$0xff]  ;;  %v2766_v15 = vld [vmem:[#allocation2 + $0x2c0] sm:$0xf]  ;;  %v2253_v21 = vor.u32 %v2734_v63, %v2724_v58  ;;  %v316_v24 = vunpack.c.h.bf16 %v305_v5  ;;  %v2053_v25 = vor.u32 %v2738_v1, %v2736_v0  ;;  %s304_s12 = scalar_lea.vmem %s2979_s6, %s2343_s9 }
  0x32   : > { %1331 = vmatpush.bf16.msra.mxu1 %v1829_v45  ;;  %v2751_v7 = vld [vmem:[%s2976_s3] sm:$0xff]  ;;  %v324_v9 = vunpack.c.l.bf16 %v310_v6  ;;  %v2760_v12 = vld [vmem:[%s2721_s17 + $0x8] sm:$0xff]  ;;  %v326_v19 = vunpack.c.l.bf16 %v2763_v13  ;;  %v325_v28 = vunpack.c.h.bf16 %v310_v6  ;;  %v2791_v43 = vld [vmem:[#allocation2 + $0x230] sm:$0xf]  ;;  %vm1600_vm2 = vcmask 1040384  }
  0x33   : > { %1345 = vmatpush.bf16.msra.mxu2 %v1893_v46  ;;  %v337_v10 = vperm.slane %v2751_v7, 0  ;;  %v2757_v11 = vld [vmem:[%s2977_s4] sm:$0xff]  ;;  %v339_v14 = vperm.slane %v2751_v7, 2  ;;  %v2768_v16 = vld [vmem:[#allocation2 + $0x2c4] sm:$0xf0]  ;;  %v317_v18 = vunpack.c.l.bf16 %v2760_v12  ;;  %v338_v34 = vperm.slane %v2751_v7, 1 }
  0x34   : > { %1359 = vmatpush.bf16.msra.mxu3 %v1957_v56  ;;  %v377_v17 = vperm.slane %v2757_v11, 0  ;;  %v379_v20 = vperm.slane %v2757_v11, 2  ;;  %v2117_v29 = vor.u32 %v2768_v16, %v2766_v15  ;;  %v2780_v30 = vld [vmem:[#allocation2 + $0x340] sm:$0xf]  ;;  %v2782_v31 = vld [vmem:[#allocation2 + $0x344] sm:$0xf0]  ;;  %v318_v40 = vunpack.c.h.bf16 %v2760_v12 }
  0x35   : > { %1366 = vmatpush.bf16.msrb.mxu0 %v2077_v50  ;;  %v355_v22 = vmul.f32 %v337_v10, %v315_v8  ;;  %v364_v23 = vmul.f32 %v337_v10, %v324_v9  ;;  %v357_v26 = vmul.f32 %v339_v14, %v317_v18  ;;  %v366_v27 = vmul.f32 %v339_v14, %v326_v19  ;;  %v2785_v35 = vld [vmem:[#allocation2 + $0x3c0] sm:$0xf]  ;;  %v2787_v36 = vld [vmem:[#allocation2 + $0x3c4] sm:$0xf0]  ;;  %v2793_v44 = vld [vmem:[#allocation2 + $0x234] sm:$0xf0] }
  0x36   : > { %1380 = vmatpush.bf16.msrb.mxu1 %v2141_v51  ;;  %v378_v39 = vperm.slane %v2757_v11, 1  ;;  %v356_v45 = vmul.f32 %v338_v34, %v316_v24  ;;  %v365_v46 = vmul.f32 %v338_v34, %v325_v28  ;;  %v2795_v49 = vld [vmem:[#allocation2 + $0x2b0] sm:$0xf]  ;;  %v2797_v50 = vld [vmem:[#allocation2 + $0x2b4] sm:$0xf0]  ;;  %v340_v56 = vperm.slane %v2751_v7, 3 }
  0x37   : > { %1394 = vmatpush.bf16.msrb.mxu2 %v2205_v55  ;;  %v395_v32 = vadd.f32 %v377_v17, %v355_v22  ;;  %v404_v33 = vadd.f32 %v377_v17, %v364_v23  ;;  %v397_v37 = vadd.f32 %v379_v20, %v357_v26  ;;  %v406_v38 = vadd.f32 %v379_v20, %v366_v27  ;;  %v2799_v51 = vld [vmem:[#allocation2 + $0x330] sm:$0xf]  ;;  %v2801_v52 = vld [vmem:[#allocation2 + $0x334] sm:$0xf0]  ;;  %v2812_v63 = vld [vmem:[#allocation2 + $0x220] sm:$0xf] }
  0x38   : > { %1408 = vmatpush.bf16.msrb.mxu3 %v2269_v57  ;;  %v327_v55 = vunpack.c.h.bf16 %v2763_v13  ;;  %v396_v58 = vadd.f32 %v378_v39, %v356_v45  ;;  %v2814_v5 = vld [vmem:[#allocation2 + $0x224] sm:$0xf0]  ;;  %v358_v6 = vmul.f32 %v340_v56, %v318_v40  ;;  %v2823_v9 = vld [vmem:[#allocation2 + $0x2a0] sm:$0xf]  ;;  %v2828_v12 = vld [vmem:[%s2721_s17 + $0x10] sm:$0xff]  ;;  %v2245_v53 = vor.u32 %v2787_v36, %v2785_v35 }
  0x39   : > { %1367 = vmatpush.bf16.msrb.mxu0 %v2069_v59  ;;  %v413_v41 = vmax.f32 %v395_v32, 0.0  ;;  %v422_v42 = vmax.f32 %v404_v33, 0.0  ;;  %v415_v47 = vmax.f32 %v397_v37, 0.0  ;;  %v424_v48 = vmax.f32 %v406_v38, 0.0  ;;  %v2825_v10 = vld [vmem:[#allocation2 + $0x2a4] sm:$0xf0] }
  0x3a   : > { %1381 = vmatpush.bf16.msrb.mxu1 %v2133_v60  ;;  %v405_v59 = vadd.f32 %v378_v39, %v365_v46  ;;  %v380_v60 = vperm.slane %v2757_v11, 3  ;;  %v367_v8 = vmul.f32 %v340_v56, %v327_v55  ;;  %v2831_v13 = vld [vmem:[%s2721_s17 + $0x34] sm:$0xff]  ;;  %v414_v54 = vmax.f32 %v396_v58, 0.0  ;;  %v2836_v14 = vld [vmem:[#allocation2 + $0x320] sm:$0xf] }
  0x3b   : > { %1395 = vmatpush.bf16.msrb.mxu2 %v2197_v61  ;;  %v2805_v57 = vpack.c.bf16 %v422_v42, %v413_v41  ;;  %v2808_v61 = vld [vmem:[#allocation2 + $0x3b0] sm:$0xf]  ;;  %v2838_v15 = vld [vmem:[#allocation2 + $0x324] sm:$0xf0]  ;;  %v2045_v16 = vor.u32 %v2793_v44, %v2791_v43  ;;  %v2843_v19 = vld [vmem:[#allocation2 + $0x3a0] sm:$0xf]  ;;  %v2109_v22 = vor.u32 %v2797_v50, %v2795_v49  ;;  %v2173_v23 = vor.u32 %v2801_v52, %v2799_v51 }
  0x3c   : > { %1409 = vmatpush.bf16.msrb.mxu3 %v2261_v62  ;;  %v2810_v62 = vld [vmem:[#allocation2 + $0x3b4] sm:$0xf0]  ;;  %v398_v17 = vadd.f32 %v380_v60, %v358_v6  ;;  %v407_v18 = vadd.f32 %v380_v60, %v367_v8  ;;  %v2845_v20 = vld [vmem:[#allocation2 + $0x3a4] sm:$0xf0]  ;;  %v2859_v26 = vld [vmem:[#allocation2 + $0x210] sm:$0xf]  ;;  %v2037_v1 = vor.u32 %v2814_v5, %v2812_v63  ;;  %v2101_v32 = vor.u32 %v2825_v10, %v2823_v9 }
  0x3d   : > { %1368 = vmatpush.bf16.msrb.mxu0 %v2061_v2  ;;  %v2181_v2 = vor.u32 %v2782_v31, %v2780_v30  ;;  %v2861_v27 = vld [vmem:[#allocation2 + $0x214] sm:$0xf0]  ;;  %v2864_v28 = vld [vmem:[%s2721_s17 + $0x3c] sm:$0xff]  ;;  %v2237_v0 = vor.u32 %v2810_v62, %v2808_v61  ;;  %v2165_v33 = vor.u32 %v2838_v15, %v2836_v14  ;;  %v2879_v34 = vld [vmem:[#allocation2 + $0x310] sm:$0xf]  ;;  %v319_v36 = vunpack.c.l.bf16 %v2828_v12 }
  0x3e   : > { %1382 = vmatpush.bf16.msrb.mxu1 %v2125_v3  ;;  %v2821_v3 = vpack.c.bf16 %v424_v48, %v415_v47  ;;  %1318 = vmatmul.bf16.vlgmr.msra.gmra.mxu0 %v2805_v57  ;;  %v416_v30 = vmax.f32 %v398_v17, 0.0  ;;  %v425_v31 = vmax.f32 %v407_v18, 0.0  ;;  %v2881_v35 = vld [vmem:[#allocation2 + $0x314] sm:$0xf0]  ;;  %v328_v37 = vunpack.c.l.bf16 %v2831_v13  ;;  %v2889_v40 = vld [vmem:[#allocation2 + $0x390] sm:$0xf] }
  0x3f   : > { %1396 = vmatpush.bf16.msrb.mxu2 %v2189_v4  ;;  %v423_v4 = vmax.f32 %v405_v59, 0.0  ;;  %v2229_v39 = vor.u32 %v2845_v20, %v2843_v19  ;;  %v2891_v41 = vld [vmem:[#allocation2 + $0x394] sm:$0xf0]  ;;  %v330_v43 = vunpack.c.l.bf16 %v2864_v28  ;;  %v2029_v44 = vor.u32 %v2861_v27, %v2859_v26  ;;  %v2909_v55 = vld [vmem:[#allocation2 + $0x200] sm:$0xf] }
  0x40   : > { %1410 = vmatpush.bf16.msrb.mxu3 %v2253_v21  ;;  %1346 = vmatmul.bf16.vlgmr.msra.gmra.mxu2 %v2821_v3  ;;  %v2848_v21 = vld [vmem:[%s2721_s17 + $0x18] sm:$0xff]  ;;  %v2885_v38 = vpack.c.bf16 %v425_v31, %v416_v30  ;;  %v341_v46 = vperm.slane %v2751_v7, 4  ;;  %v381_v47 = vperm.slane %v2757_v11, 4  ;;  %v2157_v48 = vor.u32 %v2881_v35, %v2879_v34  ;;  %v2911_v56 = vld [vmem:[#allocation2 + $0x204] sm:$0xf0] }
  0x41   : > { %1369 = vmatpush.bf16.msrb.mxu0 %v2053_v25  ;;  %v2857_v24 = vpack.c.bf16 %v423_v4, %v414_v54  ;;  %v2870_v25 = vld [vmem:[#allocation2 + $0x290] sm:$0xf]  ;;  %v321_v42 = vunpack.c.l.bf16 %v2848_v21  ;;  %v343_v49 = vperm.slane %v2751_v7, 6  ;;  %v383_v50 = vperm.slane %v2757_v11, 6  ;;  %v2084_v61 = vld [vmem:[#allocation2 + $0x280] sm:$0xf] }
  0x42   : > { %1383 = vmatpush.bf16.msrb.mxu1 %v2117_v29  ;;  %v2872_v29 = vld [vmem:[#allocation2 + $0x294] sm:$0xf0]  ;;  %1360 = vmatmul.bf16.vlgmr.msra.gmra.mxu3 %v2885_v38  ;;  %v320_v51 = vunpack.c.h.bf16 %v2828_v12  ;;  %v2221_v52 = vor.u32 %v2891_v41, %v2889_v40  ;;  %v359_v58 = vmul.f32 %v341_v46, %v319_v36  ;;  %v368_v59 = vmul.f32 %v341_v46, %v328_v37  ;;  %v2425_v62 = vld [vmem:[#allocation2 + $0x284] sm:$0xf0]  ;;  %v2148_v8 = vld [vmem:[#allocation2 + $0x300] sm:$0xf] }
  0x43   : > { %1397 = vmatpush.bf16.msrb.mxu2 %v2181_v2  ;;  %1332 = vmatmul.bf16.vlgmr.msra.gmra.mxu1 %v2857_v24  ;;  %v2093_v45 = vor.u32 %v2872_v29, %v2870_v25  ;;  %v329_v60 = vunpack.c.h.bf16 %v2831_v13  ;;  %v361_v63 = vmul.f32 %v343_v49, %v321_v42  ;;  %v370_v5 = vmul.f32 %v343_v49, %v330_v43  ;;  %v2441_v54 = vld [vmem:[#allocation2 + $0x304] sm:$0xf0]  ;;  %v2332_v13 = vld [vmem:[#allocation2 + $0x470] sm:$0xf]  ;;  %v2487_v4 = vld [vmem:[#allocation2 + $0x474] sm:$0xf0] }
  0x44   : > { %1411 = vmatpush.bf16.msrb.mxu3 %v2245_v53  ;;  %v342_v2 = vperm.slane %v2751_v7, 5  ;;  %v382_v6 = vperm.slane %v2757_v11, 5  ;;  %v399_v9 = vadd.f32 %v381_v47, %v359_v58  ;;  %v408_v10 = vadd.f32 %v381_v47, %v368_v59  ;;  %v2358_v20 = vld [vmem:[#allocation2 + $0x74] sm:$0xf]  ;;  %v1886_v27 = vld [vmem:[#allocation2 + $0xf8] sm:$0xf0] }
  0x45   : > { %1370 = vmatpush.bf16.msrb.mxu0 %v2045_v16  ;;  %v322_v12 = vunpack.c.h.bf16 %v2848_v21  ;;  %v331_v53 = vunpack.c.h.bf16 %v2864_v28  ;;  %v401_v14 = vadd.f32 %v383_v50, %v361_v63  ;;  %v410_v15 = vadd.f32 %v383_v50, %v370_v5  ;;  %v2374_v26 = vld [vmem:[#allocation2 + $0xf4] sm:$0xf]  ;;  %v2457_v25 = vld [vmem:[#allocation2 + $0x384] sm:$0xf0]  ;;  %v1950_v37 = vld [vmem:[#allocation2 + $0x178] sm:$0xf0] }
  0x46   : > { %1384 = vmatpush.bf16.msrb.mxu1 %v2109_v22  ;;  %v360_v16 = vmul.f32 %v342_v2, %v320_v51  ;;  %v369_v17 = vmul.f32 %v342_v2, %v329_v60  ;;  %v2021_v18 = vor.u32 %v2911_v56, %v2909_v55  ;;  %v2085_v19 = vor.u32 %v2425_v62, %v2084_v61  ;;  %v1822_v22 = vld [vmem:[#allocation2 + $0x78] sm:$0xf0]  ;;  %v2356_v49 = vld [vmem:[#allocation2 + $0x64] sm:$0xf]  ;;  %v1814_v50 = vld [vmem:[#allocation2 + $0x68] sm:$0xf0] }
  0x47   : > { %1398 = vmatpush.bf16.msrb.mxu2 %v2173_v23  ;;  %v344_v23 = vperm.slane %v2751_v7, 7  ;;  %v384_v21 = vperm.slane %v2757_v11, 7  ;;  %v417_v28 = vmax.f32 %v399_v9, 0.0  ;;  %v426_v30 = vmax.f32 %v408_v10, 0.0  ;;  %v2390_v7 = vld [vmem:[#allocation2 + $0x174] sm:$0xf] }
  0x48   : > { %1412 = vmatpush.bf16.msrb.mxu3 %v2237_v0  ;;  %v400_v31 = vadd.f32 %v382_v6, %v360_v16  ;;  %v409_v0 = vadd.f32 %v382_v6, %v369_v17  ;;  %v419_v29 = vmax.f32 %v401_v14, 0.0  ;;  %v2149_v35 = vor.u32 %v2441_v54, %v2148_v8  ;;  %v2372_v58 = vld [vmem:[#allocation2 + $0xe4] sm:$0xf]  ;;  %v1942_v62 = vld [vmem:[#allocation2 + $0x168] sm:$0xf0] }
  0x49   : > { %1371 = vmatpush.bf16.msrb.mxu0 %v2037_v1  ;;  %v2212_v1 = vld [vmem:[#allocation2 + $0x380] sm:$0xf]  ;;  %v371_v34 = vmul.f32 %v344_v23, %v331_v53  ;;  %v2333_v36 = vor.u32 %v2487_v4, %v2332_v13  ;;  %v1825_v40 = vor.u32 %v2358_v20, %v1822_v22  ;;  %v1889_v41 = vor.u32 %v2374_v26, %v1886_v27  ;;  %v2388_v61 = vld [vmem:[#allocation2 + $0x164] sm:$0xf]  ;;  %v2316_v2 = vld [vmem:[#allocation2 + $0x450] sm:$0xf] }
  0x4a   : > { %1385 = vmatpush.bf16.msrb.mxu1 %v2101_v32  ;;  %v428_v32 = vmax.f32 %v410_v15, 0.0  ;;  %v418_v11 = vmax.f32 %v400_v31, 0.0  ;;  %v2213_v46 = vor.u32 %v2457_v25, %v2212_v1  ;;  %v2922_v47 = vpack.c.bf16 %v426_v30, %v417_v28  ;;  %v2483_v6 = vld [vmem:[#allocation2 + $0x454] sm:$0xf0]  ;;  %v2354_v9 = vld [vmem:[#allocation2 + $0x54] sm:$0xf] }
  0x4b   : > { %1399 = vmatpush.bf16.msrb.mxu2 %v2165_v33  ;;  %v362_v33 = vmul.f32 %v344_v23, %v322_v12  ;;  %v411_v43 = vadd.f32 %v384_v21, %v371_v34  ;;  %v1953_v51 = vor.u32 %v2390_v7, %v1950_v37  ;;  %v1817_v5 = vor.u32 %v2356_v49, %v1814_v50  ;;  %v1806_v10 = vld [vmem:[#allocation2 + $0x58] sm:$0xf0]  ;;  %v2370_v53 = vld [vmem:[#allocation2 + $0xd4] sm:$0xf]  ;;  %v2308_v16 = vld [vmem:[#allocation2 + $0x440] sm:$0xf] }
  0x4c   : > { %1413 = vmatpush.bf16.msrb.mxu3 %v2229_v39  ;;  %v427_v39 = vmax.f32 %v409_v0, 0.0  ;;  %v1945_v12 = vor.u32 %v2388_v61, %v1942_v62  ;;  %v1870_v54 = vld [vmem:[#allocation2 + $0xd8] sm:$0xf0]  ;;  %v2317_v13 = vor.u32 %v2483_v6, %v2316_v2  ;;  %v2386_v4 = vld [vmem:[#allocation2 + $0x154] sm:$0xf]  ;;  %v1809_v15 = vor.u32 %v2354_v9, %v1806_v10 }
  0x4d   : > { %1372 = vmatpush.bf16.msrb.mxu0 %v2029_v44  ;;  %v402_v42 = vadd.f32 %v384_v21, %v362_v33  ;;  %v2324_v44 = vld [vmem:[#allocation2 + $0x460] sm:$0xf]  ;;  %v429_v56 = vmax.f32 %v411_v43, 0.0  ;;  %v1934_v14 = vld [vmem:[#allocation2 + $0x158] sm:$0xf0] }
  0x4e   : > { %1386 = vmatpush.bf16.msrb.mxu1 %v2093_v45  ;;  %v2485_v45 = vld [vmem:[#allocation2 + $0x464] sm:$0xf0]  ;;  %v2926_v59 = vpack.c.bf16 %v427_v39, %v418_v11  ;;  %v1798_v20 = vld [vmem:[#allocation2 + $0x48] sm:$0xf0]  ;;  %v1937_v22 = vor.u32 %v2386_v4, %v1934_v14  ;;  %v2368_v23 = vld [vmem:[#allocation2 + $0xc4] sm:$0xf] }
  0x4f   : > { %1400 = vmatpush.bf16.msrb.mxu2 %v2157_v48  ;;  %v2924_v48 = vpack.c.bf16 %v428_v32, %v419_v29  ;;  %v420_v55 = vmax.f32 %v402_v42, 0.0  ;;  %v2325_v60 = vor.u32 %v2485_v45, %v2324_v44  ;;  %v2481_v17 = vld [vmem:[#allocation2 + $0x444] sm:$0xf0]  ;;  %v1862_v21 = vld [vmem:[#allocation2 + $0xc8] sm:$0xf0] }
  0x50   : > { %1414 = vmatpush.bf16.msrb.mxu3 %v2221_v52  ;;  %v1878_v52 = vld [vmem:[#allocation2 + $0xe8] sm:$0xf0]  ;;  %v2309_v26 = vor.u32 %v2481_v17, %v2308_v16  ;;  %v2384_v27 = vld [vmem:[#allocation2 + $0x144] sm:$0xf]  ;;  %v2300_v31 = vld [vmem:[#allocation2 + $0x430] sm:$0xf]  ;;  %v1865_v25 = vor.u32 %v2368_v23, %v1862_v21 }
  0x51   : > { %1373 = vmatpush.bf16.msrb.mxu0 %v2021_v18  ;;  %v2928_v63 = vpack.c.bf16 %v429_v56, %v420_v55  ;;  %v1881_v8 = vor.u32 %v2372_v58, %v1878_v52  ;;  %v1873_v18 = vor.u32 %v2370_v53, %v1870_v54  ;;  %v1926_v28 = vld [vmem:[#allocation2 + $0x148] sm:$0xf0]  ;;  %v2479_v0 = vld [vmem:[#allocation2 + $0x434] sm:$0xf0]  ;;  %v2350_v1 = vld [vmem:[#allocation2 + $0x34] sm:$0xf] }
  0x52   : > { %1387 = vmatpush.bf16.msrb.mxu1 %v2085_v19  ;;  %v2352_v19 = vld [vmem:[#allocation2 + $0x44] sm:$0xf]  ;;  %v1790_v29 = vld [vmem:[#allocation2 + $0x38] sm:$0xf0]  ;;  %v2366_v32 = vld [vmem:[#allocation2 + $0xb4] sm:$0xf]  ;;  %v1929_v34 = vor.u32 %v2384_v27, %v1926_v28  ;;  %v2301_v37 = vor.u32 %v2479_v0, %v2300_v31 }
  0x53   : > { %1401 = vmatpush.bf16.msrb.mxu2 %v2149_v35  ;;  %v1801_v30 = vor.u32 %v2352_v19, %v1798_v20  ;;  %v1854_v33 = vld [vmem:[#allocation2 + $0xb8] sm:$0xf0]  ;;  %v2382_v35 = vld [vmem:[#allocation2 + $0x134] sm:$0xf]  ;;  %v309_v7 = vld [vmem:[%s2721_s17 + $0x20] sm:$0xf] }
  0x54   : > { %1415 = vmatpush.bf16.msrb.mxu3 %v2213_v46  ;;  %1374 = vmatmul.bf16.vlgmr.msrb.gmra.mxu0 %v2922_v47  ;;  %v314_v11 = vld [vmem:[%s2721_s17 + $0x44] sm:$0xf]  ;;  %v323_v39 = vunpack.c.l.bf16 %v309_v7  ;;  %v2292_v42 = vld [vmem:[#allocation2 + $0x420] sm:$0xf]  ;;  %v2477_v43 = vld [vmem:[#allocation2 + $0x424] sm:$0xf0]  ;;  %v1857_v45 = vor.u32 %v2366_v32, %v1854_v33 }
  0x55   : > { %1422 = vmatpush.bf16.msra.mxu0 %v2333_v36  ;;  %1388 = vmatmul.bf16.vlgmr.msrb.gmra.mxu1 %v2926_v59  ;;  %v1918_v36 = vld [vmem:[#allocation2 + $0x138] sm:$0xf0]  ;;  %v332_v44 = vunpack.c.l.bf16 %v314_v11  ;;  %v2348_v46 = vld [vmem:[#allocation2 + $0x24] sm:$0xf]  ;;  %v1782_v49 = vld [vmem:[#allocation2 + $0x28] sm:$0xf0]  ;;  %v2293_v56 = vor.u32 %v2477_v43, %v2292_v42 }
  0x56   : > { %1436 = vmatpush.bf16.msra.mxu1 %v1825_v40  ;;  %1402 = vmatmul.bf16.vlgmr.msrb.gmra.mxu2 %v2924_v48  ;;  %v2520_v40 = vld [vmem:[%s2976_s3 + $0x8] ss:$0 sm:$0xff]  ;;  %v1921_v50 = vor.u32 %v2382_v35, %v1918_v36  ;;  %v1846_v55 = vld [vmem:[#allocation2 + $0xa8] sm:$0xf0]  ;;  %v2380_v58 = vld [vmem:[#allocation2 + $0x124] sm:$0xf] }
  0x57   : > { %1450 = vmatpush.bf16.msra.mxu2 %v1889_v41  ;;  %1416 = vmatmul.bf16.vlgmr.msrb.gmra.mxu3 %v2928_v63  ;;  %v1793_v41 = vor.u32 %v2350_v1, %v1790_v29  ;;  %v1910_v52 = vld [vmem:[#allocation2 + $0x128] sm:$0xf0]  ;;  %v372_v61 = vmul.f32 %v2520_v40, %v332_v44  ;;  %v2521_v62 = vld [vmem:[%s2977_s4 + $0x8] ss:$0 sm:$0xff]  ;;  %v2284_v2 = vld [vmem:[#allocation2 + $0x410] sm:$0xf] }
  0x58   : > { %1464 = vmatpush.bf16.msra.mxu3 %v1953_v51  ;;  %v2364_v51 = vld [vmem:[#allocation2 + $0xa4] sm:$0xf]  ;;  %v2475_v6 = vld [vmem:[#allocation2 + $0x414] sm:$0xf0]  ;;  %v2346_v9 = vld [vmem:[#allocation2 + $0x14] sm:$0xf]  ;;  %v1913_v53 = vor.u32 %v2380_v58, %v1910_v52 }
  0x59   : > { %1423 = vmatpush.bf16.msra.mxu0 %v2325_v60  ;;  %v363_v60 = vmul.f32 %v2520_v40, %v323_v39  ;;  %v1774_v10 = vld [vmem:[#allocation2 + $0x18] sm:$0xf0]  ;;  %v2285_v14 = vor.u32 %v2475_v6, %v2284_v2  ;;  %v2473_v16 = vld [vmem:[#allocation2 + $0x404] sm:$0xf0]  ;;  %v2344_v17 = vld [vmem:[#allocation2 + $0x4] sm:$0xf]  ;;  %v412_v19 = vadd.f32 %v2521_v62, %v372_v61 }
  0x5a   : > { %1437 = vmatpush.bf16.msra.mxu1 %v1817_v5  ;;  %v1785_v5 = vor.u32 %v2348_v46, %v1782_v49  ;;  %v1838_v54 = vld [vmem:[#allocation2 + $0x98] sm:$0xf0]  ;;  %v1777_v20 = vor.u32 %v2346_v9, %v1774_v10  ;;  %v2360_v23 = vld [vmem:[#allocation2 + $0x84] sm:$0xf]  ;;  %v1830_v21 = vld [vmem:[#allocation2 + $0x88] sm:$0xf0] }
  0x5b   : > { %1451 = vmatpush.bf16.msra.mxu2 %v1881_v8  ;;  %v1849_v8 = vor.u32 %v2364_v51, %v1846_v55  ;;  %v1902_v4 = vld [vmem:[#allocation2 + $0x118] sm:$0xf0]  ;;  %v2406_v27 = vld [vmem:[#allocation2 + $0x1f4] sm:$0xf]  ;;  %v2376_v32 = vld [vmem:[#allocation2 + $0x104] sm:$0xf]  ;;  %v1833_v39 = vor.u32 %v2360_v23, %v1830_v21 }
  0x5c   : > { %1465 = vmatpush.bf16.msra.mxu3 %v1945_v12  ;;  %v2362_v12 = vld [vmem:[#allocation2 + $0x94] sm:$0xf]  ;;  %v2014_v28 = vld [vmem:[#allocation2 + $0x1f8] sm:$0xf0]  ;;  %v1894_v33 = vld [vmem:[#allocation2 + $0x108] sm:$0xf0] }
  0x5d   : > { %1424 = vmatpush.bf16.msra.mxu0 %v2317_v13  ;;  %v2378_v13 = vld [vmem:[#allocation2 + $0x114] sm:$0xf]  ;;  %v2078_v0 = vld [vmem:[#allocation2 + $0x278] sm:$0xf0]  ;;  %v430_v35 = vmax.f32 %v412_v19, 0.0  ;;  %v2017_v7 = vor.u32 %v2406_v27, %v2014_v28  ;;  %v1897_v44 = vor.u32 %v2376_v32, %v1894_v33 }
  0x5e   : > { %1438 = vmatpush.bf16.msra.mxu1 %v1809_v15  ;;  %v2276_v15 = vld [vmem:[#allocation2 + $0x400] sm:$0xf]  ;;  %v1905_v31 = vor.u32 %v2378_v13, %v1902_v4  ;;  %v2438_v1 = vld [vmem:[#allocation2 + $0x2f4] sm:$0xf]  ;;  %v2206_v11 = vld [vmem:[#allocation2 + $0x378] sm:$0xf0] }
  0x5f   : > { %1452 = vmatpush.bf16.msra.mxu2 %v1873_v18  ;;  %v403_v18 = vadd.f32 %v2521_v62, %v363_v60  ;;  %v2277_v29 = vor.u32 %v2473_v16, %v2276_v15  ;;  %v2006_v42 = vld [vmem:[#allocation2 + $0x1e8] sm:$0xf0]  ;;  %v2436_v51 = vld [vmem:[#allocation2 + $0x2e4] sm:$0xf]  ;;  %v2402_v61 = vld [vmem:[#allocation2 + $0x1d4] sm:$0xf] }
  0x60   : > { %1466 = vmatpush.bf16.msra.mxu3 %v1937_v22  ;;  %v1766_v22 = vld [vmem:[#allocation2 + $0x8] sm:$0xf0]  ;;  %v2452_v58 = vld [vmem:[#allocation2 + $0x364] sm:$0xf]  ;;  %v1998_v62 = vld [vmem:[#allocation2 + $0x1d8] sm:$0xf0] }
  0x61   : > { %1425 = vmatpush.bf16.msra.mxu0 %v2309_v26  ;;  %v1841_v26 = vor.u32 %v2362_v12, %v1838_v54  ;;  %v1769_v36 = vor.u32 %v2344_v17, %v1766_v22  ;;  %v2070_v46 = vld [vmem:[#allocation2 + $0x268] sm:$0xf0]  ;;  %v2418_v2 = vld [vmem:[#allocation2 + $0x254] sm:$0xf]  ;;  %v2062_v6 = vld [vmem:[#allocation2 + $0x258] sm:$0xf0]  ;;  %v2001_v12 = vor.u32 %v2402_v61, %v1998_v62 }
  0x62   : > { %1439 = vmatpush.bf16.msra.mxu1 %v1801_v30  ;;  %v2422_v30 = vld [vmem:[#allocation2 + $0x274] sm:$0xf]  ;;  %v2134_v55 = vld [vmem:[#allocation2 + $0x2e8] sm:$0xf0]  ;;  %v2126_v10 = vld [vmem:[#allocation2 + $0x2d8] sm:$0xf0]  ;;  %v2065_v13 = vor.u32 %v2418_v2, %v2062_v6 }
  0x63   : > { %1453 = vmatpush.bf16.msra.mxu2 %v1865_v25  ;;  %v2142_v25 = vld [vmem:[#allocation2 + $0x2f8] sm:$0xf0]  ;;  %v2081_v40 = vor.u32 %v2422_v30, %v2078_v0  ;;  %v2198_v52 = vld [vmem:[#allocation2 + $0x368] sm:$0xf0]  ;;  %v2434_v9 = vld [vmem:[#allocation2 + $0x2d4] sm:$0xf] }
  0x64   : > { %1467 = vmatpush.bf16.msra.mxu3 %v1929_v34  ;;  %v421_v34 = vmax.f32 %v403_v18, 0.0  ;;  %v2145_v43 = vor.u32 %v2438_v1, %v2142_v25  ;;  %v2190_v54 = vld [vmem:[#allocation2 + $0x358] sm:$0xf0]  ;;  %v2400_v4 = vld [vmem:[#allocation2 + $0x1c4] sm:$0xf]  ;;  %v2129_v15 = vor.u32 %v2434_v9, %v2126_v10 }
  0x65   : > { %1426 = vmatpush.bf16.msra.mxu0 %v2301_v37  ;;  %v2454_v37 = vld [vmem:[#allocation2 + $0x374] sm:$0xf]  ;;  %v2416_v16 = vld [vmem:[#allocation2 + $0x244] sm:$0xf]  ;;  %v2054_v17 = vld [vmem:[#allocation2 + $0x248] sm:$0xf0] }
  0x66   : > { %1440 = vmatpush.bf16.msra.mxu1 %v1793_v41  ;;  %v2404_v41 = vld [vmem:[#allocation2 + $0x1e4] sm:$0xf]  ;;  %v2942_v49 = vpack.c.bf16 %v430_v35, %v421_v34  ;;  %v2057_v21 = vor.u32 %v2416_v16, %v2054_v17  ;;  %v1982_v27 = vld [vmem:[#allocation2 + $0x1b8] sm:$0xf0]  ;;  %v2414_v28 = vld [vmem:[#allocation2 + $0x234] sm:$0xf] }
  0x67   : > { %1454 = vmatpush.bf16.msra.mxu2 %v1857_v45  ;;  %v2420_v45 = vld [vmem:[#allocation2 + $0x264] sm:$0xf]  ;;  %v2046_v30 = vld [vmem:[#allocation2 + $0x238] sm:$0xf0]  ;;  %v2430_v0 = vld [vmem:[#allocation2 + $0x2b4] sm:$0xf] }
  0x68   : > { %1468 = vmatpush.bf16.msra.mxu3 %v1921_v50  ;;  %v2209_v50 = vor.u32 %v2454_v37, %v2206_v11  ;;  %v2073_v60 = vor.u32 %v2420_v45, %v2070_v46  ;;  %v2432_v19 = vld [vmem:[#allocation2 + $0x2c4] sm:$0xf]  ;;  %v2446_v25 = vld [vmem:[#allocation2 + $0x334] sm:$0xf]  ;;  %v2049_v32 = vor.u32 %v2414_v28, %v2046_v30  ;;  %v1974_v34 = vld [vmem:[#allocation2 + $0x1a8] sm:$0xf0] }
  0x69   : > { %1427 = vmatpush.bf16.msra.mxu0 %v2293_v56  ;;  %v2009_v56 = vor.u32 %v2404_v41, %v2006_v42  ;;  %v2448_v23 = vld [vmem:[#allocation2 + $0x344] sm:$0xf]  ;;  %v2166_v42 = vld [vmem:[#allocation2 + $0x328] sm:$0xf0]  ;;  %v1966_v45 = vld [vmem:[#allocation2 + $0x198] sm:$0xf0] }
  0x6a   : > { %1441 = vmatpush.bf16.msra.mxu1 %v1785_v5  ;;  %v2137_v5 = vor.u32 %v2436_v51, %v2134_v55  ;;  %v2396_v33 = vld [vmem:[#allocation2 + $0x1a4] sm:$0xf]  ;;  %v2030_v51 = vld [vmem:[#allocation2 + $0x218] sm:$0xf0]  ;;  %v1958_v2 = vld [vmem:[#allocation2 + $0x188] sm:$0xf0] }
  0x6b   : > { %1455 = vmatpush.bf16.msra.mxu2 %v1849_v8  ;;  %v2201_v8 = vor.u32 %v2452_v58, %v2198_v52  ;;  %v2428_v11 = vld [vmem:[#allocation2 + $0x2a4] sm:$0xf]  ;;  %v2094_v58 = vld [vmem:[#allocation2 + $0x298] sm:$0xf0]  ;;  %v2150_v17 = vld [vmem:[#allocation2 + $0x308] sm:$0xf0] }
  0x6c   : > { %1469 = vmatpush.bf16.msra.mxu3 %v1913_v53  ;;  %v2450_v53 = vld [vmem:[#allocation2 + $0x354] sm:$0xf]  ;;  %v2444_v41 = vld [vmem:[#allocation2 + $0x324] sm:$0xf]  ;;  %v2158_v61 = vld [vmem:[#allocation2 + $0x318] sm:$0xf0] }
  0x6d   : > { %1428 = vmatpush.bf16.msra.mxu0 %v2285_v14  ;;  %v1990_v14 = vld [vmem:[#allocation2 + $0x1c8] sm:$0xf0]  ;;  %v2193_v18 = vor.u32 %v2450_v53, %v2190_v54  ;;  %v2169_v55 = vor.u32 %v2444_v41, %v2166_v42  ;;  %v2392_v62 = vld [vmem:[#allocation2 + $0x184] sm:$0xf]  ;;  %v2270_v53 = vld [vmem:[#allocation2 + $0x3f8] sm:$0xf0] }
  0x6e   : > { %1442 = vmatpush.bf16.msra.mxu1 %v1777_v20  ;;  %v2118_v20 = vld [vmem:[#allocation2 + $0x2c8] sm:$0xf0]  ;;  %v1993_v22 = vor.u32 %v2400_v4, %v1990_v14  ;;  %v2408_v6 = vld [vmem:[#allocation2 + $0x204] sm:$0xf]  ;;  %v2486_v4 = vld [vmem:[#allocation2 + $0x474] sm:$0xf] }
  0x6f   : > { %1456 = vmatpush.bf16.msra.mxu2 %v1841_v26  ;;  %v2398_v26 = vld [vmem:[#allocation2 + $0x1b4] sm:$0xf]  ;;  %v2424_v10 = vld [vmem:[#allocation2 + $0x284] sm:$0xf]  ;;  %v2334_v14 = vld [vmem:[#allocation2 + $0x478] sm:$0xf0] }
  0x70   : > { %1470 = vmatpush.bf16.msra.mxu3 %v1905_v31  ;;  %v1985_v1 = vor.u32 %v2398_v26, %v1982_v27  ;;  %v2440_v16 = vld [vmem:[#allocation2 + $0x304] sm:$0xf]  ;;  %v2326_v27 = vld [vmem:[#allocation2 + $0x468] sm:$0xf0]  ;;  %v2466_v30 = vld [vmem:[#allocation2 + $0x3d4] sm:$0xf] }
  0x71   : > { %1429 = vmatpush.bf16.msra.mxu0 %v2277_v29  ;;  %v2174_v29 = vld [vmem:[#allocation2 + $0x338] sm:$0xf0]  ;;  %v2484_v26 = vld [vmem:[#allocation2 + $0x464] sm:$0xf]  ;;  %v2294_v41 = vld [vmem:[#allocation2 + $0x428] sm:$0xf0] }
  0x72   : > { %1443 = vmatpush.bf16.msra.mxu1 %v1769_v36  ;;  %v2412_v36 = vld [vmem:[#allocation2 + $0x224] sm:$0xf]  ;;  %v2177_v37 = vor.u32 %v2446_v25, %v2174_v29  ;;  %v2329_v28 = vor.u32 %v2484_v26, %v2326_v27 }
  0x73   : > { %1457 = vmatpush.bf16.msra.mxu2 %v1833_v39  ;;  %v2102_v39 = vld [vmem:[#allocation2 + $0x2a8] sm:$0xf0]  ;;  %v2464_v29 = vld [vmem:[#allocation2 + $0x3c4] sm:$0xf] }
  0x74   : > { %1471 = vmatpush.bf16.msra.mxu3 %v1897_v44  ;;  %1430 = vmatmul.bf16.vlgmr.msra.gmra.mxu0 %v2942_v49  ;;  %v2394_v44 = vld [vmem:[#allocation2 + $0x194] sm:$0xf]  ;;  %v2105_v46 = vor.u32 %v2428_v11, %v2102_v39  ;;  %v2460_v39 = vld [vmem:[#allocation2 + $0x3a4] sm:$0xf] }
  0x75   : > { %1478 = vmatpush.bf16.msrb.mxu0 %v2017_v7  ;;  %1444 = vmatmul.bf16.vlgmr.msra.gmra.mxu1 %v2805_v57  ;;  %v2110_v57 = vld [vmem:[#allocation2 + $0x2b8] sm:$0xf0]  ;;  %v2038_v7 = vld [vmem:[#allocation2 + $0x228] sm:$0xf0]  ;;  %v1969_v52 = vor.u32 %v2394_v44, %v1966_v45  ;;  %v2458_v44 = vld [vmem:[#allocation2 + $0x394] sm:$0xf] }
  0x76   : > { %1492 = vmatpush.bf16.msrb.mxu1 %v2081_v40  ;;  %1458 = vmatmul.bf16.vlgmr.msra.gmra.mxu2 %v2857_v24  ;;  %v2182_v24 = vld [vmem:[#allocation2 + $0x348] sm:$0xf0]  ;;  %v2113_v35 = vor.u32 %v2430_v0, %v2110_v57  ;;  %v1977_v40 = vor.u32 %v2396_v33, %v1974_v34  ;;  %v2482_v0 = vld [vmem:[#allocation2 + $0x454] sm:$0xf]  ;;  %v2318_v57 = vld [vmem:[#allocation2 + $0x458] sm:$0xf0] }
  0x77   : > { %1506 = vmatpush.bf16.msrb.mxu2 %v2145_v43  ;;  %1472 = vmatmul.bf16.vlgmr.msra.gmra.mxu3 %v2821_v3  ;;  %v2121_v3 = vor.u32 %v2432_v19, %v2118_v20  ;;  %v2185_v31 = vor.u32 %v2448_v23, %v2182_v24  ;;  %v2041_v43 = vor.u32 %v2412_v36, %v2038_v7  ;;  %v2468_v23 = vld [vmem:[#allocation2 + $0x3e4] sm:$0xf]  ;;  %v2262_v24 = vld [vmem:[#allocation2 + $0x3e8] sm:$0xf0]  ;;  %v2462_v36 = vld [vmem:[#allocation2 + $0x3b4] sm:$0xf] }
  0x78   : > { %1520 = vmatpush.bf16.msrb.mxu3 %v2209_v50  ;;  %v2410_v50 = vld [vmem:[#allocation2 + $0x214] sm:$0xf]  ;;  %v2321_v25 = vor.u32 %v2482_v0, %v2318_v57  ;;  %v2480_v33 = vld [vmem:[#allocation2 + $0x444] sm:$0xf]  ;;  %v2310_v34 = vld [vmem:[#allocation2 + $0x448] sm:$0xf0] }
  0x79   : > { %1479 = vmatpush.bf16.msrb.mxu0 %v2009_v56  ;;  %v2426_v56 = vld [vmem:[#allocation2 + $0x294] sm:$0xf]  ;;  %v2238_v7 = vld [vmem:[#allocation2 + $0x3b8] sm:$0xf0] }
  0x7a   : > { %1493 = vmatpush.bf16.msrb.mxu1 %v2073_v60  ;;  %v2442_v60 = vld [vmem:[#allocation2 + $0x314] sm:$0xf]  ;;  %v2097_v9 = vor.u32 %v2426_v56, %v2094_v58  ;;  %v2222_v45 = vld [vmem:[#allocation2 + $0x398] sm:$0xf0]  ;;  %v2456_v56 = vld [vmem:[#allocation2 + $0x384] sm:$0xf] }
  0x7b   : > { %1507 = vmatpush.bf16.msrb.mxu2 %v2137_v5  ;;  %v2033_v5 = vor.u32 %v2410_v50, %v2030_v51  ;;  %v2161_v54 = vor.u32 %v2442_v60, %v2158_v61  ;;  %v2286_v50 = vld [vmem:[#allocation2 + $0x418] sm:$0xf0]  ;;  %v2225_v51 = vor.u32 %v2458_v44, %v2222_v45  ;;  %v2214_v58 = vld [vmem:[#allocation2 + $0x388] sm:$0xf0]  ;;  %v1570_v44 = vstv %s2338_s28 }
  0x7c   : > { %1521 = vmatpush.bf16.msrb.mxu3 %v2201_v8  ;;  %v2022_v8 = vld [vmem:[#allocation2 + $0x208] sm:$0xf0]  ;;  %v2217_v61 = vor.u32 %v2456_v56, %v2214_v58 }
  0x7d   : > { %1480 = vmatpush.bf16.msrb.mxu0 %v2001_v12  ;;  %v2470_v12 = vld [vmem:[#allocation2 + $0x3f4] sm:$0xf]  ;;  %v2278_v60 = vld [vmem:[#allocation2 + $0x408] sm:$0xf0] }
  0x7e   : > { %1494 = vmatpush.bf16.msrb.mxu1 %v2065_v13  ;;  %v2086_v13 = vld [vmem:[#allocation2 + $0x288] sm:$0xf0]  ;;  %v2273_v19 = vor.u32 %v2470_v12, %v2270_v53 }
  0x7f   : > { %1508 = vmatpush.bf16.msrb.mxu2 %v2129_v15  ;;  %v1961_v15 = vor.u32 %v2392_v62, %v1958_v2  ;;  %v2089_v20 = vor.u32 %v2424_v10, %v2086_v13 }
  0x80   : > { %1522 = vmatpush.bf16.msrb.mxu3 %v2193_v18  ;;  %v2025_v18 = vor.u32 %v2408_v6, %v2022_v8 }
  0x81   : > { %1481 = vmatpush.bf16.msrb.mxu0 %v1993_v22  ;;  %v2337_v22 = vor.u32 %v2486_v4, %v2334_v14 }
  0x82   : > { %1495 = vmatpush.bf16.msrb.mxu1 %v2057_v21  ;;  %v2153_v21 = vor.u32 %v2440_v16, %v2150_v17  ;;  %v584_v17 = vld [vmem:[#allocation4] sm:$0x3] }
  0x83   : > { %1509 = vmatpush.bf16.msrb.mxu2 %v2121_v3  ;;  %v2265_v3 = vor.u32 %v2468_v23, %v2262_v24  ;;  %v587_v26 = vperm.slane %v584_v17, 1 }
  0x84   : > { %1523 = vmatpush.bf16.msrb.mxu3 %v2185_v31  ;;  %v2254_v31 = vld [vmem:[#allocation2 + $0x3d8] sm:$0xf0] }
  0x85   : > { %1482 = vmatpush.bf16.msrb.mxu0 %v1985_v1  ;;  %v2257_v1 = vor.u32 %v2466_v30, %v2254_v31 }
  0x86   : > { %1496 = vmatpush.bf16.msrb.mxu1 %v2049_v32  ;;  %v2246_v32 = vld [vmem:[#allocation2 + $0x3c8] sm:$0xf0] }
  0x87   : > { %1510 = vmatpush.bf16.msrb.mxu2 %v2113_v35  ;;  %v2249_v35 = vor.u32 %v2464_v29, %v2246_v32 }
  0x88   : > { %1524 = vmatpush.bf16.msrb.mxu3 %v2177_v37  ;;  %v2478_v37 = vld [vmem:[#allocation2 + $0x434] sm:$0xf] }
  0x89   : > { %1483 = vmatpush.bf16.msrb.mxu0 %v1977_v40  ;;  %v2476_v40 = vld [vmem:[#allocation2 + $0x424] sm:$0xf] }
  0x8a   : > { %1497 = vmatpush.bf16.msrb.mxu1 %v2041_v43  ;;  %v2297_v43 = vor.u32 %v2476_v40, %v2294_v41 }
  0x8b   : > { %1511 = vmatpush.bf16.msrb.mxu2 %v2105_v46  ;;  %v2474_v46 = vld [vmem:[#allocation2 + $0x414] sm:$0xf] }
  0x8c   : > { %1525 = vmatpush.bf16.msrb.mxu3 %v2169_v55  ;;  %v2289_v55 = vor.u32 %v2474_v46, %v2286_v50 }
  0x8d   : > { %1484 = vmatpush.bf16.msrb.mxu0 %v1969_v52  ;;  %v2472_v52 = vld [vmem:[#allocation2 + $0x404] sm:$0xf] }
  0x8e   : > { %1498 = vmatpush.bf16.msrb.mxu1 %v2033_v5  ;;  %v2281_v62 = vor.u32 %v2472_v52, %v2278_v60 }
  0x8f   : > { %1512 = vmatpush.bf16.msrb.mxu2 %v2097_v9 }
  0x90   : > { %1526 = vmatpush.bf16.msrb.mxu3 %v2161_v54 }
  0x91   : > { %1485 = vmatpush.bf16.msrb.mxu0 %v1961_v15 }
  0x92   : > { %1499 = vmatpush.bf16.msrb.mxu1 %v2025_v18 }
  0x93   : > { %1513 = vmatpush.bf16.msrb.mxu2 %v2089_v20 }
  0x94   : > { %1527 = vmatpush.bf16.msrb.mxu3 %v2153_v21  ;;  %1486 = vmatmul.bf16.vlgmr.msrb.gmra.mxu0 %v2885_v38  ;;  %v2313_v38 = vor.u32 %v2480_v33, %v2310_v34  ;;  %v1567_v33 = vlaneseq }
  0x95   : > { %1534 = vmatpush.bf16.msra.mxu0 %v2273_v19  ;;  %1500 = vmatmul.bf16.vlgmr.msrb.gmra.mxu1 %v2922_v47  ;;  %v2302_v47 = vld [vmem:[#allocation2 + $0x438] sm:$0xf0]  ;;  %v586_v19 = vperm.slane %v584_v17, 0 }
  0x96   : > { %1548 = vmatpush.bf16.msra.mxu1 %v2337_v22  ;;  %1514 = vmatmul.bf16.vlgmr.msrb.gmra.mxu2 %v2926_v59  ;;  %v2241_v59 = vor.u32 %v2462_v36, %v2238_v7  ;;  %v2305_v11 = vor.u32 %v2478_v37, %v2302_v47  ;;  %v1568_v47 = vshrl.u32 %v1567_v33, 7  ;;  %vm1605_vm3 = vcmp.lt.s32.totalorder %v1567_v33, 256 }
  0x97   : > { %1528 = vmatmul.bf16.vlgmr.msrb.gmra.mxu3 %v2924_v48  ;;  %v2230_v48 = vld [vmem:[#allocation2 + $0x3a8] sm:$0xf0] }
  0x98   : > { %v2233_v42 = vor.u32 %v2460_v39, %v2230_v48  ;;  %v1569_v40 = vadd.s32 8, %v1568_v47  ;;  %v1571_v58 = vadd.s32 %v1570_v44, %v1568_v47 }
  0x99   : > { %1535 = vmatpush.bf16.msra.mxu0 %v2265_v3 }
  0x9a   : > { %1549 = vmatpush.bf16.msra.mxu1 %v2329_v28  ;;  %v1572_v50 = vadd.s32 %v1570_v44, %v1569_v40  ;;  %vm1573_vm1 = vcmp.lt.s32.totalorder %v1571_v58, 32 }
  0x9c   : > { %vm1574_vm0 = vcmp.lt.s32.totalorder %v1572_v50, 32 }
  0x9d   : > { %1536 = vmatpush.bf16.msra.mxu0 %v2257_v1 }
  0x9e   : > { %1550 = vmatpush.bf16.msra.mxu1 %v2321_v25 }
  0xa1   : > { %1537 = vmatpush.bf16.msra.mxu0 %v2249_v35 }
  0xa2   : > { %1551 = vmatpush.bf16.msra.mxu1 %v2313_v38 }
  0xa5   : > { %1538 = vmatpush.bf16.msra.mxu0 %v2241_v59 }
  0xa6   : > { %1552 = vmatpush.bf16.msra.mxu1 %v2305_v11 }
  0xa9   : > { %1539 = vmatpush.bf16.msra.mxu0 %v2233_v42 }
  0xaa   : > { %1553 = vmatpush.bf16.msra.mxu1 %v2297_v43 }
  0xad   : > { %1540 = vmatpush.bf16.msra.mxu0 %v2225_v51 }
  0xae   : > { %1554 = vmatpush.bf16.msra.mxu1 %v2289_v55 }
  0xb1   : > { %1541 = vmatpush.bf16.msra.mxu0 %v2217_v61 }
  0xb2   : > { %1555 = vmatpush.bf16.msra.mxu1 %v2281_v62 }
  0xb4   : > { %1542 = vmatmul.bf16.vlgmr.msra.gmra.mxu0 %v2928_v63 }
  0xb5   : > { %1556 = vmatmul.bf16.vlgmr.msra.gmra.mxu1 %v2942_v49 }
  0xbb   : > { %v1319_v2 = vpop.f32.mrf.mxu0 }
  0xbc   : > { %v1320_v22 = vadd.f32 %v1319_v2, %v586_v19 }
  0xc0   : > { %v1333_v5 = vpop.f32.mrf.mxu1 }
  0xc1   : > { %v1334_v21 = vadd.f32 %v1333_v5, %v1320_v22 }
  0xc3   : > { %v1347_v6 = vpop.f32.mrf.mxu2  ;;  %v1321_v9 = vpop.f32.mrf.mxu0 }
  0xc4   : > { %v1322_v23 = vadd.f32 %v1321_v9, %v586_v19  ;;  %v1348_v31 = vadd.f32 %v1347_v6, %v1334_v21 }
  0xc5   : > { %v1361_v10 = vpop.f32.mrf.mxu3 }
  0xc6   : > { %v1362_v1 = vadd.f32 %v1361_v10, %v1348_v31 }
  0xc8   : > { %v1335_v8 = vpop.f32.mrf.mxu1 }
  0xc9   : > { %v1336_v27 = vadd.f32 %v1335_v8, %v1322_v23 }
  0xcb   : > { %v1349_v12 = vpop.f32.mrf.mxu2 }
  0xcc   : > { %v1350_v57 = vadd.f32 %v1349_v12, %v1336_v27 }
  0xcd   : > { %v1363_v54 = vpop.f32.mrf.mxu3 }
  0xce   : > { %v1364_v32 = vadd.f32 %v1363_v54, %v1350_v57 }
  0xd1   : > { %v1375_v13 = vpop.f32.mrf.mxu0 }
  0xd2   : > { %v1389_v53 = vpop.f32.mrf.mxu1  ;;  %v1376_v35 = vadd.f32 %v1375_v13, %v1362_v1 }
  0xd4   : > { %v1390_v59 = vadd.f32 %v1389_v53, %v1376_v35 }
  0xd9   : > { %v1403_v4 = vpop.f32.mrf.mxu2  ;;  %v1377_v15 = vpop.f32.mrf.mxu0 }
  0xda   : > { %v1391_v14 = vpop.f32.mrf.mxu1  ;;  %v1417_v16 = vpop.f32.mrf.mxu3  ;;  %v1378_v38 = vadd.f32 %v1377_v15, %v1364_v32  ;;  %v1404_v43 = vadd.f32 %v1403_v4, %v1390_v59 }
  0xdc   : > { %v1392_v11 = vadd.f32 %v1391_v14, %v1378_v38  ;;  %v1418_v60 = vadd.f32 %v1417_v16, %v1404_v43 }
  0xe1   : > { %v1405_v18 = vpop.f32.mrf.mxu2 }
  0xe2   : > { %v1419_v49 = vpop.f32.mrf.mxu3  ;;  %v1406_v41 = vadd.f32 %v1405_v18, %v1392_v11 }
  0xe4   : > { %v1420_v55 = vadd.f32 %v1419_v49, %v1406_v41 }
  0xf1   : > { %v1431_v20 = vpop.f32.mrf.mxu0 }
  0xf2   : > { %v1445_v63 = vpop.f32.mrf.mxu1  ;;  %v1432_v2 = vadd.f32 %v1431_v20, %v1418_v60 }
  0xf3   : > { %v1446_v0 = vadd.f32 %v1445_v63, %v587_v26 }
  0xf4   : > { %v1579_v53 = vsel %vm1573_vm1, %v1432_v2, 0.0 }
  0xf5   : > { %v1608_v17 = vmul.f32 %v1579_v53, %v1579_v53 }
  0xf9   : > { %v1459_v24 = vpop.f32.mrf.mxu2  ;;  %v1433_v28 = vpop.f32.mrf.mxu0 }
  0xfa   : > { %v1447_v3 = vpop.f32.mrf.mxu1  ;;  %v1473_v30 = vpop.f32.mrf.mxu3  ;;  %v1460_v25 = vadd.f32 %v1459_v24, %v1446_v0  ;;  %v1434_v61 = vadd.f32 %v1433_v28, %v1420_v55 }
  0xfb   : > { %v1448_v39 = vadd.f32 %v1447_v3, %v587_v26 }
  0xfc   : > { %v1474_v36 = vadd.f32 %v1473_v30, %v1460_v25  ;;  %v1581_v8 = vsel %vm1574_vm0, %v1434_v61, 0.0 }
  0xfd   : > { %v1610_v14 = vmul.f32 %v1581_v8, %v1581_v8  ;;  %v1583_v18 = vadd.f32 %v1581_v8, %v1579_v53 }
  0xff   : > { %v1612_v20 = vadd.f32 %v1610_v14, %v1608_v17  ;;  %v1584_v22 = vrot.slane %v1583_v18, 4 }
 0x101   : > { %v1461_v29 = vpop.f32.mrf.mxu2  ;;  %v1613_v21 = vrot.slane %v1612_v20, 4  ;;  %v1585_v28 = vadd.f32 %v1584_v22, %v1583_v18 }
 0x102   : > { %v1475_v37 = vpop.f32.mrf.mxu3  ;;  %v1462_v45 = vadd.f32 %v1461_v29, %v1448_v39 }
 0x103   : > { %v1614_v0 = vadd.f32 %v1613_v21, %v1612_v20  ;;  %v1586_v29 = vrot.slane %v1585_v28, 2 }
 0x104   : > { %v1476_v62 = vadd.f32 %v1475_v37, %v1462_v45 }
 0x105   : > { %v1615_v35 = vrot.slane %v1614_v0, 2 }
 0x107   : > { %v1616_v59 = vadd.f32 %v1615_v35, %v1614_v0 }
 0x111   : > { %v1487_v34 = vpop.f32.mrf.mxu0 }
 0x112   : > { %v1501_v7 = vpop.f32.mrf.mxu1  ;;  %v1488_v48 = vadd.f32 %v1487_v34, %v1474_v36 }
 0x114   : > { %v1502_v46 = vadd.f32 %v1501_v7, %v1488_v48  ;;  %v1587_v7 = vadd.f32 %v1586_v29, %v1585_v28 }
 0x116   : > { %v1588_v48 = vrot.slane %v1587_v7, 1 }
 0x118   : > { %v1589_v45 = vadd.f32 %v1588_v48, %v1587_v7 }
 0x119   : > { %v1515_v42 = vpop.f32.mrf.mxu2  ;;  %v1489_v51 = vpop.f32.mrf.mxu0 }
 0x11a   : > { %v1503_v56 = vpop.f32.mrf.mxu1  ;;  %v1529_v52 = vpop.f32.mrf.mxu3  ;;  %v1516_v5 = vadd.f32 %v1515_v42, %v1502_v46  ;;  %v1490_v6 = vadd.f32 %v1489_v51, %v1476_v62  ;;  %v1617_v42 = vrot.slane %v1616_v59, 1 }
 0x11c   : > { %v1530_v9 = vadd.f32 %v1529_v52, %v1516_v5  ;;  %v1504_v54 = vadd.f32 %v1503_v56, %v1490_v6  ;;  %v1618_v51 = vadd.f32 %v1617_v42, %v1616_v59 }
 0x121   : > { %v1517_v10 = vpop.f32.mrf.mxu2 }
 0x122   : > { %v1518_v15 = vadd.f32 %v1517_v10, %v1504_v54  ;;  %v1531_v19 = vpop.f32.mrf.mxu3 }
 0x124   : > { %v1532_v49 = vadd.f32 %v1531_v19, %v1518_v15 }
 0x131   : > { %v1543_v12 = vpop.f32.mrf.mxu0 }
 0x132   : > { %v1544_v13 = vadd.f32 %v1543_v12, %v1530_v9  ;;  %v1557_v4 = vpop.f32.mrf.mxu1 }
 0x134   : > { %v1558_v16 = vadd.f32 %v1557_v4, %v1544_v13 }
 0x136   : > { %v1562_v63 = vpack.c.bf16 %v1558_v16, %v1432_v2  ;;  %v1580_v27 = vsel %vm1573_vm1, %v1558_v16, 0.0 }
 0x137   : > { %v1609_v57 = vmul.f32 %v1580_v27, %v1580_v27 }
 0x138   : > { %1564 = vst [vmem:[%s298_s8] sm:$0xff] %v1562_v63 }
 0x139   : > { %v1545_v23 = vpop.f32.mrf.mxu0 }
 0x13a   : > { %v1546_v24 = vadd.f32 %v1545_v23, %v1532_v49  ;;  %v1559_v26 = vpop.f32.mrf.mxu1 }
 0x13c   : > { %v1560_v3 = vadd.f32 %v1559_v26, %v1546_v24 }
 0x13e   : > { %v1563_v30 = vpack.c.bf16 %v1560_v3, %v1434_v61  ;;  %v1582_v31 = vsel %vm1574_vm0, %v1560_v3, 0.0 }
 0x13f   : > { %v1590_v1 = vadd.f32 %v1582_v31, %v1580_v27  ;;  %v1611_v25 = vmul.f32 %v1582_v31, %v1582_v31 }
 0x140   : > { %1565 = vst [vmem:[%s298_s8 + $0x8] sm:$0xff] %v1563_v30 }
 0x141   : > { %v1591_v32 = vrot.slane %v1590_v1, 4  ;;  %v1619_v34 = vadd.f32 %v1611_v25, %v1609_v57 }
 0x143   : > { %v1592_v38 = vadd.f32 %v1591_v32, %v1590_v1  ;;  %v1620_v36 = vrot.slane %v1619_v34, 4 }
 0x145   : > { %v1593_v37 = vrot.slane %v1592_v38, 2  ;;  %v1621_v47 = vadd.f32 %v1620_v36, %v1619_v34 }
 0x147   : > { %v1594_v11 = vadd.f32 %v1593_v37, %v1592_v38  ;;  %v1622_v39 = vrot.slane %v1621_v47, 2 }
 0x149   : > { %v1595_v40 = vrot.slane %v1594_v11, 1  ;;  %v1623_v41 = vadd.f32 %v1622_v39, %v1621_v47 }
 0x14b   : > { %v1596_v43 = vadd.f32 %v1595_v40, %v1594_v11  ;;  %v1624_v44 = vrot.slane %v1623_v41, 1 }
 0x14d   : > { %v1599_v46 = vrot.slane %v1596_v43, 7  ;;  %v1625_v50 = vadd.f32 %v1624_v44, %v1623_v41 }
 0x14f   : > { %v1601_v55 = vsel %vm1600_vm2, %v1589_v45, %v1599_v46  ;;  %v1628_v56 = vrot.slane %v1625_v50, 7 }
 0x150   : > { %1607 = vst.msk [vmem:[%s304_s12] ss:$2 sm:$0x3] %vm1605_vm3, %v1601_v55 }
 0x151   : > { %v1629_v58 = vsel %vm1600_vm2, %v1618_v51, %v1628_v56 }
 0x152   : > { %2339 = vst.msk [vmem:[%s304_s12 + $0x1] ss:$2 sm:$0x3] %vm1605_vm3, %v1629_v58 }
 0x153 PF: > { %s19_s21 = sadd.s32 1, %s2596_s21  }
 0x154   : > { %p16_p8 = scmp.ge.s32.totalorder %s19_s21, 4  }
 0x156   :  { %18 = sbr.rel (!%p16_p8) target bundleno = 2 (0x2), region = 92 }
 0x15b   :  { %1673 = vsyncpa [#allocation3], 1 }
 0x15c   :  { %1675 = vsyncpa [#allocation3 + $0x1], 1 }
 0x15d   :  { %1676 = vsyncpa [#allocation5], 1 }

// kernel: generator_forward.6
= control target key start
LH: loop header
LB: loop body
LE: loop exit
PB: predicated region body
PF: predicated region fallthrough
CT: control target
= control target key end

     0   :  { %s1427_s21 = smov 0   ;;  %s1808_s0 = inlined_call_operand.vmem [shape: bf16[128,576], index: 0, kind: input, shape index: {}]   ;;  %s1809_s1 = inlined_call_operand.vmem [shape: bf16[576,128], index: 1, kind: input, shape index: {}]   ;;  %s1810_s2 = inlined_call_operand.vmem [shape: f32[1,128], index: 2, kind: input, shape index: {}]   ;;  %s1811_s3 = inlined_call_operand.vmem [shape: f32[1,576], index: 3, kind: input, shape index: {}]   ;;  %s1812_s4 = inlined_call_operand.vmem [shape: f32[1,576], index: 4, kind: input, shape index: {}]   ;;  %s1813_s5 = inlined_call_operand.vmem [shape: bf16[128,128], index: 5, kind: output, shape index: {0}]   ;;  %s1814_s6 = inlined_call_operand.vmem [shape: f32[2,2,128], index: 6, kind: output, shape index: {1}]  }
   0x1 LB: > { %s1433_s22 = sadd.s32 4294967295, %s1390_s21   ;;  %p1142_p0 = scmp.ge.s32.totalorder %s1390_s21, 1  ;;  %s1390_s21 = sphi %s1427_s21, %s17_s21  }
   0x2   : > { %p217_p1 = scmp.lt.s32.totalorder %s1390_s21, 3 }
   0x4   : > { %p218_p2 = pnand %p1142_p0, %p217_p1 }
   0x5   : > { %s1143_s25 = sshll.u32 (!%p218_p2), %s1433_s22, 3  ;;  %p265_p4 = scmp.lt.s32.totalorder (!%p218_p2), %s1433_s22, 1 }
   0x6   : > { %221 = sbr.rel (%p218_p2) target bundleno = 287 (0x11f), region = 40  ;;  %p253_p3 = scmp.lt.s32.totalorder (!%p218_p2), %s1143_s25, 15 }
   0xb   : > { %v1306_v0 = vld [vmem:[%s1809_s1 + $0x38] sm:$0xff]  ;;  %v1305_v1 = vld [vmem:[%s1809_s1 + $0x30] sm:$0xff]  ;;  %s1816_s25 = smov (!%p253_p3, %s1143_s25), 15  ;;  %v1304_v4 = vld [vmem:[%s1809_s1 + $0x28] sm:$0xff]  ;;  %vm790_vm0 = vcmask 523264  }
   0xc   : > { %1358 = vmatpush.bf16.msra.mxu1 %v1306_v0  ;;  %1359 = vmatpush.bf16.msra.mxu2 %v1306_v0  ;;  %v1330_v2 = vld [vmem:[%s1809_s1 + $0xf8] sm:$0xff]  ;;  %v1329_v3 = vld [vmem:[%s1809_s1 + $0xf0] sm:$0xff]  ;;  %s1374_s8 = smul.u32 20, %s1816_s25  ;;  %v1328_v5 = vld [vmem:[%s1809_s1 + $0xe8] sm:$0xff]  ;;  %s1146_s23 = sshll.u32 %s1816_s25, 2 }
   0xd   : > { %803 = vmatpush.bf16.msra.mxu0 %v1306_v0  ;;  %890 = vmatpush.bf16.msra.mxu3 %v1330_v2  ;;  %v1303_v6 = vld [vmem:[%s1809_s1 + $0x20] sm:$0xff]  ;;  %v1302_v22 = vld [vmem:[%s1809_s1 + $0x18] sm:$0xff]  ;;  %v1301_v34 = vld [vmem:[%s1809_s1 + $0x10] sm:$0xff]  ;;  %s1783_s27 = scalar_lea.vmem %s1813_s5, %s1146_s23  ;;  %s1296_s25 = sshll.u32 %s1433_s22, 6 }
   0xe   : > { %s1459_s13 = scalar_lea.vmem %s1808_s0, %s1374_s8  ;;  %v1473_v8 = vld [vmem:[%s1811_s3] sm:$0x1f]  ;;  %v1326_v28 = vld [vmem:[%s1809_s1 + $0xd8] sm:$0xff]  ;;  %v1325_v38 = vld [vmem:[%s1809_s1 + $0xd0] sm:$0xff]  ;;  %s1818_s22 = smov (!%p265_p4, %s1433_s22), 1 }
   0xf   : > { %v1468_v7 = vld [vmem:[%s1459_s13 + $0x28] sm:$0xff]  ;;  %v1476_v9 = vld [vmem:[%s1459_s13 + $0x3c] sm:$0xff]  ;;  %v1486_v13 = vperm.slane %v1473_v8, 0  ;;  %v1495_v16 = vld [vmem:[%s1459_s13 + $0x14] sm:$0xff]  ;;  %v1532_v35 = vperm.slane %v1473_v8, 3  ;;  %s1147_s28 = sshll.u32 %s1818_s22, 1 }
  0x10   : > { %1360 = vmatpush.bf16.msra.mxu1 %v1305_v1  ;;  %1361 = vmatpush.bf16.msra.mxu2 %v1305_v1  ;;  %v1479_v10 = vld [vmem:[%s1459_s13 + $0x78] sm:$0xff]  ;;  %v1482_v11 = vld [vmem:[%s1459_s13 + $0x8c] sm:$0xff]  ;;  %v304_v12 = vunpack.c.l.bf16 %v1468_v7  ;;  %v1327_v14 = vld [vmem:[%s1809_s1 + $0xe0] sm:$0xff]  ;;  %v309_v17 = vunpack.c.l.bf16 %v1476_v9  ;;  %v299_v25 = vunpack.c.l.bf16 %v1495_v16  ;;  %s268_s7 = scalar_lea.vmem %s1814_s6, %s1147_s28 }
  0x11   : > { %804 = vmatpush.bf16.msra.mxu0 %v1305_v1  ;;  %891 = vmatpush.bf16.msra.mxu3 %v1329_v3  ;;  %v1492_v15 = vld [vmem:[%s1459_s13] sm:$0xff]  ;;  %v324_v19 = vunpack.c.l.bf16 %v1479_v10  ;;  %v329_v20 = vunpack.c.l.bf16 %v1482_v11  ;;  %v1506_v21 = vld [vmem:[%s1459_s13 + $0x8] sm:$0xff]  ;;  %v1562_v57 = vld [vmem:[%s1459_s13 + $0x50] sm:$0xff] }
  0x12   : > { %v1501_v18 = vld [vmem:[%s1812_s4] sm:$0x1f]  ;;  %v294_v24 = vunpack.c.l.bf16 %v1492_v15  ;;  %v356_v26 = vmul.f32 %v1486_v13, %v304_v12  ;;  %v297_v29 = vunpack.c.h.bf16 %v1506_v21  ;;  %v361_v30 = vmul.f32 %v1486_v13, %v309_v17  ;;  %v1300_v46 = vld [vmem:[%s1809_s1 + $0x8] sm:$0xff]  ;;  %v1322_v59 = vld [vmem:[%s1809_s1 + $0xb8] sm:$0xff] }
  0x13   : > { %v1512_v23 = vld [vmem:[%s1459_s13 + $0x1c] sm:$0xff]  ;;  %v1518_v27 = vperm.slane %v1501_v18, 0  ;;  %v376_v31 = vmul.f32 %v1486_v13, %v324_v19  ;;  %v381_v32 = vmul.f32 %v1486_v13, %v329_v20  ;;  %v351_v37 = vmul.f32 %v1486_v13, %v299_v25  ;;  %v1324_v49 = vld [vmem:[%s1809_s1 + $0xc8] sm:$0xff]  ;;  %v272_v2 = vld [vmem:[%s1459_s13 + $0x10] sm:$0xf] }
  0x14   : > { %1362 = vmatpush.bf16.msra.mxu1 %v1304_v4  ;;  %1363 = vmatpush.bf16.msra.mxu2 %v1304_v4  ;;  %v302_v33 = vunpack.c.h.bf16 %v1512_v23  ;;  %v346_v36 = vmul.f32 %v1486_v13, %v294_v24  ;;  %v349_v39 = vmul.f32 %v1532_v35, %v297_v29  ;;  %v1542_v41 = vperm.slane %v1501_v18, 3  ;;  %v1299_v56 = vld [vmem:[%s1809_s1] sm:$0xff]  ;;  %v1314_v60 = vld [vmem:[%s1809_s1 + $0x78] sm:$0xff]  ;;  %v1321_v20 = vld [vmem:[%s1809_s1 + $0xb0] sm:$0xff] }
  0x15   : > { %805 = vmatpush.bf16.msra.mxu0 %v1304_v4  ;;  %892 = vmatpush.bf16.msra.mxu3 %v1328_v5  ;;  %v408_v42 = vadd.f32 %v1518_v27, %v356_v26  ;;  %v413_v43 = vadd.f32 %v1518_v27, %v361_v30  ;;  %v428_v44 = vadd.f32 %v1518_v27, %v376_v31  ;;  %v1565_v58 = vld [vmem:[%s1459_s13 + $0x64] sm:$0xff]  ;;  %v1334_v19 = vld [vmem:[%s1809_s1 + $0x118] sm:$0xff]  ;;  %v298_v24 = vunpack.c.l.bf16 %v272_v2 }
  0x16   : > { %v354_v40 = vmul.f32 %v1532_v35, %v302_v33  ;;  %v433_v45 = vadd.f32 %v1518_v27, %v381_v32  ;;  %v398_v47 = vadd.f32 %v1518_v27, %v346_v36  ;;  %v403_v48 = vadd.f32 %v1518_v27, %v351_v37  ;;  %v1323_v63 = vld [vmem:[%s1809_s1 + $0xc0] sm:$0xff]  ;;  %v1320_v36 = vld [vmem:[%s1809_s1 + $0xa8] sm:$0xff] }
  0x17   : > { %v401_v50 = vadd.f32 %v1542_v41, %v349_v39  ;;  %v448_v52 = vmax.f32 %v408_v42, 0.0  ;;  %v453_v53 = vmax.f32 %v413_v43, 0.0  ;;  %v468_v54 = vmax.f32 %v428_v44, 0.0  ;;  %v275_v3 = vld [vmem:[%s1459_s13 + $0x24] sm:$0xf]  ;;  %v1312_v37 = vld [vmem:[%s1809_s1 + $0x68] sm:$0xff] }
  0x18   : > { %1364 = vmatpush.bf16.msra.mxu1 %v1303_v6  ;;  %1365 = vmatpush.bf16.msra.mxu2 %v1303_v6  ;;  %v406_v51 = vadd.f32 %v1542_v41, %v354_v40  ;;  %v473_v55 = vmax.f32 %v433_v45, 0.0  ;;  %v438_v61 = vmax.f32 %v398_v47, 0.0  ;;  %v443_v62 = vmax.f32 %v403_v48, 0.0  ;;  %v1584_v17 = vld [vmem:[%s1459_s13 + $0x44] sm:$0xff] }
  0x19   : > { %806 = vmatpush.bf16.msra.mxu0 %v1303_v6  ;;  %893 = vmatpush.bf16.msra.mxu3 %v1327_v14  ;;  %v441_v0 = vmax.f32 %v401_v50, 0.0  ;;  %v483_v4 = vpack.c.bf16 %v453_v53, %v448_v52  ;;  %v314_v6 = vunpack.c.l.bf16 %v1562_v57  ;;  %v319_v12 = vunpack.c.l.bf16 %v1565_v58  ;;  %v1581_v14 = vld [vmem:[%s1459_s13 + $0x30] sm:$0xff]  ;;  %v1332_v45 = vld [vmem:[%s1809_s1 + $0x108] sm:$0xff]  ;;  %v1311_v47 = vld [vmem:[%s1809_s1 + $0x60] sm:$0xff] }
  0x1a   : > { %v446_v1 = vmax.f32 %v406_v51, 0.0  ;;  %v493_v5 = vpack.c.bf16 %v473_v55, %v468_v54  ;;  %v303_v25 = vunpack.c.l.bf16 %v275_v3  ;;  %v1596_v26 = vperm.slane %v1473_v8, 4  ;;  %v1331_v55 = vld [vmem:[%s1809_s1 + $0x100] sm:$0xff] }
  0x1b   : > { %v307_v30 = vunpack.c.h.bf16 %v1581_v14  ;;  %v312_v31 = vunpack.c.h.bf16 %v1584_v17  ;;  %v366_v32 = vmul.f32 %v1486_v13, %v314_v6  ;;  %v371_v33 = vmul.f32 %v1486_v13, %v319_v12  ;;  %v1658_v6 = vld [vmem:[%s1459_s13 + $0x6c] sm:$0xff] }
  0x1c   : > { %1366 = vmatpush.bf16.msra.mxu1 %v1302_v22  ;;  %1367 = vmatpush.bf16.msra.mxu2 %v1302_v22  ;;  %v481_v29 = vpack.c.bf16 %v446_v1, %v441_v0  ;;  %v355_v39 = vmul.f32 %v1596_v26, %v303_v25  ;;  %v1614_v13 = vperm.slane %v1501_v18, 4  ;;  %v296_v53 = vunpack.c.l.bf16 %v1506_v21  ;;  %v1310_v21 = vld [vmem:[%s1809_s1 + $0x58] sm:$0xff]  ;;  %v281_v0 = vld [vmem:[%s1459_s13 + $0x4c] sm:$0xf] }
  0x1d   : > { %807 = vmatpush.bf16.msra.mxu0 %v1302_v22  ;;  %894 = vmatpush.bf16.msra.mxu3 %v1326_v28  ;;  %v1313_v22 = vld [vmem:[%s1809_s1 + $0x70] sm:$0xff]  ;;  %v478_v28 = vpack.c.bf16 %v443_v62, %v438_v61  ;;  %v359_v40 = vmul.f32 %v1532_v35, %v307_v30  ;;  %v364_v42 = vmul.f32 %v1532_v35, %v312_v31  ;;  %v301_v54 = vunpack.c.l.bf16 %v1512_v23 }
  0x1e   : > { %v418_v43 = vadd.f32 %v1518_v27, %v366_v32  ;;  %v423_v44 = vadd.f32 %v1518_v27, %v371_v33  ;;  %v295_v1 = vunpack.c.h.bf16 %v1492_v15  ;;  %v300_v2 = vunpack.c.h.bf16 %v1495_v16  ;;  %v1317_v15 = vld [vmem:[%s1809_s1 + $0x90] sm:$0xff] }
  0x1f   : > { %v411_v27 = vadd.f32 %v1542_v41, %v359_v40  ;;  %v416_v50 = vadd.f32 %v1542_v41, %v364_v42  ;;  %v1676_v32 = vperm.slane %v1501_v18, 1 }
  0x20   : > { %1368 = vmatpush.bf16.msra.mxu1 %v1301_v34  ;;  %1369 = vmatpush.bf16.msra.mxu2 %v1301_v34  ;;  %v458_v51 = vmax.f32 %v418_v43, 0.0  ;;  %v463_v52 = vmax.f32 %v423_v44, 0.0 }
  0x21   : > { %808 = vmatpush.bf16.msra.mxu0 %v1301_v34  ;;  %895 = vmatpush.bf16.msra.mxu3 %v1325_v38  ;;  %v1333_v34 = vld [vmem:[%s1809_s1 + $0x110] sm:$0xff]  ;;  %v350_v38 = vmul.f32 %v1596_v26, %v298_v24  ;;  %v451_v61 = vmax.f32 %v411_v27, 0.0  ;;  %v456_v62 = vmax.f32 %v416_v50, 0.0 }
  0x22   : > { %v488_v3 = vpack.c.bf16 %v463_v52, %v458_v51 }
  0x23   : > { %v402_v48 = vadd.f32 %v1614_v13, %v350_v38  ;;  %v486_v25 = vpack.c.bf16 %v456_v62, %v451_v61 }
  0x24   : > { %1370 = vmatpush.bf16.msra.mxu1 %v1300_v46  ;;  %1371 = vmatpush.bf16.msra.mxu2 %v1300_v46 }
  0x25   : > { %809 = vmatpush.bf16.msra.mxu0 %v1300_v46  ;;  %896 = vmatpush.bf16.msra.mxu3 %v1324_v49  ;;  %v1319_v46 = vld [vmem:[%s1809_s1 + $0xa0] sm:$0xff]  ;;  %v407_v49 = vadd.f32 %v1614_v13, %v355_v39  ;;  %v442_v23 = vmax.f32 %v402_v48, 0.0 }
  0x28   : > { %1372 = vmatpush.bf16.msra.mxu1 %v1299_v56  ;;  %1373 = vmatpush.bf16.msra.mxu2 %v1299_v56 }
  0x29   : > { %810 = vmatpush.bf16.msra.mxu0 %v1299_v56  ;;  %897 = vmatpush.bf16.msra.mxu3 %v1323_v63  ;;  %v1639_v56 = vperm.slane %v1473_v8, 2  ;;  %v278_v63 = vld [vmem:[%s1459_s13 + $0x38] sm:$0xf] }
  0x2a   : > { %v308_v16 = vunpack.c.l.bf16 %v278_v63  ;;  %v284_v63 = vld [vmem:[%s1459_s13 + $0x60] sm:$0xf] }
  0x2b   : > { %816 = vmatmul.bf16.vlgmr.msra.gmra.mxu1 %v483_v4  ;;  %826 = vmatmul.bf16.vlgmr.msra.gmra.mxu2 %v493_v5  ;;  %v1652_v4 = vperm.slane %v1473_v8, 1  ;;  %v1655_v5 = vld [vmem:[%s1459_s13 + $0x58] sm:$0xff]  ;;  %v348_v12 = vmul.f32 %v1639_v56, %v296_v53  ;;  %v1309_v8 = vld [vmem:[%s1809_s1 + $0x50] sm:$0xff] }
  0x2c   : > { %861 = vmatpush.bf16.msrb.mxu2 %v1322_v59  ;;  %832 = vmatpush.bf16.msrb.mxu1 %v1314_v60  ;;  %v1318_v59 = vld [vmem:[%s1809_s1 + $0x98] sm:$0xff]  ;;  %v447_v60 = vmax.f32 %v407_v49, 0.0  ;;  %v360_v38 = vmul.f32 %v1596_v26, %v308_v16 }
  0x2d   : > { %923 = vmatpush.bf16.msrb.mxu0 %v1334_v19  ;;  %898 = vmatmul.bf16.vlgmr.msra.gmra.mxu3 %v481_v29  ;;  %v353_v19 = vmul.f32 %v1639_v56, %v301_v54  ;;  %v322_v29 = vunpack.c.h.bf16 %v1658_v6  ;;  %v347_v30 = vmul.f32 %v1652_v4, %v295_v1  ;;  %v352_v31 = vmul.f32 %v1652_v4, %v300_v2  ;;  %v287_v1 = vld [vmem:[%s1459_s13 + $0x74] sm:$0xf]  ;;  %v1710_v2 = vld [vmem:[%s1459_s13 + $0x80] sm:$0xff] }
  0x2e   : > { %811 = vmatmul.bf16.vlgmr.msra.gmra.mxu0 %v478_v28  ;;  %v482_v24 = vpack.c.bf16 %v447_v60, %v442_v23  ;;  %v317_v28 = vunpack.c.h.bf16 %v1655_v5  ;;  %v412_v48 = vadd.f32 %v1614_v13, %v360_v38  ;;  %v306_v54 = vunpack.c.l.bf16 %v1581_v14 }
  0x2f   : > { %v374_v40 = vmul.f32 %v1532_v35, %v322_v29  ;;  %v399_v42 = vadd.f32 %v1676_v32, %v347_v30  ;;  %v404_v43 = vadd.f32 %v1676_v32, %v352_v31  ;;  %v305_v23 = vunpack.c.h.bf16 %v1468_v7 }
  0x30   : > { %862 = vmatpush.bf16.msrb.mxu2 %v1321_v20  ;;  %833 = vmatpush.bf16.msrb.mxu1 %v1313_v22  ;;  %v1663_v20 = vperm.slane %v1501_v18, 2  ;;  %v313_v22 = vunpack.c.l.bf16 %v281_v0  ;;  %v369_v18 = vmul.f32 %v1532_v35, %v317_v28  ;;  %v310_v60 = vunpack.c.h.bf16 %v1476_v9 }
  0x31   : > { %924 = vmatpush.bf16.msrb.mxu0 %v1333_v34  ;;  %v426_v50 = vadd.f32 %v1542_v41, %v374_v40  ;;  %v439_v51 = vmax.f32 %v399_v42, 0.0  ;;  %v444_v52 = vmax.f32 %v404_v43, 0.0  ;;  %v358_v14 = vmul.f32 %v1639_v56, %v306_v54 }
  0x32   : > { %v400_v33 = vadd.f32 %v1663_v20, %v348_v12  ;;  %v405_v34 = vadd.f32 %v1663_v20, %v353_v19  ;;  %v365_v39 = vmul.f32 %v1596_v26, %v313_v22  ;;  %v421_v27 = vadd.f32 %v1542_v41, %v369_v18 }
  0x33   : > { %v466_v62 = vmax.f32 %v426_v50, 0.0  ;;  %v479_v0 = vpack.c.bf16 %v444_v52, %v439_v51  ;;  %v357_v19 = vmul.f32 %v1652_v4, %v305_v23  ;;  %v362_v7 = vmul.f32 %v1652_v4, %v310_v60 }
  0x34   : > { %863 = vmatpush.bf16.msrb.mxu2 %v1320_v36  ;;  %834 = vmatpush.bf16.msrb.mxu1 %v1312_v37  ;;  %v1316_v36 = vld [vmem:[%s1809_s1 + $0x88] sm:$0xff]  ;;  %v440_v44 = vmax.f32 %v400_v33, 0.0  ;;  %v417_v49 = vadd.f32 %v1614_v13, %v365_v39  ;;  %v461_v61 = vmax.f32 %v421_v27, 0.0  ;;  %v318_v9 = vunpack.c.l.bf16 %v284_v63 }
  0x35   : > { %925 = vmatpush.bf16.msrb.mxu0 %v1332_v45  ;;  %v1308_v37 = vld [vmem:[%s1809_s1 + $0x48] sm:$0xff]  ;;  %v445_v45 = vmax.f32 %v405_v34, 0.0  ;;  %v327_v16 = vunpack.c.h.bf16 %v1710_v2  ;;  %v409_v28 = vadd.f32 %v1676_v32, %v357_v19  ;;  %v414_v29 = vadd.f32 %v1676_v32, %v362_v7 }
  0x36   : > { %v370_v30 = vmul.f32 %v1596_v26, %v318_v9  ;;  %v325_v18 = vunpack.c.h.bf16 %v1479_v10  ;;  %v330_v40 = vunpack.c.h.bf16 %v1482_v11  ;;  %v321_v10 = vunpack.c.l.bf16 %v1658_v6 }
  0x37   : > { %v480_v53 = vpack.c.bf16 %v445_v45, %v440_v44  ;;  %v379_v33 = vmul.f32 %v1532_v35, %v327_v16  ;;  %v449_v38 = vmax.f32 %v409_v28, 0.0  ;;  %v454_v39 = vmax.f32 %v414_v29, 0.0 }
  0x38   : > { %864 = vmatpush.bf16.msrb.mxu2 %v1319_v46  ;;  %835 = vmatpush.bf16.msrb.mxu1 %v1311_v47  ;;  %v1315_v46 = vld [vmem:[%s1809_s1 + $0x80] sm:$0xff]  ;;  %v422_v42 = vadd.f32 %v1614_v13, %v370_v30  ;;  %v320_v54 = vunpack.c.h.bf16 %v1565_v58  ;;  %v373_v6 = vmul.f32 %v1639_v56, %v321_v10 }
  0x39   : > { %926 = vmatpush.bf16.msrb.mxu0 %v1331_v55  ;;  %v1307_v47 = vld [vmem:[%s1809_s1 + $0x40] sm:$0xff]  ;;  %v311_v55 = vunpack.c.l.bf16 %v1584_v17  ;;  %v431_v44 = vadd.f32 %v1542_v41, %v379_v33  ;;  %v484_v11 = vpack.c.bf16 %v454_v39, %v449_v38 }
  0x3a   : > { %v462_v50 = vmax.f32 %v422_v42, 0.0 }
  0x3b   : > { %821 = vmatmul.bf16.gmra.mxu1 %v488_v3  ;;  %v1713_v3 = vld [vmem:[%s1459_s13 + $0x94] sm:$0xff]  ;;  %v363_v17 = vmul.f32 %v1639_v56, %v311_v55  ;;  %v471_v52 = vmax.f32 %v431_v44, 0.0  ;;  %v290_v55 = vld [vmem:[%s1459_s13 + $0x88] sm:$0xf] }
  0x3c   : > { %865 = vmatpush.bf16.msrb.mxu2 %v1318_v59  ;;  %836 = vmatpush.bf16.msrb.mxu1 %v1310_v21  ;;  %v452_v59 = vmax.f32 %v412_v48, 0.0  ;;  %v457_v21 = vmax.f32 %v417_v49, 0.0  ;;  %v332_v22 = vunpack.c.h.bf16 %v1713_v3  ;;  %v316_v48 = vunpack.c.l.bf16 %v1655_v5 }
  0x3d   : > { %903 = vmatmul.bf16.gmra.mxu3 %v486_v25  ;;  %v415_v25 = vadd.f32 %v1663_v20, %v363_v17  ;;  %v328_v63 = vunpack.c.l.bf16 %v290_v55  ;;  %v331_v28 = vunpack.c.l.bf16 %v1713_v3 }
  0x3e   : > { %1292 = vmatmul.msk.bf16.vlgmr.msrb.gmra.mxu0 %vm790_vm0, %v482_v24  ;;  %v487_v12 = vpack.c.bf16 %v457_v21, %v452_v59  ;;  %v410_v24 = vadd.f32 %v1663_v20, %v358_v14  ;;  %v384_v34 = vmul.f32 %v1532_v35, %v332_v22  ;;  %v377_v35 = vmul.f32 %v1652_v4, %v325_v18  ;;  %v293_v59 = vld [vmem:[%s1459_s13 + $0x9c] sm:$0xf] }
  0x3f   : > { %v368_v5 = vmul.f32 %v1639_v56, %v316_v48  ;;  %v425_v14 = vadd.f32 %v1663_v20, %v373_v6  ;;  %v380_v17 = vmul.f32 %v1596_v26, %v328_v63 }
  0x40   : > { %866 = vmatpush.bf16.msrb.mxu2 %v1317_v15  ;;  %837 = vmatpush.bf16.msrb.mxu1 %v1309_v8  ;;  %v491_v15 = vpack.c.bf16 %v466_v62, %v461_v61  ;;  %v323_v8 = vunpack.c.l.bf16 %v287_v1  ;;  %v436_v45 = vadd.f32 %v1542_v41, %v384_v34  ;;  %v429_v49 = vadd.f32 %v1676_v32, %v377_v35 }
  0x41   : > { %v315_v41 = vunpack.c.h.bf16 %v1562_v57  ;;  %v372_v57 = vmul.f32 %v1652_v4, %v320_v54  ;;  %v420_v58 = vadd.f32 %v1663_v20, %v368_v5 }
  0x42   : > { %v375_v31 = vmul.f32 %v1596_v26, %v323_v8  ;;  %v469_v21 = vmax.f32 %v429_v49, 0.0  ;;  %v432_v8 = vadd.f32 %v1614_v13, %v380_v17 }
  0x43   : > { %v367_v1 = vmul.f32 %v1652_v4, %v315_v41  ;;  %v424_v7 = vadd.f32 %v1676_v32, %v372_v57  ;;  %v460_v9 = vmax.f32 %v420_v58, 0.0 }
  0x44   : > { %867 = vmatpush.bf16.msrb.mxu2 %v1316_v36  ;;  %838 = vmatpush.bf16.msrb.mxu1 %v1308_v37  ;;  %v450_v36 = vmax.f32 %v410_v24, 0.0  ;;  %v455_v37 = vmax.f32 %v415_v25, 0.0  ;;  %v427_v43 = vadd.f32 %v1614_v13, %v375_v31  ;;  %v326_v25 = vunpack.c.l.bf16 %v1710_v2 }
  0x45   : > { %v419_v19 = vadd.f32 %v1676_v32, %v367_v1  ;;  %v464_v22 = vmax.f32 %v424_v7, 0.0  ;;  %v472_v29 = vmax.f32 %v432_v8, 0.0 }
  0x46   : > { %v467_v51 = vmax.f32 %v427_v43, 0.0  ;;  %v378_v31 = vmul.f32 %v1639_v56, %v326_v25 }
  0x47   : > { %v459_v16 = vmax.f32 %v419_v19, 0.0 }
  0x48   : > { %868 = vmatpush.bf16.msrb.mxu2 %v1315_v46  ;;  %839 = vmatpush.bf16.msrb.mxu1 %v1307_v47  ;;  %v382_v46 = vmul.f32 %v1652_v4, %v330_v40  ;;  %v485_v47 = vpack.c.bf16 %v455_v37, %v450_v36  ;;  %v492_v61 = vpack.c.bf16 %v467_v51, %v462_v50 }
  0x49   : > { %v430_v34 = vadd.f32 %v1663_v20, %v378_v31 }
  0x4a   : > { %v434_v27 = vadd.f32 %v1676_v32, %v382_v46  ;;  %v383_v32 = vmul.f32 %v1639_v56, %v331_v28 }
  0x4b   : > { %869 = vmatmul.bf16.vlgmr.msrb.gmra.mxu2 %v480_v53  ;;  %840 = vmatmul.bf16.vlgmr.msrb.gmra.mxu1 %v479_v0  ;;  %v476_v53 = vmax.f32 %v436_v45, 0.0  ;;  %v333_v0 = vunpack.c.l.bf16 %v293_v59  ;;  %v470_v36 = vmax.f32 %v430_v34, 0.0 }
  0x4c   : > { %v474_v23 = vmax.f32 %v434_v27, 0.0 }
  0x4d   : > { %908 = vmatmul.bf16.gmra.mxu3 %v491_v15  ;;  %v496_v62 = vpack.c.bf16 %v476_v53, %v471_v52  ;;  %v465_v15 = vmax.f32 %v425_v14, 0.0 }
  0x4e   : > { %1293 = vmatmul.msk.bf16.gmra.mxu0 %vm790_vm0, %v487_v12  ;;  %v494_v60 = vpack.c.bf16 %v474_v23, %v469_v21  ;;  %v385_v12 = vmul.f32 %v1596_v26, %v333_v0  ;;  %v489_v26 = vpack.c.bf16 %v464_v22, %v459_v16 }
  0x4f   : > { %v490_v24 = vpack.c.bf16 %v465_v15, %v460_v9  ;;  %v965_v15 = vlaneseq }
  0x50   : > { %v437_v4 = vadd.f32 %v1614_v13, %v385_v12  ;;  %v435_v13 = vadd.f32 %v1663_v20, %v383_v32  ;;  %v1773_v20 = vld [vmem:[%s1810_s2] ss:$0 sm:$0xff] }
  0x52   : > { %v477_v30 = vmax.f32 %v437_v4, 0.0  ;;  %v475_v2 = vmax.f32 %v435_v13, 0.0  ;;  %v974_v13 = vstv %s1296_s25 }
  0x54   : > { %v497_v33 = vpack.c.bf16 %v477_v30, %v472_v29  ;;  %v495_v37 = vpack.c.bf16 %v475_v2, %v470_v36  ;;  %v966_v29 = vshrl.u32 %v965_v15, 7 }
  0x56   : > { %v968_v32 = vadd.s32 16, %v966_v29 }
  0x5b   : > { %874 = vmatmul.bf16.gmra.mxu2 %v485_v47  ;;  %845 = vmatmul.bf16.gmra.mxu1 %v484_v11 }
  0x5d   : > { %913 = vmatmul.bf16.gmra.mxu3 %v496_v62 }
  0x5e   : > { %1294 = vmatmul.msk.bf16.gmra.mxu0 %vm790_vm0, %v492_v61 }
  0x6b   : > { %879 = vmatmul.bf16.gmra.mxu2 %v490_v24  ;;  %850 = vmatmul.bf16.gmra.mxu1 %v489_v26  ;;  %v967_v26 = vadd.s32 8, %v966_v29 }
  0x6e   : > { %1295 = vmatmul.msk.bf16.gmra.mxu0 %vm790_vm0, %v497_v33 }
  0x7b   : > { %884 = vmatmul.bf16.gmra.mxu2 %v495_v37  ;;  %855 = vmatmul.bf16.gmra.mxu1 %v494_v60  ;;  %v976_v37 = vadd.s32 %v974_v13, %v967_v26 }
  0x7d   : > { %vm984_vm1 = vcmp.lt.s32.totalorder %v976_v37, 128 }
  0xa8   : > { %v817_v3 = vpop.f32.mrf.mxu1 }
  0xa9   : > { %v818_v6 = vadd.f32 %v1773_v20, %v817_v3  ;;  %v969_v3 = vadd.s32 24, %v966_v29 }
  0xab   : > { %v812_v38 = vpop.f32.mrf.mxu0 }
  0xac   : > { %v813_v47 = vadd.f32 %v1773_v20, %v812_v38 }
  0xae   : > { %v1766_v42 = vpop.f32.mrf.mxu2 }
  0xb0   : > { %v819_v39 = vpop.f32.mrf.mxu1  ;;  %v899_v56 = vpop.f32.mrf.mxu3 }
  0xb1   : > { %v820_v0 = vadd.f32 %v1773_v20, %v819_v39 }
  0xb3   : > { %v814_v18 = vpop.f32.mrf.mxu0 }
  0xb4   : > { %v815_v49 = vadd.f32 %v1773_v20, %v814_v18  ;;  %v975_v18 = vadd.s32 %v974_v13, %v966_v29 }
  0xb6   : > { %v1768_v45 = vpop.f32.mrf.mxu2  ;;  %vm983_vm2 = vcmp.lt.s32.totalorder %v975_v18, 128 }
  0xb8   : > { %v822_v40 = vpop.f32.mrf.mxu1  ;;  %v901_v46 = vpop.f32.mrf.mxu3 }
  0xb9   : > { %v823_v24 = vadd.f32 %v1773_v20, %v822_v40  ;;  %v977_v40 = vadd.s32 %v974_v13, %v968_v32 }
  0xbb   : > { %v928_v44 = vpop.f32.mrf.mxu0  ;;  %vm985_vm3 = vcmp.lt.s32.totalorder %v977_v40, 128 }
  0xc0   : > { %v824_v43 = vpop.f32.mrf.mxu1  ;;  %v904_v53 = vpop.f32.mrf.mxu3 }
  0xc1   : > { %v825_v31 = vadd.f32 %v1773_v20, %v824_v43  ;;  %v828_v43 = vadd.f32 %v1773_v20, %v1766_v42 }
  0xc3   : > { %v930_v10 = vpop.f32.mrf.mxu0 }
  0xc8   : > { %v841_v35 = vpop.f32.mrf.mxu1  ;;  %v906_v63 = vpop.f32.mrf.mxu3 }
  0xc9   : > { %v842_v11 = vadd.f32 %v841_v35, %v813_v47  ;;  %v970_v35 = vadd.s32 32, %v966_v29  ;;  %v978_v47 = vadd.s32 %v974_v13, %v969_v3 }
  0xcb   : > { %v933_v55 = vpop.f32.mrf.mxu0  ;;  %vm986_vm4 = vcmp.lt.s32.totalorder %v978_v47, 128 }
  0xce   : > { %v870_v48 = vpop.f32.mrf.mxu2 }
  0xcf   : > { %v871_v27 = vadd.f32 %v870_v48, %v842_v11  ;;  %v971_v48 = vadd.s32 40, %v966_v29 }
  0xd0   : > { %v843_v50 = vpop.f32.mrf.mxu1  ;;  %v909_v9 = vpop.f32.mrf.mxu3 }
  0xd1   : > { %v844_v51 = vadd.f32 %v843_v50, %v815_v49  ;;  %v900_v41 = vadd.f32 %v899_v56, %v871_v27  ;;  %v979_v50 = vadd.s32 %v974_v13, %v970_v35 }
  0xd3   : > { %v1778_v21 = vadd.f32 %v928_v44, %v900_v41  ;;  %v935_v1 = vpop.f32.mrf.mxu0  ;;  %vm987_vm5 = vcmp.lt.s32.totalorder %v979_v50, 128 }
  0xd5   : > { %v1007_v41 = vsel %vm983_vm2, %v1778_v21, 0.0 }
  0xd6   : > { %v872_v52 = vpop.f32.mrf.mxu2 }
  0xd7   : > { %v873_v54 = vadd.f32 %v872_v52, %v844_v51  ;;  %v972_v52 = vadd.s32 48, %v966_v29 }
  0xd8   : > { %v846_v5 = vpop.f32.mrf.mxu1  ;;  %v911_v36 = vpop.f32.mrf.mxu3 }
  0xd9   : > { %v902_v59 = vadd.f32 %v901_v46, %v873_v54  ;;  %v847_v62 = vadd.f32 %v846_v5, %v818_v6  ;;  %v980_v54 = vadd.s32 %v974_v13, %v971_v48 }
  0xdb   : > { %v931_v23 = vadd.f32 %v930_v10, %v902_v59  ;;  %v938_v22 = vpop.f32.mrf.mxu0  ;;  %vm988_vm6 = vcmp.lt.s32.totalorder %v980_v54, 128 }
  0xdd   : > { %v1338_v60 = vpack.c.bf16 %v931_v23, %v1778_v21  ;;  %v1008_v27 = vsel %vm984_vm1, %v931_v23, 0.0  ;;  %v830_v23 = vadd.f32 %v1773_v20, %v1768_v45  ;;  %v973_v21 = vadd.s32 56, %v966_v29 }
  0xde   : > { %v875_v61 = vpop.f32.mrf.mxu2  ;;  %v1030_v42 = vmul.f32 %v1008_v27, %v1008_v27 }
  0xdf   : > { %1339 = vst [vmem:[%s1783_s27] sm:$0xff] %v1338_v60   ;;  %v876_v57 = vadd.f32 %v875_v61, %v847_v62  ;;  %v981_v61 = vadd.s32 %v974_v13, %v972_v52  ;;  %v1029_v62 = vmul.f32 %v1007_v41, %v1007_v41  ;;  %v982_v20 = vadd.s32 %v974_v13, %v973_v21 }
  0xe0   : > { %v848_v58 = vpop.f32.mrf.mxu1 }
  0xe1   : > { %v849_v14 = vadd.f32 %v848_v58, %v820_v0  ;;  %v905_v12 = vadd.f32 %v904_v53, %v876_v57  ;;  %v1037_v58 = vadd.f32 %v1030_v42, %v1029_v62  ;;  %vm989_vm7 = vcmp.lt.s32.totalorder %v981_v61, 128 }
  0xe2   : > { %vm990_vm8 = vcmp.lt.s32.totalorder %v982_v20, 128 }
  0xe3   : > { %v934_v8 = vadd.f32 %v933_v55, %v905_v12  ;;  %v940_v38 = vpop.f32.mrf.mxu0  ;;  %v914_v55 = vpop.f32.mrf.mxu3 }
  0xe5   : > { %v1009_v5 = vsel %vm985_vm3, %v934_v8, 0.0 }
  0xe6   : > { %v877_v17 = vpop.f32.mrf.mxu2  ;;  %v1031_v57 = vmul.f32 %v1009_v5, %v1009_v5 }
  0xe7   : > { %v878_v19 = vadd.f32 %v877_v17, %v849_v14 }
  0xe8   : > { %v851_v16 = vpop.f32.mrf.mxu1 }
  0xe9   : > { %v907_v7 = vadd.f32 %v906_v63, %v878_v19  ;;  %v852_v30 = vadd.f32 %v851_v16, %v823_v24 }
  0xeb   : > { %v936_v4 = vadd.f32 %v935_v1, %v907_v7  ;;  %v943_v60 = vpop.f32.mrf.mxu0  ;;  %v1015_v1 = vadd.f32 %v1008_v27, %v1007_v41 }
  0xed   : > { %v1343_v25 = vpack.c.bf16 %v936_v4, %v934_v8  ;;  %v1010_v63 = vsel %vm986_vm4, %v936_v4, 0.0  ;;  %v1016_v19 = vadd.f32 %v1015_v1, %v1009_v5  ;;  %v1038_v8 = vadd.f32 %v1037_v58, %v1031_v57 }
  0xee   : > { %v880_v28 = vpop.f32.mrf.mxu2  ;;  %v1032_v7 = vmul.f32 %v1010_v63, %v1010_v63 }
  0xef   : > { %1355 = vst [vmem:[%s1783_s27 + $0x8] sm:$0xff] %v1343_v25   ;;  %v881_v33 = vadd.f32 %v880_v28, %v852_v30  ;;  %v1017_v16 = vadd.f32 %v1016_v19, %v1010_v63  ;;  %v916_v30 = vpop.f32.mrf.mxu3 }
  0xf0   : > { %v853_v34 = vpop.f32.mrf.mxu1  ;;  %v1039_v25 = vadd.f32 %v1038_v8, %v1032_v7 }
  0xf1   : > { %v854_v2 = vadd.f32 %v853_v34, %v825_v31  ;;  %v910_v56 = vadd.f32 %v909_v9, %v881_v33 }
  0xf3   : > { %v939_v10 = vadd.f32 %v938_v22, %v910_v56  ;;  %v945_v34 = vpop.f32.mrf.mxu0 }
  0xf5   : > { %v1011_v14 = vsel %vm987_vm5, %v939_v10, 0.0 }
  0xf6   : > { %v882_v39 = vpop.f32.mrf.mxu2  ;;  %v1033_v22 = vmul.f32 %v1011_v14, %v1011_v14  ;;  %v1018_v28 = vadd.f32 %v1017_v16, %v1011_v14 }
  0xf7   : > { %v883_v44 = vadd.f32 %v882_v39, %v854_v2 }
  0xf8   : > { %v856_v49 = vpop.f32.mrf.mxu1  ;;  %v1040_v31 = vadd.f32 %v1039_v25, %v1033_v22 }
  0xf9   : > { %v912_v46 = vadd.f32 %v911_v36, %v883_v44  ;;  %v857_v51 = vadd.f32 %v856_v49, %v828_v43 }
  0xfb   : > { %v941_v11 = vadd.f32 %v940_v38, %v912_v46 }
  0xfd   : > { %v1348_v53 = vpack.c.bf16 %v941_v11, %v939_v10  ;;  %v1012_v15 = vsel %vm988_vm6, %v941_v11, 0.0 }
  0xfe   : > { %v885_v59 = vpop.f32.mrf.mxu2  ;;  %v1034_v29 = vmul.f32 %v1012_v15, %v1012_v15  ;;  %v1019_v32 = vadd.f32 %v1018_v28, %v1012_v15 }
  0xff   : > { %1356 = vst [vmem:[%s1783_s27 + $0x10] sm:$0xff] %v1348_v53   ;;  %v886_v6 = vadd.f32 %v885_v59, %v857_v51 }
 0x100   : > { %v858_v12 = vpop.f32.mrf.mxu1  ;;  %v1041_v2 = vadd.f32 %v1040_v31, %v1034_v29 }
 0x101   : > { %v915_v0 = vadd.f32 %v914_v55, %v886_v6  ;;  %v859_v9 = vadd.f32 %v858_v12, %v830_v23 }
 0x103   : > { %v944_v17 = vadd.f32 %v943_v60, %v915_v0 }
 0x105   : > { %v1013_v4 = vsel %vm989_vm7, %v944_v17, 0.0 }
 0x106   : > { %v887_v45 = vpop.f32.mrf.mxu2  ;;  %v1035_v33 = vmul.f32 %v1013_v4, %v1013_v4  ;;  %v1020_v37 = vadd.f32 %v1019_v32, %v1013_v4 }
 0x107   : > { %v888_v24 = vadd.f32 %v887_v45, %v859_v9 }
 0x108   : > { %v1042_v38 = vadd.f32 %v1041_v2, %v1035_v33 }
 0x109   : > { %v917_v26 = vadd.f32 %v916_v30, %v888_v24 }
 0x10b   : > { %v946_v36 = vadd.f32 %v945_v34, %v917_v26 }
 0x10d   : > { %v1353_v3 = vpack.c.bf16 %v946_v36, %v944_v17  ;;  %v1014_v13 = vsel %vm990_vm8, %v946_v36, 0.0 }
 0x10e   : > { %v1021_v39 = vadd.f32 %v1020_v37, %v1014_v13  ;;  %v1036_v18 = vmul.f32 %v1014_v13, %v1014_v13 }
 0x10f   : > { %1357 = vst [vmem:[%s1783_s27 + $0x18] sm:$0xff] %v1353_v3  }
 0x110   : > { %v1022_v40 = vrot.slane %v1021_v39, 4  ;;  %v1043_v56 = vadd.f32 %v1042_v38, %v1036_v18 }
 0x112   : > { %v1023_v44 = vadd.f32 %v1022_v40, %v1021_v39  ;;  %v1044_v35 = vrot.slane %v1043_v56, 4 }
 0x114   : > { %v1024_v46 = vrot.slane %v1023_v44, 2  ;;  %v1045_v43 = vadd.f32 %v1044_v35, %v1043_v56 }
 0x116   : > { %v1025_v47 = vadd.f32 %v1024_v46, %v1023_v44  ;;  %v1046_v48 = vrot.slane %v1045_v43, 2 }
 0x118   : > { %v1026_v10 = vrot.slane %v1025_v47, 1  ;;  %v1047_v11 = vadd.f32 %v1046_v48, %v1045_v43 }
 0x11a   : > { %v1027_v49 = vadd.f32 %v1026_v10, %v1025_v47  ;;  %v1048_v27 = vrot.slane %v1047_v11, 1 }
 0x11c   : > { %1028 = vst [vmem:[%s268_s7] sm:$0x1] %v1027_v49  ;;  %v1049_v50 = vadd.f32 %v1048_v27, %v1047_v11 }
 0x11e   : > { %1050 = vst [vmem:[%s268_s7 + $0x1] sm:$0x1] %v1049_v50 }
 0x11f PF: > { %s17_s21 = sadd.s32 1, %s1390_s21  }
 0x120   : > { %p14_p5 = scmp.ge.s32.totalorder %s17_s21, 4  }
 0x122   :  { %16 = sbr.rel (!%p14_p5) target bundleno = 1 (0x1), region = 82 }

// kernel: tile.53
= control target key start
LH: loop header
LB: loop body
LE: loop exit
PB: predicated region body
PF: predicated region fallthrough
CT: control target
= control target key end

     0   :  { %s28_s0 = inlined_call_operand.vmem [shape: f32[32], index: 0, kind: input, shape index: {}]   ;;  %s29_s1 = inlined_call_operand.vmem [shape: f32[9,32], index: 1, kind: output, shape index: {}]  }
   0x1   :  { %v4_v0 = vld [vmem:[%s28_s0] ss:$0 sm:$0xff] }
   0x2   :  { %5 = vst [vmem:[%s29_s1] sm:$0xff] %v4_v0 }
   0x3   :  { %8 = vst [vmem:[%s29_s1 + $0x8] sm:$0xff] %v4_v0 }

// kernel: tile.54
= control target key start
LH: loop header
LB: loop body
LE: loop exit
PB: predicated region body
PF: predicated region fallthrough
CT: control target
= control target key end

     0   :  { %s6_s6 = smov 3  ;;  %s52_s9 = smov 96   ;;  %vm3_vm0 = vcmask 261120   ;;  %vm10_vm1 = vcmask 1048320   ;;  %vm17_vm2 = vcmask 785920   ;;  %vm24_vm3 = vcmask 523520   ;;  %s86_s0 = inlined_call_operand.vmem [shape: f32[9,32], index: 0, kind: input, shape index: {}]   ;;  %s87_s1 = inlined_call_operand.vmem [shape: f32[1,288], index: 1, kind: output, shape index: {}]  }
   0x1   :  { %v44_v0 = vld [vmem:[%s86_s0 + $0x3] ss:$4 sm:%s6_s6]   ;;  %s20_s10 = smov 3  ;;  %s13_s13 = smov 3 }
   0x2   :  { %8 = vrot.lane.b32.xlu0 %v44_v0, %s52_s9  ;;  %v46_v1 = vld [vmem:[%s86_s0 + $0x1] ss:$4 sm:%s20_s10]   ;;  %s53_s14 = smov 32   ;;  %s54_s17 = smov 64  }
   0x3   :  { %22 = vrot.lane.b32.xlu1 %v46_v1, %s53_s14  ;;  %v45_v2 = vld [vmem:[%s86_s0 + $0x2] ss:$4 sm:%s13_s13]   ;;  %v2_v3 = vld [vmem:[%s86_s0] ss:$4 sm:$0x7]  }
   0x4   :  { %4 = vst.msk [vmem:[#allocation0] ss:$8 sm:$0x7] %vm3_vm0, %v2_v3  }
   0xa   :  { %15 = vrot.lane.b32.xlu0 %v45_v2, %s54_s17 }
   0xb   :  { %v39_v4 = vld [vmem:[#allocation0 + $0x10] sm:$0x1] }
   0xc   :  { %48 = vst [vmem:[%s87_s1 + $0x2] sm:$0x1] %v39_v4 }
  0x74   :  { %v9_v5 = vpop.permute.xlu0 %8  }
  0x75   :  { %11 = vst.msk [vmem:[#allocation0] ss:$8 sm:$0x3] %vm10_vm1, %v9_v5   ;;  %v23_v6 = vpop.permute.xlu1 %22  }
  0x7c   :  { %v16_v7 = vpop.permute.xlu0 %15  }
  0x7d   :  { %18 = vst.msk [vmem:[#allocation0] ss:$8 sm:$0x3] %vm17_vm2, %v16_v7  }
  0x7e   :  { %25 = vst.msk [vmem:[#allocation0] ss:$8 sm:$0x3] %vm24_vm3, %v23_v6  }
  0x85   :  { %v28_v8 = vld [vmem:[#allocation0] sm:$0x1]  ;;  %v33_v9 = vld [vmem:[#allocation0 + $0x8] sm:$0x1] }
  0x86   :  { %31 = vst [vmem:[%s87_s1] sm:$0x1] %v28_v8 }
  0x87   :  { %47 = vst [vmem:[%s87_s1 + $0x1] sm:$0x1] %v33_v9 }

// kernel: generator_forward.7
= control target key start
LH: loop header
LB: loop body
LE: loop exit
PB: predicated region body
PF: predicated region fallthrough
CT: control target
= control target key end

     0   :  { %s1575_s18 = smov 0   ;;  %s2133_s0 = inlined_call_operand.vmem [shape: bf16[512,288], index: 0, kind: input, shape index: {}]   ;;  %s2134_s1 = inlined_call_operand.vmem [shape: bf16[288,128], index: 1, kind: input, shape index: {}]   ;;  %s2135_s2 = inlined_call_operand.vmem [shape: f32[1,128], index: 2, kind: input, shape index: {}]   ;;  %s2136_s3 = inlined_call_operand.vmem [shape: f32[1,288], index: 3, kind: input, shape index: {}]   ;;  %s2137_s4 = inlined_call_operand.vmem [shape: f32[1,288], index: 4, kind: input, shape index: {}]   ;;  %s2138_s5 = inlined_call_operand.vmem [shape: f32[512,128], index: 5, kind: output, shape index: {}]  }
   0x1 LB: > { %s1328_s19 = sadd.s32 4294967295, %s1543_s18   ;;  %p1332_p0 = scmp.ge.s32.totalorder %s1543_s18, 1  ;;  %s1543_s18 = sphi %s1575_s18, %s15_s18  }
   0x2   : > { %p189_p1 = scmp.lt.s32.totalorder %s1543_s18, 3 }
   0x4   : > { %p190_p2 = pnand %p1332_p0, %p189_p1 }
   0x5   : > { %s1333_s24 = sshll.u32 (!%p190_p2), %s1328_s19, 5 }
   0x6   : > { %193 = sbr.rel (%p190_p2) target bundleno = 384 (0x180), region = 40  ;;  %p219_p3 = scmp.lt.s32.totalorder (!%p190_p2), %s1333_s24, 63 }
   0xb   : > { %v1434_v0 = vld [vmem:[%s2134_s1 + $0x38] sm:$0xff]  ;;  %v1594_v2 = vld [vmem:[%s2134_s1 + $0x88] sm:$0xff]  ;;  %v1433_v3 = vld [vmem:[%s2134_s1 + $0x30] sm:$0xff]  ;;  %s2140_s24 = smov (!%p219_p3, %s1333_s24), 63  ;;  %vm892_vm0 = vcmask 261120  }
   0xc   : > { %v1589_v1 = vld [vmem:[%s2134_s1 + $0x78] sm:$0xff]  ;;  %941 = vmatpush.bf16.msra.mxu0 %v1434_v0  ;;  %1445 = vmatpush.bf16.msra.mxu3 %v1434_v0  ;;  %v1603_v4 = vld [vmem:[%s2134_s1 + $0x70] sm:$0xff]  ;;  %v1609_v5 = vld [vmem:[%s2134_s1 + $0x80] sm:$0xff]  ;;  %s1463_s10 = smul.u32 12, %s2140_s24  ;;  %s1336_s21 = sshll.u32 %s2140_s24, 3 }
   0xd   : > { %1030 = vmatpush.bf16.msra.mxu1 %v1589_v1  ;;  %1125 = vmatpush.bf16.msra.mxu2 %v1594_v2  ;;  %v392_v6 = vld [vmem:[%s2136_s3] sm:$0x7]  ;;  %v1432_v7 = vld [vmem:[%s2134_s1 + $0x28] sm:$0xff]  ;;  %v1430_v33 = vld [vmem:[%s2134_s1 + $0x18] sm:$0xff]  ;;  %s1989_s24 = scalar_lea.vmem %s2138_s5, %s1336_s21 }
   0xe   : > { %v496_v8 = vld [vmem:[%s2137_s4] sm:$0x7]  ;;  %v1627_v9 = vld [vmem:[%s2134_s1 + $0x68] sm:$0xff]  ;;  %s1633_s20 = scalar_lea.vmem %s2133_s0, %s1463_s10  ;;  %v1635_v10 = vperm.slane %v392_v6, 2  ;;  %v1660_v26 = vperm.slane %v392_v6, 0  ;;  %v1671_v36 = vperm.slane %v392_v6, 1 }
   0xf   : > { %v233_v11 = vld [vmem:[%s1633_s20 + $0x8] sm:$0xf]  ;;  %v235_v12 = vld [vmem:[%s1633_s20 + $0x14] sm:$0xf]  ;;  %v1639_v15 = vperm.slane %v496_v8, 2  ;;  %v232_v16 = vld [vmem:[%s1633_s20] sm:$0xff] }
  0x10   : > { %942 = vmatpush.bf16.msra.mxu0 %v1433_v3  ;;  %1446 = vmatpush.bf16.msra.mxu3 %v1433_v3  ;;  %v298_v13 = vunpack.c.l.bf16 %v233_v11  ;;  %v301_v14 = vunpack.c.l.bf16 %v235_v12  ;;  %v234_v17 = vld [vmem:[%s1633_s20 + $0xc] sm:$0xff]  ;;  %v1431_v18 = vld [vmem:[%s2134_s1 + $0x20] sm:$0xff]  ;;  %v296_v24 = vunpack.c.l.bf16 %v232_v16  ;;  %v297_v34 = vunpack.c.h.bf16 %v232_v16  ;;  %v1677_v39 = vld [vmem:[%s2134_s1 + $0x58] sm:$0xff] }
  0x11   : > { %1031 = vmatpush.bf16.msra.mxu1 %v1603_v4  ;;  %1126 = vmatpush.bf16.msra.mxu2 %v1609_v5  ;;  %v1647_v19 = vld [vmem:[%s1633_s20 + $0x120] sm:$0xff]  ;;  %v1650_v20 = vld [vmem:[%s1633_s20 + $0x12c] sm:$0xff]  ;;  %v299_v25 = vunpack.c.l.bf16 %v234_v17  ;;  %v300_v35 = vunpack.c.h.bf16 %v234_v17  ;;  %v1681_v44 = vperm.slane %v496_v8, 0  ;;  %v1690_v51 = vperm.slane %v496_v8, 1  ;;  %v236_v12 = vld [vmem:[%s1633_s20 + $0x18] sm:$0xff] }
  0x12   : > { %v1656_v21 = vld [vmem:[%s2134_s1 + $0x60] sm:$0xff]  ;;  %v402_v22 = vmul.f32 %v1635_v10, %v298_v13  ;;  %v405_v23 = vmul.f32 %v1635_v10, %v301_v14  ;;  %v239_v28 = vld [vmem:[%s1633_s20 + $0x2c] sm:$0xf]  ;;  %v368_v31 = vunpack.c.l.bf16 %v1647_v19  ;;  %v371_v32 = vunpack.c.l.bf16 %v1650_v20  ;;  %v1429_v48 = vld [vmem:[%s2134_s1 + $0x10] sm:$0xff] }
  0x13   : > { %v237_v27 = vld [vmem:[%s1633_s20 + $0x20] sm:$0xf]  ;;  %v307_v41 = vunpack.c.l.bf16 %v239_v28  ;;  %v400_v42 = vmul.f32 %v1660_v26, %v296_v24  ;;  %v403_v43 = vmul.f32 %v1660_v26, %v299_v25  ;;  %v401_v49 = vmul.f32 %v1671_v36, %v297_v34  ;;  %v1697_v52 = vld [vmem:[%s2134_s1 + $0x50] sm:$0xff]  ;;  %v1428_v59 = vld [vmem:[%s2134_s1 + $0x8] sm:$0xff] }
  0x14   : > { %943 = vmatpush.bf16.msra.mxu0 %v1432_v7  ;;  %1447 = vmatpush.bf16.msra.mxu3 %v1432_v7  ;;  %v506_v29 = vadd.f32 %v1639_v15, %v402_v22  ;;  %v509_v30 = vadd.f32 %v1639_v15, %v405_v23  ;;  %v304_v40 = vunpack.c.l.bf16 %v237_v27  ;;  %v472_v46 = vmul.f32 %v1660_v26, %v368_v31  ;;  %v1714_v62 = vld [vmem:[%s2134_s1 + $0x48] sm:$0xff]  ;;  %v1427_v7 = vld [vmem:[%s2134_s1] sm:$0xff]  ;;  %v1724_v17 = vld [vmem:[%s1633_s20 + $0x138] sm:$0xff] }
  0x15   : > { %1032 = vmatpush.bf16.msra.mxu1 %v1627_v9  ;;  %v475_v47 = vmul.f32 %v1660_v26, %v371_v32  ;;  %v404_v50 = vmul.f32 %v1671_v36, %v300_v35  ;;  %v411_v54 = vmul.f32 %v1635_v10, %v307_v41  ;;  %v504_v55 = vadd.f32 %v1681_v44, %v400_v42  ;;  %v238_v16 = vld [vmem:[%s1633_s20 + $0x24] sm:$0xff]  ;;  %v241_v28 = vld [vmem:[%s1633_s20 + $0x38] sm:$0xf] }
  0x16   : > { %v602_v37 = vmax.f32 %v506_v29, 0.0  ;;  %v605_v38 = vmax.f32 %v509_v30, 0.0  ;;  %v408_v53 = vmul.f32 %v1635_v10, %v304_v40  ;;  %v507_v56 = vadd.f32 %v1681_v44, %v403_v43  ;;  %v1733_v22 = vld [vmem:[%s2134_s1 + $0x40] sm:$0xff] }
  0x17   : > { %v576_v57 = vadd.f32 %v1681_v44, %v472_v46  ;;  %v579_v58 = vadd.f32 %v1681_v44, %v475_v47  ;;  %v505_v60 = vadd.f32 %v1690_v51, %v401_v49  ;;  %v508_v61 = vadd.f32 %v1690_v51, %v404_v50  ;;  %v243_v29 = vld [vmem:[%s1633_s20 + $0x44] sm:$0xf] }
  0x18   : > { %944 = vmatpush.bf16.msra.mxu0 %v1431_v18  ;;  %1448 = vmatpush.bf16.msra.mxu3 %v1431_v18  ;;  %v698_v45 = vpack.c.bf16 %v605_v38, %v602_v37  ;;  %v512_v63 = vadd.f32 %v1639_v15, %v408_v53  ;;  %v515_v0 = vadd.f32 %v1639_v15, %v411_v54  ;;  %v600_v3 = vmax.f32 %v504_v55, 0.0  ;;  %v1727_v18 = vld [vmem:[%s1633_s20 + $0x144] sm:$0xff] }
  0x19   : > { %1033 = vmatpush.bf16.msra.mxu1 %v1656_v21  ;;  %v603_v6 = vmax.f32 %v507_v56, 0.0  ;;  %v672_v8 = vmax.f32 %v576_v57, 0.0  ;;  %v675_v11 = vmax.f32 %v579_v58, 0.0  ;;  %v601_v13 = vmax.f32 %v505_v60, 0.0 }
  0x1a   : > { %1409 = vmatmul.msk.bf16.vlgmr.msra.gmra.mxu2 %vm892_vm0, %v698_v45  ;;  %v604_v14 = vmax.f32 %v508_v61, 0.0  ;;  %v608_v23 = vmax.f32 %v512_v63, 0.0  ;;  %v611_v24 = vmax.f32 %v515_v0, 0.0  ;;  %v302_v27 = vunpack.c.l.bf16 %v236_v12  ;;  %v240_v0 = vld [vmem:[%s1633_s20 + $0x30] sm:$0xff] }
  0x1b   : > { %v696_v25 = vpack.c.bf16 %v603_v6, %v600_v3  ;;  %v732_v30 = vpack.c.bf16 %v675_v11, %v672_v8  ;;  %v305_v31 = vunpack.c.l.bf16 %v238_v16  ;;  %v374_v32 = vunpack.c.l.bf16 %v1724_v17  ;;  %v242_v3 = vld [vmem:[%s1633_s20 + $0x3c] sm:$0xff]  ;;  %v1763_v8 = vld [vmem:[%s1633_s20 + $0x150] sm:$0xff] }
  0x1c   : > { %945 = vmatpush.bf16.msra.mxu0 %v1430_v33  ;;  %1449 = vmatpush.bf16.msra.mxu3 %v1430_v33  ;;  %v377_v33 = vunpack.c.l.bf16 %v1727_v18  ;;  %v697_v34 = vpack.c.bf16 %v604_v14, %v601_v13  ;;  %v303_v35 = vunpack.c.h.bf16 %v236_v12  ;;  %v306_v37 = vunpack.c.h.bf16 %v238_v16  ;;  %v1766_v11 = vld [vmem:[%s1633_s20 + $0x15c] sm:$0xff]  ;;  %v245_v16 = vld [vmem:[%s1633_s20 + $0x50] sm:$0xf] }
  0x1d   : > { %1034 = vmatpush.bf16.msra.mxu1 %v1677_v39  ;;  %v701_v38 = vpack.c.bf16 %v611_v24, %v608_v23  ;;  %v310_v40 = vunpack.c.l.bf16 %v241_v28  ;;  %v313_v41 = vunpack.c.l.bf16 %v243_v29  ;;  %v406_v42 = vmul.f32 %v1660_v26, %v302_v27  ;;  %v247_v23 = vld [vmem:[%s1633_s20 + $0x5c] sm:$0xf] }
  0x1e   : > { %v409_v43 = vmul.f32 %v1660_v26, %v305_v31  ;;  %v478_v45 = vmul.f32 %v1660_v26, %v374_v32  ;;  %v481_v46 = vmul.f32 %v1660_v26, %v377_v33  ;;  %v407_v47 = vmul.f32 %v1671_v36, %v303_v35 }
  0x1f   : > { %v414_v49 = vmul.f32 %v1635_v10, %v310_v40  ;;  %v510_v50 = vadd.f32 %v1681_v44, %v406_v42  ;;  %v308_v14 = vunpack.c.l.bf16 %v240_v0  ;;  %v380_v27 = vunpack.c.l.bf16 %v1763_v8 }
  0x20   : > { %946 = vmatpush.bf16.msra.mxu0 %v1429_v48  ;;  %1450 = vmatpush.bf16.msra.mxu3 %v1429_v48  ;;  %v410_v48 = vmul.f32 %v1671_v36, %v306_v37  ;;  %v513_v53 = vadd.f32 %v1681_v44, %v409_v43  ;;  %v582_v54 = vadd.f32 %v1681_v44, %v478_v45  ;;  %v383_v28 = vunpack.c.l.bf16 %v1766_v11 }
  0x21   : > { %1035 = vmatpush.bf16.msra.mxu1 %v1697_v52  ;;  %v585_v55 = vadd.f32 %v1681_v44, %v481_v46  ;;  %v511_v56 = vadd.f32 %v1690_v51, %v407_v47  ;;  %v518_v58 = vadd.f32 %v1639_v15, %v414_v49  ;;  %v312_v31 = vunpack.c.h.bf16 %v242_v3 }
  0x22   : > { %v514_v57 = vadd.f32 %v1690_v51, %v410_v48  ;;  %v609_v60 = vmax.f32 %v513_v53, 0.0  ;;  %v678_v61 = vmax.f32 %v582_v54, 0.0  ;;  %v316_v33 = vunpack.c.l.bf16 %v245_v16  ;;  %v251_v16 = vld [vmem:[%s1633_s20 + $0x74] sm:$0xf] }
  0x23   : > { %v681_v63 = vmax.f32 %v585_v55, 0.0  ;;  %v607_v6 = vmax.f32 %v511_v56, 0.0  ;;  %v614_v12 = vmax.f32 %v518_v58, 0.0  ;;  %v484_v37 = vmul.f32 %v1660_v26, %v380_v27  ;;  %v1798_v58 = vld [vmem:[%s1633_s20 + $0x168] sm:$0xff] }
  0x24   : > { %947 = vmatpush.bf16.msra.mxu0 %v1428_v59  ;;  %1451 = vmatpush.bf16.msra.mxu3 %v1428_v59  ;;  %v420_v42 = vmul.f32 %v1635_v10, %v316_v33  ;;  %v369_v46 = vunpack.c.h.bf16 %v1647_v19  ;;  %v372_v47 = vunpack.c.h.bf16 %v1650_v20  ;;  %v244_v19 = vld [vmem:[%s1633_s20 + $0x48] sm:$0xff]  ;;  %v246_v20 = vld [vmem:[%s1633_s20 + $0x54] sm:$0xff] }
  0x25   : > { %1036 = vmatpush.bf16.msra.mxu1 %v1714_v62  ;;  %v588_v48 = vadd.f32 %v1681_v44, %v484_v37 }
  0x27   : > { %v684_v56 = vmax.f32 %v588_v48, 0.0 }
  0x28   : > { %948 = vmatpush.bf16.msra.mxu0 %v1427_v7  ;;  %1452 = vmatpush.bf16.msra.mxu3 %v1427_v7  ;;  %v610_v7 = vmax.f32 %v514_v57, 0.0 }
  0x29   : > { %1037 = vmatpush.bf16.msra.mxu1 %v1733_v22 }
  0x2a   : > { %1410 = vmatmul.msk.bf16.gmra.mxu2 %vm892_vm0, %v701_v38  ;;  %v700_v29 = vpack.c.bf16 %v610_v7, %v607_v6  ;;  %v487_v38 = vmul.f32 %v1660_v26, %v383_v28  ;;  %v314_v7 = vunpack.c.l.bf16 %v244_v19 }
  0x2b   : > { %949 = vmatmul.bf16.vlgmr.msra.gmra.mxu0 %v696_v25  ;;  %1009 = vmatmul.bf16.vlgmr.msra.gmra.mxu3 %v732_v30  ;;  %v735_v25 = vpack.c.bf16 %v681_v63, %v678_v61  ;;  %v309_v30 = vunpack.c.h.bf16 %v240_v0 }
  0x2c   : > { %1453 = vmatpush.bf16.msrb.mxu3 %v1589_v1  ;;  %1038 = vmatmul.bf16.vlgmr.msra.gmra.mxu1 %v697_v34  ;;  %v417_v1 = vmul.f32 %v1635_v10, %v313_v41  ;;  %v319_v34 = vunpack.c.l.bf16 %v247_v23  ;;  %v416_v41 = vmul.f32 %v1671_v36, %v312_v31  ;;  %v591_v49 = vadd.f32 %v1681_v44, %v487_v38 }
  0x2d   : > { %v413_v40 = vmul.f32 %v1671_v36, %v309_v30 }
  0x2e   : > { %v521_v59 = vadd.f32 %v1639_v15, %v417_v1  ;;  %v687_v57 = vmax.f32 %v591_v49, 0.0  ;;  %v375_v49 = vunpack.c.h.bf16 %v1724_v17 }
  0x2f   : > { %v517_v1 = vadd.f32 %v1690_v51, %v413_v40 }
  0x30   : > { %1454 = vmatpush.bf16.msrb.mxu3 %v1603_v4  ;;  %v606_v4 = vmax.f32 %v510_v50, 0.0  ;;  %v617_v13 = vmax.f32 %v521_v59, 0.0  ;;  %v520_v50 = vadd.f32 %v1690_v51, %v416_v41  ;;  %v1801_v59 = vld [vmem:[%s1633_s20 + $0x174] sm:$0xff] }
  0x31   : > { %v613_v61 = vmax.f32 %v517_v1, 0.0  ;;  %v378_v1 = vunpack.c.h.bf16 %v1727_v18 }
  0x32   : > { %v699_v24 = vpack.c.bf16 %v609_v60, %v606_v4  ;;  %v704_v32 = vpack.c.bf16 %v617_v13, %v614_v12  ;;  %v473_v4 = vmul.f32 %v1671_v36, %v369_v46  ;;  %v476_v60 = vmul.f32 %v1671_v36, %v372_v47 }
  0x33   : > { %v616_v63 = vmax.f32 %v520_v50, 0.0  ;;  %v317_v12 = vunpack.c.l.bf16 %v246_v20  ;;  %v386_v13 = vunpack.c.l.bf16 %v1798_v58 }
  0x34   : > { %1455 = vmatpush.bf16.msrb.mxu3 %v1627_v9  ;;  %v311_v9 = vunpack.c.l.bf16 %v242_v3  ;;  %v577_v3 = vadd.f32 %v1690_v51, %v473_v4  ;;  %v580_v6 = vadd.f32 %v1690_v51, %v476_v60  ;;  %v250_v4 = vld [vmem:[%s1633_s20 + $0x6c] sm:$0xff] }
  0x35   : > { %v703_v28 = vpack.c.bf16 %v616_v63, %v613_v61 }
  0x36   : > { %v415_v35 = vmul.f32 %v1660_v26, %v311_v9  ;;  %v249_v9 = vld [vmem:[%s1633_s20 + $0x68] sm:$0xf]  ;;  %v676_v27 = vmax.f32 %v580_v6, 0.0 }
  0x37   : > { %v322_v31 = vunpack.c.l.bf16 %v249_v9 }
  0x38   : > { %1456 = vmatpush.bf16.msrb.mxu3 %v1656_v21  ;;  %v412_v21 = vmul.f32 %v1660_v26, %v308_v14  ;;  %v519_v45 = vadd.f32 %v1681_v44, %v415_v35  ;;  %v389_v14 = vunpack.c.l.bf16 %v1801_v59  ;;  %v490_v35 = vmul.f32 %v1660_v26, %v386_v13 }
  0x39   : > { %v426_v40 = vmul.f32 %v1635_v10, %v322_v31 }
  0x3a   : > { %1411 = vmatmul.msk.bf16.gmra.mxu2 %vm892_vm0, %v704_v32  ;;  %v516_v43 = vadd.f32 %v1681_v44, %v412_v21  ;;  %v615_v55 = vmax.f32 %v519_v45, 0.0  ;;  %v325_v32 = vunpack.c.l.bf16 %v251_v16  ;;  %v421_v21 = vmul.f32 %v1660_v26, %v317_v12 }
  0x3b   : > { %954 = vmatmul.bf16.gmra.mxu0 %v699_v24  ;;  %1014 = vmatmul.bf16.gmra.mxu3 %v735_v25  ;;  %v738_v24 = vpack.c.bf16 %v687_v57, %v684_v56  ;;  %v673_v25 = vmax.f32 %v577_v3, 0.0  ;;  %v530_v47 = vadd.f32 %v1639_v15, %v426_v40  ;;  %v255_v3 = vld [vmem:[%s1633_s20 + $0x8c] sm:$0xf]  ;;  %v324_v16 = vunpack.c.h.bf16 %v250_v4 }
  0x3c   : > { %1457 = vmatpush.bf16.msrb.mxu3 %v1677_v39  ;;  %1043 = vmatmul.bf16.gmra.mxu1 %v700_v29  ;;  %v423_v39 = vmul.f32 %v1635_v10, %v319_v34  ;;  %v612_v54 = vmax.f32 %v516_v43, 0.0  ;;  %v318_v29 = vunpack.c.h.bf16 %v246_v20  ;;  %v418_v34 = vmul.f32 %v1660_v26, %v314_v7  ;;  %v248_v20 = vld [vmem:[%s1633_s20 + $0x60] sm:$0xff] }
  0x3d   : > { %v1813_v33 = vpack.c.bf16 %v676_v27, %v673_v25  ;;  %v429_v41 = vmul.f32 %v1635_v10, %v325_v32  ;;  %v594_v43 = vadd.f32 %v1681_v44, %v490_v35  ;;  %v626_v60 = vmax.f32 %v530_v47, 0.0 }
  0x3e   : > { %v527_v53 = vadd.f32 %v1639_v15, %v423_v39  ;;  %v702_v23 = vpack.c.bf16 %v615_v55, %v612_v54  ;;  %v422_v38 = vmul.f32 %v1671_v36, %v318_v29  ;;  %v525_v39 = vadd.f32 %v1681_v44, %v421_v21 }
  0x3f   : > { %v533_v48 = vadd.f32 %v1639_v15, %v429_v41  ;;  %v479_v55 = vmul.f32 %v1671_v36, %v375_v49  ;;  %v320_v6 = vunpack.c.l.bf16 %v248_v20  ;;  %v323_v7 = vunpack.c.l.bf16 %v250_v4 }
  0x40   : > { %1458 = vmatpush.bf16.msrb.mxu3 %v1697_v52  ;;  %v524_v52 = vadd.f32 %v1639_v15, %v420_v42  ;;  %v522_v42 = vadd.f32 %v1681_v44, %v418_v34  ;;  %v526_v46 = vadd.f32 %v1690_v51, %v422_v38  ;;  %v321_v9 = vunpack.c.h.bf16 %v248_v20 }
  0x41   : > { %v629_v61 = vmax.f32 %v533_v48, 0.0  ;;  %v583_v17 = vadd.f32 %v1690_v51, %v479_v55  ;;  %v331_v25 = vunpack.c.l.bf16 %v255_v3  ;;  %v381_v40 = vunpack.c.h.bf16 %v1763_v8 }
  0x42   : > { %v620_v0 = vmax.f32 %v524_v52, 0.0  ;;  %v618_v50 = vmax.f32 %v522_v42, 0.0  ;;  %v621_v52 = vmax.f32 %v525_v39, 0.0  ;;  %v622_v57 = vmax.f32 %v526_v46, 0.0 }
  0x43   : > { %v679_v12 = vmax.f32 %v583_v17, 0.0  ;;  %v425_v29 = vmul.f32 %v1671_v36, %v321_v9  ;;  %v435_v32 = vmul.f32 %v1635_v10, %v331_v25  ;;  %v384_v41 = vunpack.c.h.bf16 %v1766_v11  ;;  %v257_v11 = vld [vmem:[%s1633_s20 + $0x98] sm:$0xf] }
  0x44   : > { %1459 = vmatpush.bf16.msrb.mxu3 %v1714_v62  ;;  %v623_v62 = vmax.f32 %v527_v53, 0.0  ;;  %v690_v53 = vmax.f32 %v594_v43, 0.0  ;;  %v705_v63 = vpack.c.bf16 %v621_v52, %v618_v50  ;;  %v252_v43 = vld [vmem:[%s1633_s20 + $0x78] sm:$0xff] }
  0x45   : > { %v529_v35 = vadd.f32 %v1690_v51, %v425_v29  ;;  %v539_v38 = vadd.f32 %v1639_v15, %v435_v32  ;;  %v488_v46 = vmul.f32 %v1671_v36, %v384_v41  ;;  %v326_v52 = vunpack.c.l.bf16 %v252_v43  ;;  %v256_v32 = vld [vmem:[%s1633_s20 + $0x90] sm:$0xff] }
  0x46   : > { %v707_v30 = vpack.c.bf16 %v623_v62, %v620_v0  ;;  %v253_v62 = vld [vmem:[%s1633_s20 + $0x80] sm:$0xf]  ;;  %v327_v20 = vunpack.c.h.bf16 %v252_v43 }
  0x47   : > { %v625_v47 = vmax.f32 %v529_v35, 0.0  ;;  %v592_v8 = vadd.f32 %v1690_v51, %v488_v46 }
  0x48   : > { %1460 = vmatpush.bf16.msrb.mxu3 %v1733_v22  ;;  %v315_v22 = vunpack.c.h.bf16 %v244_v19  ;;  %v482_v19 = vmul.f32 %v1671_v36, %v378_v1  ;;  %v635_v1 = vmax.f32 %v539_v38, 0.0  ;;  %v261_v38 = vld [vmem:[%s1633_s20 + $0xb0] sm:$0xf] }
  0x4a   : > { %v419_v37 = vmul.f32 %v1671_v36, %v315_v22  ;;  %1412 = vmatmul.msk.bf16.gmra.mxu2 %vm892_vm0, %v707_v30  ;;  %v586_v18 = vadd.f32 %v1690_v51, %v482_v19  ;;  %v427_v22 = vmul.f32 %v1660_v26, %v323_v7  ;;  %v428_v30 = vmul.f32 %v1671_v36, %v324_v16 }
  0x4b   : > { %959 = vmatmul.bf16.gmra.mxu0 %v702_v23  ;;  %1019 = vmatmul.bf16.gmra.mxu3 %v738_v24  ;;  %v710_v23 = vpack.c.bf16 %v629_v61, %v626_v60  ;;  %v328_v24 = vunpack.c.l.bf16 %v253_v62  ;;  %v334_v61 = vunpack.c.l.bf16 %v257_v11  ;;  %v431_v62 = vmul.f32 %v1671_v36, %v327_v20 }
  0x4c   : > { %1461 = vmatpush.bf16.msra.mxu3 %v1594_v2  ;;  %v493_v2 = vmul.f32 %v1660_v26, %v389_v14  ;;  %1048 = vmatmul.bf16.gmra.mxu1 %v703_v28  ;;  %v523_v45 = vadd.f32 %v1690_v51, %v419_v37  ;;  %v682_v13 = vmax.f32 %v586_v18, 0.0  ;;  %v424_v28 = vmul.f32 %v1660_v26, %v320_v6 }
  0x4d   : > { %v432_v31 = vmul.f32 %v1635_v10, %v328_v24  ;;  %v531_v21 = vadd.f32 %v1681_v44, %v427_v22  ;;  %v438_v6 = vmul.f32 %v1635_v10, %v334_v61  ;;  %v390_v24 = vunpack.c.h.bf16 %v1801_v59 }
  0x4e   : > { %v619_v56 = vmax.f32 %v523_v45, 0.0  ;;  %v1843_v27 = vpack.c.bf16 %v682_v13, %v679_v12  ;;  %v528_v34 = vadd.f32 %v1681_v44, %v424_v28  ;;  %v485_v45 = vmul.f32 %v1671_v36, %v381_v40  ;;  %v263_v40 = vld [vmem:[%s1633_s20 + $0xbc] sm:$0xf] }
  0x4f   : > { %v536_v37 = vadd.f32 %v1639_v15, %v432_v31  ;;  %v627_v39 = vmax.f32 %v531_v21, 0.0  ;;  %v542_v9 = vadd.f32 %v1639_v15, %v438_v6  ;;  %v494_v29 = vmul.f32 %v1671_v36, %v390_v24  ;;  %v267_v6 = vld [vmem:[%s1633_s20 + $0xd4] sm:$0xf] }
  0x50   : > { %1462 = vmatpush.bf16.msra.mxu3 %v1609_v5  ;;  %v597_v5 = vadd.f32 %v1681_v44, %v493_v2  ;;  %v706_v14 = vpack.c.bf16 %v622_v57, %v619_v56  ;;  %v532_v2 = vadd.f32 %v1690_v51, %v428_v30  ;;  %v624_v42 = vmax.f32 %v528_v34, 0.0  ;;  %v258_v34 = vld [vmem:[%s1633_s20 + $0x9c] sm:$0xff] }
  0x51   : > { %v632_v49 = vmax.f32 %v536_v37, 0.0  ;;  %v589_v50 = vadd.f32 %v1690_v51, %v485_v45  ;;  %v688_v56 = vmax.f32 %v592_v8, 0.0  ;;  %v638_v21 = vmax.f32 %v542_v9, 0.0 }
  0x52   : > { %v693_v54 = vmax.f32 %v597_v5, 0.0  ;;  %v254_v5 = vld [vmem:[%s1633_s20 + $0x84] sm:$0xff]  ;;  %v628_v48 = vmax.f32 %v532_v2, 0.0  ;;  %v708_v55 = vpack.c.bf16 %v627_v39, %v624_v42  ;;  %v598_v37 = vadd.f32 %v1690_v51, %v494_v29 }
  0x53   : > { %v685_v19 = vmax.f32 %v589_v50, 0.0  ;;  %v330_v4 = vunpack.c.h.bf16 %v254_v5  ;;  %v713_v60 = vpack.c.bf16 %v635_v1, %v632_v49  ;;  %v332_v59 = vunpack.c.l.bf16 %v256_v32 }
  0x54   : > { %v741_v0 = vpack.c.bf16 %v693_v54, %v690_v53  ;;  %v329_v53 = vunpack.c.l.bf16 %v254_v5  ;;  %v259_v54 = vld [vmem:[%s1633_s20 + $0xa4] sm:$0xf]  ;;  %v709_v57 = vpack.c.bf16 %v628_v48, %v625_v47  ;;  %v335_v41 = vunpack.c.l.bf16 %v258_v34 }
  0x55   : > { %v337_v17 = vunpack.c.l.bf16 %v259_v54  ;;  %v1868_v18 = vpack.c.bf16 %v688_v56, %v685_v19  ;;  %v434_v3 = vmul.f32 %v1671_v36, %v330_v4  ;;  %v694_v39 = vmax.f32 %v598_v37, 0.0 }
  0x56   : > { %v333_v5 = vunpack.c.h.bf16 %v256_v32  ;;  %v336_v45 = vunpack.c.h.bf16 %v258_v34  ;;  %v340_v47 = vunpack.c.l.bf16 %v261_v38  ;;  %v343_v48 = vunpack.c.l.bf16 %v263_v40  ;;  %v264_v40 = vld [vmem:[%s1633_s20 + $0xc0] sm:$0xff] }
  0x57   : > { %v441_v7 = vmul.f32 %v1635_v10, %v337_v17  ;;  %v436_v1 = vmul.f32 %v1660_v26, %v332_v59  ;;  %v439_v50 = vmul.f32 %v1660_v26, %v335_v41  ;;  %v260_v17 = vld [vmem:[%s1633_s20 + $0xa8] sm:$0xff]  ;;  %v349_v24 = vunpack.c.l.bf16 %v267_v6 }
  0x58   : > { %v437_v8 = vmul.f32 %v1671_v36, %v333_v5  ;;  %v447_v11 = vmul.f32 %v1635_v10, %v343_v48  ;;  %v266_v41 = vld [vmem:[%s1633_s20 + $0xcc] sm:$0xff] }
  0x59   : > { %v545_v16 = vadd.f32 %v1639_v15, %v441_v7  ;;  %v543_v54 = vadd.f32 %v1681_v44, %v439_v50 }
  0x5a   : > { %1413 = vmatmul.msk.bf16.gmra.mxu2 %vm892_vm0, %v710_v23  ;;  %v387_v23 = vunpack.c.h.bf16 %v1798_v58 }
  0x5b   : > { %964 = vmatmul.bf16.gmra.mxu0 %v705_v63  ;;  %1024 = vmatmul.bf16.gmra.mxu3 %v741_v0  ;;  %v430_v63 = vmul.f32 %v1660_v26, %v326_v52  ;;  %v433_v0 = vmul.f32 %v1660_v26, %v329_v53  ;;  %v641_v35 = vmax.f32 %v545_v16, 0.0  ;;  %v440_v52 = vmul.f32 %v1671_v36, %v336_v45 }
  0x5c   : > { %1053 = vmatmul.bf16.gmra.mxu1 %v706_v14  ;;  %v535_v14 = vadd.f32 %v1690_v51, %v431_v62  ;;  %v491_v22 = vmul.f32 %v1671_v36, %v387_v23  ;;  %v444_v53 = vmul.f32 %v1635_v10, %v340_v47  ;;  %v639_v4 = vmax.f32 %v543_v54, 0.0  ;;  %v271_v47 = vld [vmem:[%s1633_s20 + $0xec] sm:$0xf] }
  0x5d   : > { %v534_v12 = vadd.f32 %v1681_v44, %v430_v63  ;;  %v537_v13 = vadd.f32 %v1681_v44, %v433_v0  ;;  %v716_v46 = vpack.c.bf16 %v641_v35, %v638_v21  ;;  %v544_v19 = vadd.f32 %v1690_v51, %v440_v52  ;;  %v262_v63 = vld [vmem:[%s1633_s20 + $0xb4] sm:$0xff] }
  0x5e   : > { %v631_v30 = vmax.f32 %v535_v14, 0.0  ;;  %v595_v2 = vadd.f32 %v1690_v51, %v491_v22  ;;  %v548_v56 = vadd.f32 %v1639_v15, %v444_v53  ;;  %v339_v14 = vunpack.c.h.bf16 %v260_v17 }
  0x5f   : > { %v630_v25 = vmax.f32 %v534_v12, 0.0  ;;  %v633_v28 = vmax.f32 %v537_v13, 0.0  ;;  %v640_v61 = vmax.f32 %v544_v19, 0.0  ;;  %v338_v12 = vunpack.c.l.bf16 %v260_v17 }
  0x60   : > { %v691_v42 = vmax.f32 %v595_v2, 0.0  ;;  %v644_v0 = vmax.f32 %v548_v56, 0.0  ;;  %v341_v13 = vunpack.c.l.bf16 %v262_v63  ;;  %v342_v9 = vunpack.c.h.bf16 %v262_v63 }
  0x61   : > { %v711_v58 = vpack.c.bf16 %v633_v28, %v630_v25  ;;  %v442_v25 = vmul.f32 %v1660_v26, %v338_v12  ;;  %v443_v22 = vmul.f32 %v1671_v36, %v339_v14  ;;  %v344_v45 = vunpack.c.l.bf16 %v264_v40 }
  0x62   : > { %v1894_v49 = vpack.c.bf16 %v694_v39, %v691_v42  ;;  %v445_v28 = vmul.f32 %v1660_v26, %v341_v13  ;;  %v446_v29 = vmul.f32 %v1671_v36, %v342_v9  ;;  %v289_v42 = vld [vmem:[%s1633_s20 + $0x158] sm:$0xf]  ;;  %v291_v39 = vld [vmem:[%s1633_s20 + $0x164] sm:$0xf]  ;;  %v345_v53 = vunpack.c.h.bf16 %v264_v40 }
  0x63   : > { %v547_v34 = vadd.f32 %v1690_v51, %v443_v22  ;;  %v382_v50 = vunpack.c.l.bf16 %v289_v42  ;;  %v448_v19 = vmul.f32 %v1660_v26, %v344_v45  ;;  %v293_v22 = vld [vmem:[%s1633_s20 + $0x170] sm:$0xf] }
  0x64   : > { %v549_v32 = vadd.f32 %v1681_v44, %v445_v28  ;;  %v550_v21 = vadd.f32 %v1690_v51, %v446_v29  ;;  %v295_v29 = vld [vmem:[%s1633_s20 + $0x17c] sm:$0xf] }
  0x65   : > { %v643_v38 = vmax.f32 %v547_v34, 0.0 }
  0x66   : > { %v646_v59 = vmax.f32 %v550_v21, 0.0  ;;  %v273_v21 = vld [vmem:[%s1633_s20 + $0xf8] sm:$0xf] }
  0x68   : > { %v718_v52 = vpack.c.bf16 %v646_v59, %v643_v38  ;;  %v391_v38 = vunpack.c.l.bf16 %v295_v29 }
  0x6a   : > { %1414 = vmatmul.msk.bf16.gmra.mxu2 %vm892_vm0, %v713_v60 }
  0x6b   : > { %969 = vmatmul.bf16.gmra.mxu0 %v708_v55  ;;  %1098 = vmatmul.bf16.vlgmr.msrb.gmra.mxu3 %v1813_v33  ;;  %v538_v33 = vadd.f32 %v1690_v51, %v434_v3  ;;  %v541_v55 = vadd.f32 %v1690_v51, %v437_v8  ;;  %v265_v3 = vld [vmem:[%s1633_s20 + $0xc8] sm:$0xf]  ;;  %v385_v8 = vunpack.c.l.bf16 %v291_v39 }
  0x6c   : > { %1058 = vmatmul.bf16.gmra.mxu1 %v709_v57  ;;  %v551_v57 = vadd.f32 %v1639_v15, %v447_v11  ;;  %v346_v23 = vunpack.c.l.bf16 %v265_v3  ;;  %v348_v11 = vunpack.c.h.bf16 %v266_v41 }
  0x6d   : > { %v634_v31 = vmax.f32 %v538_v33, 0.0  ;;  %v637_v60 = vmax.f32 %v541_v55, 0.0  ;;  %v355_v55 = vunpack.c.l.bf16 %v271_v47 }
  0x6e   : > { %v647_v62 = vmax.f32 %v551_v57, 0.0  ;;  %v486_v57 = vmul.f32 %v1635_v10, %v382_v50 }
  0x6f   : > { %v712_v43 = vpack.c.bf16 %v634_v31, %v631_v30  ;;  %v715_v33 = vpack.c.bf16 %v640_v61, %v637_v60  ;;  %v450_v30 = vmul.f32 %v1635_v10, %v346_v23  ;;  %v453_v31 = vmul.f32 %v1635_v10, %v349_v24  ;;  %v268_v23 = vld [vmem:[%s1633_s20 + $0xd8] sm:$0xff]  ;;  %v270_v24 = vld [vmem:[%s1633_s20 + $0xe4] sm:$0xff] }
  0x70   : > { %v719_v16 = vpack.c.bf16 %v647_v62, %v644_v0  ;;  %v452_v60 = vmul.f32 %v1671_v36, %v348_v11  ;;  %v459_v17 = vmul.f32 %v1635_v10, %v355_v55  ;;  %v590_v0 = vadd.f32 %v1639_v15, %v486_v57 }
  0x71   : > { %v554_v35 = vadd.f32 %v1639_v15, %v450_v30  ;;  %v557_v2 = vadd.f32 %v1639_v15, %v453_v31  ;;  %v1959_v30 = vld [vmem:[%s2135_s2] ss:$0 sm:$0xff]  ;;  %v353_v34 = vunpack.c.l.bf16 %v270_v24  ;;  %v351_v42 = vunpack.c.h.bf16 %v268_v23 }
  0x72   : > { %v563_v13 = vadd.f32 %v1639_v15, %v459_v17  ;;  %v686_v9 = vmax.f32 %v590_v0, 0.0  ;;  %v354_v39 = vunpack.c.h.bf16 %v270_v24 }
  0x73   : > { %v653_v5 = vmax.f32 %v557_v2, 0.0 }
  0x74   : > { %v458_v11 = vmul.f32 %v1671_v36, %v354_v39 }
  0x7a   : > { %1415 = vmatmul.msk.bf16.gmra.mxu2 %vm892_vm0, %v716_v46  ;;  %v269_v46 = vld [vmem:[%s1633_s20 + $0xe0] sm:$0xf] }
  0x7b   : > { %974 = vmatmul.bf16.gmra.mxu0 %v711_v58  ;;  %1103 = vmatmul.bf16.gmra.mxu3 %v1843_v27  ;;  %v540_v27 = vadd.f32 %v1681_v44, %v436_v1  ;;  %v645_v58 = vmax.f32 %v549_v32, 0.0  ;;  %v347_v1 = vunpack.c.l.bf16 %v266_v41  ;;  %v352_v54 = vunpack.c.l.bf16 %v269_v46 }
  0x7c   : > { %1063 = vmatmul.bf16.gmra.mxu1 %v712_v43  ;;  %v650_v43 = vmax.f32 %v554_v35, 0.0  ;;  %v350_v32 = vunpack.c.l.bf16 %v268_v23  ;;  %v275_v35 = vld [vmem:[%s1633_s20 + $0x104] sm:$0xf]  ;;  %v358_v46 = vunpack.c.l.bf16 %v273_v21  ;;  %v274_v23 = vld [vmem:[%s1633_s20 + $0xfc] sm:$0xff] }
  0x7d   : > { %v636_v20 = vmax.f32 %v540_v27, 0.0  ;;  %v451_v56 = vmul.f32 %v1660_v26, %v347_v1  ;;  %v456_v61 = vmul.f32 %v1635_v10, %v352_v54  ;;  %v361_v47 = vunpack.c.l.bf16 %v275_v35 }
  0x7e   : > { %v722_v27 = vpack.c.bf16 %v653_v5, %v650_v43  ;;  %v457_v1 = vmul.f32 %v1660_v26, %v353_v34  ;;  %v462_v54 = vmul.f32 %v1635_v10, %v358_v46  ;;  %v359_v35 = vunpack.c.l.bf16 %v274_v23 }
  0x7f   : > { %v714_v7 = vpack.c.bf16 %v639_v4, %v636_v20  ;;  %v489_v20 = vmul.f32 %v1635_v10, %v385_v8  ;;  %v449_v4 = vmul.f32 %v1671_v36, %v345_v53  ;;  %v555_v63 = vadd.f32 %v1681_v44, %v451_v56 }
  0x80   : > { %v560_v12 = vadd.f32 %v1639_v15, %v456_v61  ;;  %v455_v53 = vmul.f32 %v1671_v36, %v351_v42  ;;  %v465_v55 = vmul.f32 %v1635_v10, %v361_v47  ;;  %v561_v57 = vadd.f32 %v1681_v44, %v457_v1 }
  0x81   : > { %v593_v62 = vadd.f32 %v1639_v15, %v489_v20  ;;  %v553_v6 = vadd.f32 %v1690_v51, %v449_v4  ;;  %v463_v46 = vmul.f32 %v1660_v26, %v359_v35 }
  0x82   : > { %v656_v31 = vmax.f32 %v560_v12, 0.0  ;;  %v559_v17 = vadd.f32 %v1690_v51, %v455_v53 }
  0x8a   : > { %1416 = vmatmul.msk.bf16.gmra.mxu2 %vm892_vm0, %v719_v16  ;;  %v689_v16 = vmax.f32 %v593_v62, 0.0  ;;  %v566_v62 = vadd.f32 %v1639_v15, %v462_v54 }
  0x8b   : > { %979 = vmatmul.bf16.gmra.mxu0 %v714_v7  ;;  %1108 = vmatmul.bf16.gmra.mxu3 %v1868_v18  ;;  %v546_v18 = vadd.f32 %v1681_v44, %v442_v25  ;;  %v556_v7 = vadd.f32 %v1690_v51, %v452_v60  ;;  %v649_v25 = vmax.f32 %v553_v6, 0.0 }
  0x8c   : > { %1068 = vmatmul.bf16.gmra.mxu1 %v715_v33  ;;  %v651_v33 = vmax.f32 %v555_v63, 0.0 }
  0x8d   : > { %v642_v37 = vmax.f32 %v546_v18, 0.0  ;;  %v652_v28 = vmax.f32 %v556_v7, 0.0  ;;  %v659_v18 = vmax.f32 %v563_v13, 0.0  ;;  %v657_v7 = vmax.f32 %v561_v57, 0.0 }
  0x8f   : > { %v717_v48 = vpack.c.bf16 %v645_v58, %v642_v37  ;;  %v740_v37 = vpack.c.bf16 %v689_v16, %v686_v9  ;;  %v388_v58 = vunpack.c.l.bf16 %v293_v22  ;;  %v721_v41 = vpack.c.bf16 %v652_v28, %v649_v25  ;;  %v272_v16 = vld [vmem:[%s1633_s20 + $0xf0] sm:$0xff] }
  0x90   : > { %v725_v45 = vpack.c.bf16 %v659_v18, %v656_v31  ;;  %v662_v28 = vmax.f32 %v566_v62, 0.0  ;;  %v277_v18 = vld [vmem:[%s1633_s20 + $0x110] sm:$0xf]  ;;  %v356_v21 = vunpack.c.l.bf16 %v272_v16 }
  0x91   : > { %v492_v8 = vmul.f32 %v1635_v10, %v388_v58  ;;  %v364_v39 = vunpack.c.l.bf16 %v277_v18 }
  0x93   : > { %v596_v20 = vadd.f32 %v1639_v15, %v492_v8  ;;  %v468_v8 = vmul.f32 %v1635_v10, %v364_v39 }
  0x95   : > { %v692_v13 = vmax.f32 %v596_v20, 0.0 }
  0x9a   : > { %1417 = vmatmul.msk.bf16.gmra.mxu2 %vm892_vm0, %v722_v27 }
  0x9b   : > { %984 = vmatmul.bf16.gmra.mxu0 %v717_v48  ;;  %1113 = vmatmul.bf16.gmra.mxu3 %v1894_v49  ;;  %v552_v49 = vadd.f32 %v1681_v44, %v448_v19  ;;  %v454_v48 = vmul.f32 %v1660_v26, %v350_v32  ;;  %v279_v32 = vld [vmem:[%s1633_s20 + $0x11c] sm:$0xf] }
  0x9c   : > { %1073 = vmatmul.bf16.gmra.mxu1 %v718_v52  ;;  %v495_v52 = vmul.f32 %v1635_v10, %v391_v38  ;;  %v357_v38 = vunpack.c.h.bf16 %v272_v16  ;;  %v283_v16 = vld [vmem:[%s1633_s20 + $0x134] sm:$0xf] }
  0x9d   : > { %v1128_v3 = vpop.f32.mrf.mxu2  ;;  %v648_v14 = vmax.f32 %v552_v49, 0.0  ;;  %v558_v56 = vadd.f32 %v1681_v44, %v454_v48  ;;  %v562_v49 = vadd.f32 %v1690_v51, %v458_v11 }
  0x9e   : > { %v599_v4 = vadd.f32 %v1639_v15, %v495_v52  ;;  %v461_v47 = vmul.f32 %v1671_v36, %v357_v38 }
  0x9f   : > { %v720_v2 = vpack.c.bf16 %v651_v33, %v648_v14  ;;  %v654_v6 = vmax.f32 %v558_v56, 0.0  ;;  %v655_v33 = vmax.f32 %v559_v17, 0.0  ;;  %v658_v9 = vmax.f32 %v562_v49, 0.0 }
  0xa0   : > { %v695_v14 = vmax.f32 %v599_v4, 0.0  ;;  %v565_v56 = vadd.f32 %v1690_v51, %v461_v47 }
  0xa1   : > { %v723_v31 = vpack.c.bf16 %v657_v7, %v654_v6  ;;  %v724_v58 = vpack.c.bf16 %v658_v9, %v655_v33  ;;  %v278_v6 = vld [vmem:[%s1633_s20 + $0x114] sm:$0xff]  ;;  %v281_v9 = vld [vmem:[%s1633_s20 + $0x128] sm:$0xf] }
  0xa2   : > { %v743_v34 = vpack.c.bf16 %v695_v14, %v692_v13 }
  0xa5   : > { %v1130_v40 = vpop.f32.mrf.mxu2 }
  0xa8   : > { %v950_v59 = vpop.f32.mrf.mxu0 }
  0xa9   : > { %v951_v43 = vadd.f32 %v1959_v30, %v950_v59  ;;  %v1039_v5 = vpop.f32.mrf.mxu1  ;;  %v360_v59 = vunpack.c.h.bf16 %v274_v23 }
  0xaa   : > { %1418 = vmatmul.msk.bf16.gmra.mxu2 %vm892_vm0, %v725_v45  ;;  %v460_v45 = vmul.f32 %v1660_v26, %v356_v21 }
  0xab   : > { %v1040_v50 = vadd.f32 %v1039_v5, %v951_v43  ;;  %989 = vmatmul.bf16.gmra.mxu0 %v720_v2  ;;  %1423 = vmatmul.msk.bf16.vlgmr.msra.gmra.mxu3 %vm892_vm0, %v740_v37  ;;  %v367_v43 = vunpack.c.l.bf16 %v279_v32  ;;  %v464_v48 = vmul.f32 %v1671_v36, %v360_v59  ;;  %v366_v32 = vunpack.c.h.bf16 %v278_v6 }
  0xac   : > { %1078 = vmatmul.bf16.gmra.mxu1 %v721_v41  ;;  %v564_v11 = vadd.f32 %v1681_v44, %v460_v45 }
  0xad   : > { %v1129_v27 = vadd.f32 %v1128_v3, %v1040_v50  ;;  %v1133_v60 = vpop.f32.mrf.mxu2  ;;  %v569_v3 = vadd.f32 %v1639_v15, %v465_v55  ;;  %v471_v52 = vmul.f32 %v1635_v10, %v367_v43  ;;  %v568_v57 = vadd.f32 %v1690_v51, %v464_v48 }
  0xae   : > { %v1974_v19 = vpop.f32.mrf.mxu3  ;;  %v660_v49 = vmax.f32 %v564_v11, 0.0 }
  0xaf   : > { %1473 = vtanh.f32 %v1129_v27  ;;  %v665_v22 = vmax.f32 %v569_v3, 0.0  ;;  %v567_v27 = vadd.f32 %v1681_v44, %v463_v46  ;;  %v664_v62 = vmax.f32 %v568_v57, 0.0  ;;  %v276_v3 = vld [vmem:[%s1633_s20 + $0x108] sm:$0xff] }
  0xb0   : > { %v952_v61 = vpop.f32.mrf.mxu0  ;;  %v363_v18 = vunpack.c.h.bf16 %v276_v3 }
  0xb1   : > { %v953_v63 = vadd.f32 %v1959_v30, %v952_v61  ;;  %v1041_v0 = vpop.f32.mrf.mxu1  ;;  %v728_v42 = vpack.c.bf16 %v665_v22, %v662_v28  ;;  %v575_v61 = vadd.f32 %v1639_v15, %v471_v52 }
  0xb3   : > { %v1042_v12 = vadd.f32 %v1041_v0, %v953_v63  ;;  %v663_v63 = vmax.f32 %v567_v27, 0.0  ;;  %v661_v0 = vmax.f32 %v565_v56, 0.0  ;;  %v671_v14 = vmax.f32 %v575_v61, 0.0  ;;  %v285_v61 = vld [vmem:[%s1633_s20 + $0x140] sm:$0xf] }
  0xb5   : > { %v1474_v24 = vpop.eup %1473  ;;  %v1131_v25 = vadd.f32 %v1130_v40, %v1042_v12  ;;  %v1135_v2 = vpop.f32.mrf.mxu2  ;;  %v726_v23 = vpack.c.bf16 %v663_v63, %v660_v49 }
  0xb6   : > { %1240 = vst [vmem:[%s1989_s24] sm:$0xff] %v1474_v24  ;;  %v1994_v29 = vpop.f32.mrf.mxu3  ;;  %v362_v24 = vunpack.c.l.bf16 %v276_v3 }
  0xb7   : > { %1475 = vtanh.f32 %v1131_v25  ;;  %v365_v25 = vunpack.c.l.bf16 %v278_v6 }
  0xb8   : > { %v955_v37 = vpop.f32.mrf.mxu0  ;;  %v466_v38 = vmul.f32 %v1660_v26, %v362_v24 }
  0xb9   : > { %v956_v41 = vadd.f32 %v1959_v30, %v955_v37  ;;  %v1044_v40 = vpop.f32.mrf.mxu1  ;;  %v373_v37 = vunpack.c.l.bf16 %v283_v16  ;;  %v469_v59 = vmul.f32 %v1660_v26, %v365_v25 }
  0xba   : > { %1419 = vmatmul.msk.bf16.gmra.mxu2 %vm892_vm0, %v728_v42  ;;  %v570_v46 = vadd.f32 %v1681_v44, %v466_v38 }
  0xbb   : > { %v1045_v5 = vadd.f32 %v1044_v40, %v956_v41  ;;  %994 = vmatmul.bf16.gmra.mxu0 %v723_v31  ;;  %1424 = vmatmul.msk.bf16.gmra.mxu3 %vm892_vm0, %v743_v34  ;;  %v727_v31 = vpack.c.bf16 %v664_v62, %v661_v0  ;;  %v467_v41 = vmul.f32 %v1671_v36, %v363_v18 }
  0xbc   : > { %1083 = vmatmul.bf16.gmra.mxu1 %v724_v58  ;;  %v470_v40 = vmul.f32 %v1671_v36, %v366_v32  ;;  %v573_v26 = vadd.f32 %v1681_v44, %v469_v59 }
  0xbd   : > { %v1476_v1 = vpop.eup %1475  ;;  %v1134_v50 = vadd.f32 %v1133_v60, %v1045_v5  ;;  %v1138_v54 = vpop.f32.mrf.mxu2  ;;  %v572_v60 = vadd.f32 %v1639_v15, %v468_v8  ;;  %v477_v5 = vmul.f32 %v1635_v10, %v373_v37  ;;  %v571_v36 = vadd.f32 %v1690_v51, %v467_v41 }
  0xbe   : > { %1241 = vst [vmem:[%s1989_s24 + $0x8] sm:$0xff] %v1476_v1  ;;  %v2008_v53 = vpop.f32.mrf.mxu3  ;;  %v574_v1 = vadd.f32 %v1690_v51, %v470_v40 }
  0xbf   : > { %1477 = vtanh.f32 %v1134_v50  ;;  %v668_v13 = vmax.f32 %v572_v60, 0.0  ;;  %v581_v11 = vadd.f32 %v1639_v15, %v477_v5  ;;  %v667_v44 = vmax.f32 %v571_v36, 0.0 }
  0xc0   : > { %v957_v55 = vpop.f32.mrf.mxu0  ;;  %v670_v56 = vmax.f32 %v574_v1, 0.0 }
  0xc1   : > { %v958_v20 = vadd.f32 %v1959_v30, %v957_v55  ;;  %v1046_v4 = vpop.f32.mrf.mxu1  ;;  %v731_v35 = vpack.c.bf16 %v671_v14, %v668_v13  ;;  %v669_v55 = vmax.f32 %v573_v26, 0.0  ;;  %v677_v60 = vmax.f32 %v581_v11, 0.0 }
  0xc2   : > { %v730_v62 = vpack.c.bf16 %v670_v56, %v667_v44 }
  0xc3   : > { %v1047_v17 = vadd.f32 %v1046_v4, %v958_v20 }
  0xc5   : > { %v1478_v7 = vpop.eup %1477  ;;  %v1136_v12 = vadd.f32 %v1135_v2, %v1047_v17  ;;  %v1140_v28 = vpop.f32.mrf.mxu2  ;;  %v370_v2 = vunpack.c.l.bf16 %v281_v9  ;;  %v287_v17 = vld [vmem:[%s1633_s20 + $0x14c] sm:$0xf] }
  0xc6   : > { %1242 = vst [vmem:[%s1989_s24 + $0x10] sm:$0xff] %v1478_v7  ;;  %v2020_v33 = vpop.f32.mrf.mxu3  ;;  %v379_v13 = vunpack.c.l.bf16 %v287_v17 }
  0xc7   : > { %1479 = vtanh.f32 %v1136_v12  ;;  %v474_v43 = vmul.f32 %v1635_v10, %v370_v2  ;;  %v376_v12 = vunpack.c.l.bf16 %v285_v61 }
  0xc8   : > { %v960_v22 = vpop.f32.mrf.mxu0  ;;  %v483_v24 = vmul.f32 %v1635_v10, %v379_v13 }
  0xc9   : > { %v961_v34 = vadd.f32 %v1959_v30, %v960_v22  ;;  %v1049_v21 = vpop.f32.mrf.mxu1  ;;  %v578_v52 = vadd.f32 %v1639_v15, %v474_v43 }
  0xca   : > { %1420 = vmatmul.msk.bf16.gmra.mxu2 %vm892_vm0, %v731_v35 }
  0xcb   : > { %v1050_v58 = vadd.f32 %v1049_v21, %v961_v34  ;;  %999 = vmatmul.bf16.gmra.mxu0 %v726_v23  ;;  %v674_v4 = vmax.f32 %v578_v52, 0.0  ;;  %v480_v23 = vmul.f32 %v1635_v10, %v376_v12  ;;  %v587_v34 = vadd.f32 %v1639_v15, %v483_v24 }
  0xcc   : > { %1088 = vmatmul.bf16.gmra.mxu1 %v727_v31  ;;  %v1013_v52 = vadd.f32 %v1959_v30, %v1994_v29 }
  0xcd   : > { %v1480_v42 = vpop.eup %1479  ;;  %v1139_v39 = vadd.f32 %v1138_v54, %v1050_v58  ;;  %v1143_v47 = vpop.f32.mrf.mxu2  ;;  %v666_v54 = vmax.f32 %v570_v46, 0.0  ;;  %v734_v7 = vpack.c.bf16 %v677_v60, %v674_v4  ;;  %v584_v32 = vadd.f32 %v1639_v15, %v480_v23 }
  0xce   : > { %1243 = vst [vmem:[%s1989_s24 + $0x18] sm:$0xff] %v1480_v42  ;;  %v2033_v45 = vpop.f32.mrf.mxu3  ;;  %v683_v58 = vmax.f32 %v587_v34, 0.0  ;;  %v1011_v15 = vadd.f32 %v1959_v30, %v1974_v19  ;;  %v1016_v4 = vadd.f32 %v1959_v30, %v2008_v53 }
  0xcf   : > { %1481 = vtanh.f32 %v1139_v39  ;;  %v729_v49 = vpack.c.bf16 %v669_v55, %v666_v54  ;;  %v680_v37 = vmax.f32 %v584_v32, 0.0 }
  0xd0   : > { %v962_v48 = vpop.f32.mrf.mxu0 }
  0xd1   : > { %v963_v50 = vadd.f32 %v1959_v30, %v962_v48  ;;  %v1051_v8 = vpop.f32.mrf.mxu1  ;;  %v737_v42 = vpack.c.bf16 %v683_v58, %v680_v37 }
  0xd3   : > { %v1052_v27 = vadd.f32 %v1051_v8, %v963_v50 }
  0xd5   : > { %v1482_v57 = vpop.eup %1481  ;;  %v1141_v20 = vadd.f32 %v1140_v28, %v1052_v27  ;;  %v1145_v63 = vpop.f32.mrf.mxu2 }
  0xd6   : > { %1244 = vst [vmem:[%s1989_s24 + $0x20] sm:$0xff] %v1482_v57  ;;  %v2043_v51 = vpop.f32.mrf.mxu3 }
  0xd7   : > { %1483 = vtanh.f32 %v1141_v20 }
  0xd8   : > { %v965_v0 = vpop.f32.mrf.mxu0 }
  0xd9   : > { %v966_v3 = vadd.f32 %v1959_v30, %v965_v0  ;;  %v1054_v6 = vpop.f32.mrf.mxu1 }
  0xda   : > { %1421 = vmatmul.msk.bf16.gmra.mxu2 %vm892_vm0, %v734_v7 }
  0xdb   : > { %v1055_v14 = vadd.f32 %v1054_v6, %v966_v3  ;;  %1004 = vmatmul.bf16.gmra.mxu0 %v729_v49  ;;  %v1018_v6 = vadd.f32 %v1959_v30, %v2020_v33 }
  0xdc   : > { %1093 = vmatmul.bf16.gmra.mxu1 %v730_v62 }
  0xdd   : > { %v1484_v9 = vpop.eup %1483  ;;  %v1144_v16 = vadd.f32 %v1143_v47, %v1055_v14  ;;  %v1148_v28 = vpop.f32.mrf.mxu2 }
  0xde   : > { %1245 = vst [vmem:[%s1989_s24 + $0x28] sm:$0xff] %v1484_v9  ;;  %v2052_v25 = vpop.f32.mrf.mxu3 }
  0xdf   : > { %1485 = vtanh.f32 %v1144_v16 }
  0xe0   : > { %v967_v22 = vpop.f32.mrf.mxu0 }
  0xe1   : > { %v968_v31 = vadd.f32 %v1959_v30, %v967_v22  ;;  %v1056_v18 = vpop.f32.mrf.mxu1 }
  0xe3   : > { %v1057_v21 = vadd.f32 %v1056_v18, %v968_v31 }
  0xe5   : > { %v1486_v35 = vpop.eup %1485  ;;  %v1146_v2 = vadd.f32 %v1145_v63, %v1057_v21  ;;  %v1150_v38 = vpop.f32.mrf.mxu2 }
  0xe6   : > { %1246 = vst [vmem:[%s1989_s24 + $0x30] sm:$0xff] %v1486_v35  ;;  %v2058_v10 = vpop.f32.mrf.mxu3 }
  0xe7   : > { %1487 = vtanh.f32 %v1146_v2 }
  0xe8   : > { %v970_v59 = vpop.f32.mrf.mxu0 }
  0xe9   : > { %v971_v41 = vadd.f32 %v1959_v30, %v970_v59  ;;  %v1059_v40 = vpop.f32.mrf.mxu1 }
  0xea   : > { %1422 = vmatmul.msk.bf16.gmra.mxu2 %vm892_vm0, %v737_v42 }
  0xeb   : > { %v1060_v39 = vadd.f32 %v1059_v40, %v971_v41 }
  0xed   : > { %v1488_v43 = vpop.eup %1487  ;;  %v1149_v5 = vadd.f32 %v1148_v28, %v1060_v39  ;;  %v1153_v47 = vpop.f32.mrf.mxu2 }
  0xee   : > { %1247 = vst [vmem:[%s1989_s24 + $0x38] sm:$0xff] %v1488_v43  ;;  %v1099_v46 = vpop.f32.mrf.mxu3 }
  0xef   : > { %1489 = vtanh.f32 %v1149_v5  ;;  %v2065_v26 = vadd.f32 %v1099_v46, %v1011_v15 }
  0xf0   : > { %v972_v48 = vpop.f32.mrf.mxu0 }
  0xf1   : > { %v973_v36 = vadd.f32 %v1959_v30, %v972_v48  ;;  %v1061_v1 = vpop.f32.mrf.mxu1 }
  0xf3   : > { %v1062_v50 = vadd.f32 %v1061_v1, %v973_v36 }
  0xf5   : > { %v1490_v8 = vpop.eup %1489  ;;  %v1151_v19 = vadd.f32 %v1150_v38, %v1062_v50  ;;  %v1155_v54 = vpop.f32.mrf.mxu2 }
  0xf6   : > { %1248 = vst [vmem:[%s1989_s24 + $0x40] sm:$0xff] %v1490_v8  ;;  %v1101_v11 = vpop.f32.mrf.mxu3 }
  0xf7   : > { %1491 = vtanh.f32 %v1151_v19  ;;  %v2071_v27 = vadd.f32 %v1101_v11, %v1013_v52  ;;  %v1021_v11 = vadd.f32 %v1959_v30, %v2033_v45 }
  0xf8   : > { %v975_v55 = vpop.f32.mrf.mxu0 }
  0xf9   : > { %v976_v44 = vadd.f32 %v1959_v30, %v975_v55  ;;  %v1064_v56 = vpop.f32.mrf.mxu1 }
  0xfb   : > { %v1065_v57 = vadd.f32 %v1064_v56, %v976_v44 }
  0xfd   : > { %v1492_v20 = vpop.eup %1491  ;;  %v1154_v60 = vadd.f32 %v1153_v47, %v1065_v57  ;;  %v1158_v17 = vpop.f32.mrf.mxu2 }
  0xfe   : > { %1249 = vst [vmem:[%s1989_s24 + $0x48] sm:$0xff] %v1492_v20  ;;  %v1104_v29 = vpop.f32.mrf.mxu3 }
  0xff   : > { %1493 = vtanh.f32 %v1154_v60  ;;  %v2077_v61 = vadd.f32 %v1104_v29, %v1016_v4 }
 0x100   : > { %v977_v49 = vpop.f32.mrf.mxu0 }
 0x101   : > { %v978_v63 = vadd.f32 %v1959_v30, %v977_v49  ;;  %v1066_v0 = vpop.f32.mrf.mxu1  ;;  %v1023_v49 = vadd.f32 %v1959_v30, %v2043_v51  ;;  %v1026_v51 = vadd.f32 %v1959_v30, %v2052_v25  ;;  %v1028_v25 = vadd.f32 %v1959_v30, %v2058_v10 }
 0x103   : > { %v1067_v62 = vadd.f32 %v1066_v0, %v978_v63 }
 0x105   : > { %v1494_v3 = vpop.eup %1493  ;;  %v1156_v7 = vadd.f32 %v1155_v54, %v1067_v62  ;;  %v1160_v13 = vpop.f32.mrf.mxu2 }
 0x106   : > { %1250 = vst [vmem:[%s1989_s24 + $0x50] sm:$0xff] %v1494_v3  ;;  %v1106_v53 = vpop.f32.mrf.mxu3 }
 0x107   : > { %1495 = vtanh.f32 %v1156_v7  ;;  %v2083_v12 = vadd.f32 %v1106_v53, %v1018_v6 }
 0x108   : > { %v980_v14 = vpop.f32.mrf.mxu0 }
 0x109   : > { %v981_v9 = vadd.f32 %v1959_v30, %v980_v14  ;;  %v1069_v16 = vpop.f32.mrf.mxu1 }
 0x10b   : > { %v1070_v23 = vadd.f32 %v1069_v16, %v981_v9 }
 0x10d   : > { %v1496_v24 = vpop.eup %1495  ;;  %v1159_v28 = vadd.f32 %v1158_v17, %v1070_v23  ;;  %v1163_v31 = vpop.f32.mrf.mxu2 }
 0x10e   : > { %1251 = vst [vmem:[%s1989_s24 + $0x58] sm:$0xff] %v1496_v24  ;;  %v1109_v22 = vpop.f32.mrf.mxu3 }
 0x10f   : > { %1497 = vtanh.f32 %v1159_v28  ;;  %v1110_v44 = vadd.f32 %v1109_v22, %v1021_v11 }
 0x110   : > { %v982_v33 = vpop.f32.mrf.mxu0 }
 0x111   : > { %v983_v18 = vadd.f32 %v1959_v30, %v982_v33  ;;  %v1071_v32 = vpop.f32.mrf.mxu1 }
 0x113   : > { %v1072_v34 = vadd.f32 %v1071_v32, %v983_v18 }
 0x115   : > { %v1498_v21 = vpop.eup %1497  ;;  %v1161_v35 = vadd.f32 %v1160_v13, %v1072_v34  ;;  %v1165_v37 = vpop.f32.mrf.mxu2 }
 0x116   : > { %1252 = vst [vmem:[%s1989_s24 + $0x60] sm:$0xff] %v1498_v21  ;;  %v1111_v2 = vpop.f32.mrf.mxu3 }
 0x117   : > { %1499 = vtanh.f32 %v1161_v35  ;;  %v1112_v0 = vadd.f32 %v1111_v2, %v1023_v49 }
 0x118   : > { %v985_v58 = vpop.f32.mrf.mxu0 }
 0x119   : > { %v986_v38 = vadd.f32 %v1959_v30, %v985_v58  ;;  %v1074_v59 = vpop.f32.mrf.mxu1 }
 0x11b   : > { %v1075_v41 = vadd.f32 %v1074_v59, %v986_v38 }
 0x11d   : > { %v1500_v40 = vpop.eup %1499  ;;  %v1164_v42 = vadd.f32 %v1163_v31, %v1075_v41  ;;  %v1168_v43 = vpop.f32.mrf.mxu2 }
 0x11e   : > { %1253 = vst [vmem:[%s1989_s24 + $0x68] sm:$0xff] %v1500_v40  ;;  %v1114_v39 = vpop.f32.mrf.mxu3 }
 0x11f   : > { %1501 = vtanh.f32 %v1164_v42  ;;  %v1115_v24 = vadd.f32 %v1114_v39, %v1026_v51 }
 0x120   : > { %v987_v15 = vpop.f32.mrf.mxu0 }
 0x121   : > { %v988_v5 = vadd.f32 %v1959_v30, %v987_v15  ;;  %v1076_v46 = vpop.f32.mrf.mxu1 }
 0x123   : > { %v1077_v47 = vadd.f32 %v1076_v46, %v988_v5 }
 0x125   : > { %v1502_v48 = vpop.eup %1501  ;;  %v1166_v36 = vadd.f32 %v1165_v37, %v1077_v47  ;;  %v1170_v50 = vpop.f32.mrf.mxu2 }
 0x126   : > { %1254 = vst [vmem:[%s1989_s24 + $0x70] sm:$0xff] %v1502_v48  ;;  %v1116_v1 = vpop.f32.mrf.mxu3 }
 0x127   : > { %1503 = vtanh.f32 %v1166_v36  ;;  %v1117_v37 = vadd.f32 %v1116_v1, %v1028_v25 }
 0x128   : > { %v990_v8 = vpop.f32.mrf.mxu0 }
 0x129   : > { %v991_v52 = vadd.f32 %v1959_v30, %v990_v8  ;;  %v1079_v19 = vpop.f32.mrf.mxu1 }
 0x12b   : > { %v1080_v54 = vadd.f32 %v1079_v19, %v991_v52 }
 0x12d   : > { %v1504_v55 = vpop.eup %1503  ;;  %v1169_v56 = vadd.f32 %v1168_v43, %v1080_v54  ;;  %v1173_v4 = vpop.f32.mrf.mxu2 }
 0x12e   : > { %1255 = vst [vmem:[%s1989_s24 + $0x78] sm:$0xff] %v1504_v55  ;;  %v1198_v57 = vpop.f32.mrf.mxu3 }
 0x12f   : > { %1505 = vtanh.f32 %v1169_v56  ;;  %v1199_v20 = vadd.f32 %v1198_v57, %v1110_v44 }
 0x130   : > { %v992_v60 = vpop.f32.mrf.mxu0 }
 0x131   : > { %1507 = vtanh.f32 %v1199_v20  ;;  %v993_v29 = vadd.f32 %v1959_v30, %v992_v60  ;;  %v1081_v17 = vpop.f32.mrf.mxu1 }
 0x133   : > { %v1082_v45 = vadd.f32 %v1081_v17, %v993_v29 }
 0x135   : > { %v1506_v63 = vpop.eup %1505  ;;  %v1171_v62 = vadd.f32 %v1170_v50, %v1082_v45  ;;  %v1175_v53 = vpop.f32.mrf.mxu2 }
 0x136   : > { %1256 = vst [vmem:[%s1989_s24 + $0x80] sm:$0xff] %v1506_v63  ;;  %v1200_v3 = vpop.f32.mrf.mxu3 }
 0x137   : > { %v1508_v6 = vpop.eup %1507  ;;  %1509 = vtanh.f32 %v1171_v62  ;;  %v1201_v7 = vadd.f32 %v1200_v3, %v1112_v0 }
 0x138   : > { %1268 = vst [vmem:[%s1989_s24 + $0xe0] sm:$0xff] %v1508_v6  ;;  %v995_v13 = vpop.f32.mrf.mxu0 }
 0x139   : > { %1511 = vtanh.f32 %v1201_v7  ;;  %v996_v14 = vadd.f32 %v1959_v30, %v995_v13  ;;  %v1084_v9 = vpop.f32.mrf.mxu1 }
 0x13b   : > { %v1085_v16 = vadd.f32 %v1084_v9, %v996_v14 }
 0x13d   : > { %v1510_v23 = vpop.eup %1509  ;;  %v1174_v28 = vadd.f32 %v1173_v4, %v1085_v16  ;;  %v1178_v18 = vpop.f32.mrf.mxu2 }
 0x13e   : > { %1257 = vst [vmem:[%s1989_s24 + $0x88] sm:$0xff] %v1510_v23  ;;  %v1203_v22 = vpop.f32.mrf.mxu3 }
 0x13f   : > { %v1512_v31 = vpop.eup %1511  ;;  %1513 = vtanh.f32 %v1174_v28  ;;  %v1204_v33 = vadd.f32 %v1203_v22, %v1115_v24 }
 0x140   : > { %1269 = vst [vmem:[%s1989_s24 + $0xe8] sm:$0xff] %v1512_v31  ;;  %v997_v32 = vpop.f32.mrf.mxu0 }
 0x141   : > { %1515 = vtanh.f32 %v1204_v33  ;;  %v998_v34 = vadd.f32 %v1959_v30, %v997_v32  ;;  %v1086_v21 = vpop.f32.mrf.mxu1 }
 0x143   : > { %v1087_v35 = vadd.f32 %v1086_v21, %v998_v34 }
 0x145   : > { %v1514_v2 = vpop.eup %1513  ;;  %v1176_v58 = vadd.f32 %v1175_v53, %v1087_v35  ;;  %v1180_v40 = vpop.f32.mrf.mxu2 }
 0x146   : > { %1258 = vst [vmem:[%s1989_s24 + $0x90] sm:$0xff] %v1514_v2  ;;  %v1205_v38 = vpop.f32.mrf.mxu3 }
 0x147   : > { %v1516_v59 = vpop.eup %1515  ;;  %1517 = vtanh.f32 %v1176_v58  ;;  %v1206_v41 = vadd.f32 %v1205_v38, %v1117_v37 }
 0x148   : > { %1270 = vst [vmem:[%s1989_s24 + $0xf0] sm:$0xff] %v1516_v59  ;;  %v1000_v42 = vpop.f32.mrf.mxu0 }
 0x149   : > { %1519 = vtanh.f32 %v1206_v41  ;;  %v1001_v39 = vadd.f32 %v1959_v30, %v1000_v42  ;;  %v1089_v43 = vpop.f32.mrf.mxu1 }
 0x14b   : > { %v1090_v10 = vadd.f32 %v1089_v43, %v1001_v39 }
 0x14d   : > { %v1518_v15 = vpop.eup %1517  ;;  %v1179_v5 = vadd.f32 %v1178_v18, %v1090_v10  ;;  %v1183_v47 = vpop.f32.mrf.mxu2 }
 0x14e   : > { %1259 = vst [vmem:[%s1989_s24 + $0x98] sm:$0xff] %v1518_v15 }
 0x14f   : > { %v1520_v46 = vpop.eup %1519  ;;  %1521 = vtanh.f32 %v1179_v5 }
 0x150   : > { %1271 = vst [vmem:[%s1989_s24 + $0xf8] sm:$0xff] %v1520_v46  ;;  %v1002_v48 = vpop.f32.mrf.mxu0 }
 0x151   : > { %v1003_v36 = vadd.f32 %v1959_v30, %v1002_v48  ;;  %v1091_v1 = vpop.f32.mrf.mxu1 }
 0x153   : > { %v1092_v50 = vadd.f32 %v1091_v1, %v1003_v36 }
 0x155   : > { %v1522_v8 = vpop.eup %1521  ;;  %v1181_v52 = vadd.f32 %v1180_v40, %v1092_v50  ;;  %v1185_v19 = vpop.f32.mrf.mxu2 }
 0x156   : > { %1260 = vst [vmem:[%s1989_s24 + $0xa0] sm:$0xff] %v1522_v8 }
 0x157   : > { %1523 = vtanh.f32 %v1181_v52 }
 0x158   : > { %v1005_v11 = vpop.f32.mrf.mxu0 }
 0x159   : > { %v1006_v54 = vadd.f32 %v1959_v30, %v1005_v11  ;;  %v1094_v55 = vpop.f32.mrf.mxu1 }
 0x15b   : > { %v1095_v44 = vadd.f32 %v1094_v55, %v1006_v54 }
 0x15d   : > { %v1524_v56 = vpop.eup %1523  ;;  %v1184_v57 = vadd.f32 %v1183_v47, %v1095_v44  ;;  %v1188_v20 = vpop.f32.mrf.mxu2 }
 0x15e   : > { %1261 = vst [vmem:[%s1989_s24 + $0xa8] sm:$0xff] %v1524_v56  ;;  %v1189_v60 = vadd.f32 %v1188_v20, %v2065_v26 }
 0x15f   : > { %1525 = vtanh.f32 %v1184_v57 }
 0x160   : > { %v1007_v4 = vpop.f32.mrf.mxu0  ;;  %1527 = vtanh.f32 %v1189_v60 }
 0x161   : > { %v1008_v29 = vadd.f32 %v1959_v30, %v1007_v4  ;;  %v1096_v17 = vpop.f32.mrf.mxu1 }
 0x163   : > { %v1097_v49 = vadd.f32 %v1096_v17, %v1008_v29 }
 0x165   : > { %v1526_v45 = vpop.eup %1525  ;;  %v1186_v63 = vadd.f32 %v1185_v19, %v1097_v49  ;;  %v1190_v0 = vpop.f32.mrf.mxu2 }
 0x166   : > { %1262 = vst [vmem:[%s1989_s24 + $0xb0] sm:$0xff] %v1526_v45  ;;  %v1528_v62 = vpop.eup %1527  ;;  %v1191_v3 = vadd.f32 %v1190_v0, %v2071_v27 }
 0x167   : > { %1529 = vtanh.f32 %v1186_v63  ;;  %1264 = vst [vmem:[%s1989_s24 + $0xc0] sm:$0xff] %v1528_v62 }
 0x168   : > { %1531 = vtanh.f32 %v1191_v3 }
 0x16d   : > { %v1530_v6 = vpop.eup %1529  ;;  %v1193_v26 = vpop.f32.mrf.mxu2 }
 0x16e   : > { %1263 = vst [vmem:[%s1989_s24 + $0xb8] sm:$0xff] %v1530_v6  ;;  %v1532_v30 = vpop.eup %1531  ;;  %v1194_v7 = vadd.f32 %v1193_v26, %v2077_v61 }
 0x16f   : > { %1265 = vst [vmem:[%s1989_s24 + $0xc8] sm:$0xff] %v1532_v30 }
 0x170   : > { %1533 = vtanh.f32 %v1194_v7 }
 0x175   : > { %v1195_v53 = vpop.f32.mrf.mxu2 }
 0x176   : > { %v1534_v13 = vpop.eup %1533  ;;  %v1196_v14 = vadd.f32 %v1195_v53, %v2083_v12 }
 0x177   : > { %1266 = vst [vmem:[%s1989_s24 + $0xd0] sm:$0xff] %v1534_v13 }
 0x178   : > { %1535 = vtanh.f32 %v1196_v14 }
 0x17e   : > { %v1536_v9 = vpop.eup %1535 }
 0x17f   : > { %1267 = vst [vmem:[%s1989_s24 + $0xd8] sm:$0xff] %v1536_v9 }
 0x180 PF: > { %s15_s18 = sadd.s32 1, %s1543_s18  }
 0x181   : > { %p12_p4 = scmp.ge.s32.totalorder %s15_s18, 4  }
 0x183   :  { %14 = sbr.rel (!%p12_p4) target bundleno = 1 (0x1), region = 70 }

</bundles_post_ra>
